<compile_context>
chip_gen: v5e
topology: v5e:2x2
jax: 0.10.0
libtpu: 0.0.40
codegen_flags: <defaults>
</compile_context>

<pallas_src>
import functools

import jax
import jax.numpy as jnp
from jax import lax
from jax.experimental import pallas as pl
from jax.experimental.pallas import tpu as pltpu


_LANE = 128      # pad channel dims to this (lane width)
_SUBLANE = 8     # pad the width axis to this (sublane width)


def _round_up(x, m):
    return (x + m - 1) // m * m


def _fold_bn(gamma, beta, mean, var, eps=1e-5):
    scale = gamma / jnp.sqrt(var + eps)
    shift = beta - mean * scale
    return scale, shift


def _double_conv_kernel(x_hbm, w1_ref, s1_ref, b1_ref, w2_ref, s2_ref, b2_ref,
                        o_ref, x_vmem, p1_ref, p2_ref, copy_sem,
                        *, TH, Wp, H, W):
    # x_hbm : (N, (Hp+5)*Wp, Cinp) bf16 in HBM (pixel-major, 2-px zero halo baked in)
    # w*_ref: (9*Cp_in, Cp_out) bf16   s*/b*_ref: (1, Cp_out) f32 (folded BN)
    # o_ref : (1, TH, Wout_p, Coutp) f32
    Cinp = x_vmem.shape[-1]
    Cmidp = w1_ref.shape[-1]
    Coutp = w2_ref.shape[-1]
    Rv = TH + 5            # input rows per tile: 2 halo top, 2 halo + 1 slack bottom
    R1 = TH + 2            # conv1 extended rows (1-row halo each side for conv2)
    M1 = R1 * Wp           # conv1 flat (row*width) output rows
    M2 = TH * Wp           # conv2 flat output rows
    Wout_p = o_ref.shape[2]

    n = pl.program_id(0)
    i = pl.program_id(1)

    # Manual DMA of the overlapping (TH+5)-row input slab (halo overlap cannot be
    # expressed with Blocked BlockSpecs).
    cp = pltpu.make_async_copy(
        x_hbm.at[n, pl.ds(i * (TH * Wp), Rv * Wp)], x_vmem, copy_sem)
    cp.start()
    cp.wait()

    a = x_vmem[...]                                     # (Rv*Wp, Cinp) bf16

    # ---- conv1: im2col into VMEM scratch, single K = 9*Cinp matmul ----
    for ky in range(3):
        for kx in range(3):
            k = ky * 3 + kx
            off = ky * Wp + kx                          # flat pixel shift for this tap
            p1_ref[:, k * Cinp:(k + 1) * Cinp] = a[off:off + M1, :]
    y1 = jnp.dot(p1_ref[...], w1_ref[...], preferred_element_type=jnp.float32)
    y1 = jnp.maximum(y1 * s1_ref[...] + b1_ref[...], 0.0)   # folded BN + ReLU (f32)

    # Zero conv1 values outside the real image: those positions are conv2's zero
    # padding (rows depend on the tile index, columns are static).
    e3 = lax.broadcasted_iota(jnp.int32, (R1, Wp, 1), 0)
    f3 = lax.broadcasted_iota(jnp.int32, (R1, Wp, 1), 1)
    g_row = i * TH - 1 + e3
    valid = (g_row >= 0) & (g_row < H) & (f3 >= 1) & (f3 <= W)
    t = jnp.where(valid, y1.reshape(R1, Wp, Cmidp), 0.0)
    t = t.astype(jnp.bfloat16).reshape(M1, Cmidp)
    # slack rows so the shifted tap slices below never index out of bounds
    t = jnp.concatenate([t, jnp.zeros((Wp, Cmidp), jnp.bfloat16)], axis=0)

    # ---- conv2: same im2col trick on the in-VMEM intermediate ----
    for ky in range(3):
        for kx in range(3):
            k = ky * 3 + kx
            off = ky * Wp + kx
            p2_ref[:, k * Cmidp:(k + 1) * Cmidp] = t[off:off + M2, :]
    y2 = jnp.dot(p2_ref[...], w2_ref[...], preferred_element_type=jnp.float32)
    y2 = jnp.maximum(y2 * s2_ref[...] + b2_ref[...], 0.0)

    o_ref[0] = y2.reshape(TH, Wp, Coutp)[:, :Wout_p, :].astype(o_ref.dtype)


def _prep_conv_weight(w_oihw, cin_p, cout_p):
    co, ci, kh, kw = w_oihw.shape
    w_hwio = jnp.transpose(w_oihw, (2, 3, 1, 0))                     # (3,3,Ci,Co)
    w_hwio = jnp.pad(w_hwio, ((0, 0), (0, 0), (0, cin_p - ci), (0, cout_p - co)))
    return w_hwio.reshape(kh * kw * cin_p, cout_p).astype(jnp.bfloat16)


def _pad_vec(v, cp):
    return jnp.pad(v.astype(jnp.float32), (0, cp - v.shape[0])).reshape(1, cp)


def double_conv_forward(x_nchw, params, row_tile=8):
    """Matches DoubleConv.forward (BatchNorm in eval mode). NCHW in/out, f32."""
    N, Cin, H, W = x_nchw.shape
    w1 = params["w1_oihw"]
    w2 = params["w2_oihw"]
    Cmid, Cout = w1.shape[0], w2.shape[0]

    Cinp = _round_up(Cin, _LANE)
    Cmidp = _round_up(Cmid, _LANE)
    Coutp = _round_up(Cout, _LANE)

    TH = min(row_tile, H)                 # output rows per grid step (VMEM knob)
    n_tiles = -(-H // TH)
    Hp = n_tiles * TH
    Wp = _round_up(W + 4, _SUBLANE)       # in-kernel width incl. 2-px halo each side
    Wout_p = _round_up(W, _SUBLANE)
    Hprep = Hp + 5

    # Layout prep: NCHW->NHWC, bf16, 2-px spatial zero halo + lane padding,
    # flattened pixel-major.  Fuses into one XLA pass under jit.
    x_nhwc = jnp.transpose(x_nchw, (0, 2, 3, 1)).astype(jnp.bfloat16)
    x_prep = jnp.pad(x_nhwc, ((0, 0), (2, Hprep - 2 - H),
                              (2, Wp - 2 - W), (0, Cinp - Cin)))
    x_prep = x_prep.reshape(N, Hprep * Wp, Cinp)

    w1r = _prep_conv_weight(w1, Cinp, Cmidp)
    w2r = _prep_conv_weight(w2, Cmidp, Coutp)
    s1, b1 = _fold_bn(params["bn1_gamma"], params["bn1_beta"],
                      params["bn1_mean"], params["bn1_var"])
    s2, b2 = _fold_bn(params["bn2_gamma"], params["bn2_beta"],
                      params["bn2_mean"], params["bn2_var"])
    s1, b1 = _pad_vec(s1, Cmidp), _pad_vec(b1, Cmidp)
    s2, b2 = _pad_vec(s2, Coutp), _pad_vec(b2, Coutp)

    M1 = (TH + 2) * Wp
    M2 = TH * Wp

    kernel = functools.partial(_double_conv_kernel, TH=TH, Wp=Wp, H=H, W=W)

    y = pl.pallas_call(
        kernel,
        out_shape=jax.ShapeDtypeStruct((N, Hp, Wout_p, Coutp), jnp.float32),
        grid_spec=pltpu.PrefetchScalarGridSpec(
            num_scalar_prefetch=0,
            grid=(N, n_tiles),
            in_specs=[
                pl.BlockSpec(memory_space=pl.ANY),                      # x (HBM)
                pl.BlockSpec((9 * Cinp, Cmidp), lambda n, i: (0, 0)),   # w1
                pl.BlockSpec((1, Cmidp), lambda n, i: (0, 0)),          # bn1 scale
                pl.BlockSpec((1, Cmidp), lambda n, i: (0, 0)),          # bn1 shift
                pl.BlockSpec((9 * Cmidp, Coutp), lambda n, i: (0, 0)),  # w2
                pl.BlockSpec((1, Coutp), lambda n, i: (0, 0)),          # bn2 scale
                pl.BlockSpec((1, Coutp), lambda n, i: (0, 0)),          # bn2 shift
            ],
            out_specs=pl.BlockSpec((1, TH, Wout_p, Coutp),
                                   lambda n, i: (n, i, 0, 0)),
            scratch_shapes=[
                pltpu.VMEM(((TH + 5) * Wp, Cinp), jnp.bfloat16),   # input slab
                pltpu.VMEM((M1, 9 * Cinp), jnp.bfloat16),          # im2col conv1
                pltpu.VMEM((M2, 9 * Cmidp), jnp.bfloat16),         # im2col conv2
                pltpu.SemaphoreType.DMA,
            ]),
        compiler_params=pltpu.CompilerParams(
            dimension_semantics=("parallel", "parallel"),
            # raise further if row_tile / channels are sized above the default
            # scoped VMEM limit (16 MiB v5e / 32 MiB v6e,v7x)
            vmem_limit_bytes=32 * 1024 * 1024),
    )(x_prep, w1r, s1, b1, w2r, s2, b2)

    y = y[:, :H, :W, :Cout]                       # strip row/col/channel padding
    return jnp.transpose(y, (0, 3, 1, 2))         # NHWC -> NCHW


def init_params(key, in_channels, out_channels):
    ks = jax.random.split(key, 8)
    # PyTorch Conv2d weight layout: (Cout, Cin, kH, kW), bias=False.
    w1 = 0.1 * jax.random.normal(ks[0], (out_channels, in_channels, 3, 3), jnp.float32)
    w2 = 0.1 * jax.random.normal(ks[1], (out_channels, out_channels, 3, 3), jnp.float32)
    return {
        "w1_oihw": w1,
        "w2_oihw": w2,
        "bn1_gamma": 1.0 + 0.1 * jax.random.normal(ks[2], (out_channels,), jnp.float32),
        "bn1_beta": 0.1 * jax.random.normal(ks[3], (out_channels,), jnp.float32),
        "bn1_mean": 0.05 * jax.random.normal(ks[4], (out_channels,), jnp.float32),
        "bn1_var": jnp.abs(jax.random.normal(ks[5], (out_channels,), jnp.float32)) + 0.5,
        "bn2_gamma": 1.0 + 0.1 * jax.random.normal(ks[6], (out_channels,), jnp.float32),
        "bn2_beta": 0.1 * jax.random.normal(ks[7], (out_channels,), jnp.float32),
        "bn2_mean": jnp.zeros((out_channels,), jnp.float32),
        "bn2_var": jnp.ones((out_channels,), jnp.float32),
    }


if __name__ == "__main__":
    N, C_IN, C_OUT, H, W = 2, 4, 8, 16, 16

    key = jax.random.PRNGKey(0)
    k_x, k_p = jax.random.split(key)
    x = jax.random.normal(k_x, (N, C_IN, H, W), jnp.float32)   # NCHW like PyTorch
    params = init_params(k_p, C_IN, C_OUT)

    fwd = jax.jit(functools.partial(double_conv_forward, row_tile=8))
    out = jax.block_until_ready(fwd(x, params))
    assert out.shape == (N, C_OUT, H, W), out.shape

    # Plain-JAX f32 reference of the same forward pass (kernel runs the matmuls
    # in bf16, hence the loosened tolerance).
    def ref_forward(x_nchw):
        def conv_bn_relu(xh, w_oihw, g, b, m, v):
            w = jnp.transpose(w_oihw, (2, 3, 1, 0))
            yh = jax.lax.conv_general_dilated(
                xh, w, window_strides=(1, 1), padding="SAME",
                dimension_numbers=("NHWC", "HWIO", "NHWC"))
            s, sh = _fold_bn(g, b, m, v)
            return jnp.maximum(yh * s + sh, 0.0)

        xh = jnp.transpose(x_nchw, (0, 2, 3, 1))
        yh = conv_bn_relu(xh, params["w1_oihw"], params["bn1_gamma"],
                          params["bn1_beta"], params["bn1_mean"], params["bn1_var"])
        yh = conv_bn_relu(yh, params["w2_oihw"], params["bn2_gamma"],
                          params["bn2_beta"], params["bn2_mean"], params["bn2_var"])
        return jnp.transpose(yh, (0, 3, 1, 2))

    ref = jax.block_until_ready(ref_forward(x))
    max_err = float(jnp.max(jnp.abs(out - ref)))
    assert jnp.allclose(out, ref, atol=5e-2, rtol=5e-2), max_err

    print("KERNEL_OK")
</pallas_src>

<mosaic_0001>
module attributes {stable_mosaic.version = 11 : i64} {
  func.func @_double_conv_kernel(%arg0: i32, %arg1: i32, %arg2: memref<2x504x128xbf16, #tpu.memory_space<any>>, %arg3: memref<1152x128xbf16, #tpu.memory_space<vmem>>, %arg4: memref<1x128xf32, #tpu.memory_space<vmem>>, %arg5: memref<1x128xf32, #tpu.memory_space<vmem>>, %arg6: memref<1152x128xbf16, #tpu.memory_space<vmem>>, %arg7: memref<1x128xf32, #tpu.memory_space<vmem>>, %arg8: memref<1x128xf32, #tpu.memory_space<vmem>>, %arg9: memref<1x8x16x128xf32, #tpu.memory_space<vmem>>, %arg10: memref<312x128xbf16, #tpu.memory_space<vmem>>, %arg11: memref<240x1152xbf16, #tpu.memory_space<vmem>>, %arg12: memref<192x1152xbf16, #tpu.memory_space<vmem>>, %arg13: memref<!tpu.dma_semaphore, #tpu.memory_space<semaphore_mem>>) attributes {dimension_semantics = [#tpu.dimension_semantics<parallel>, #tpu.dimension_semantics<parallel>], iteration_bounds = array<i64: 2, 2>, scalar_prefetch = 0 : i64, scratch_operands = 4 : i64, tpu.core_type = #tpu.core_type<tc>, window_params = [{}, {pipeline_mode = #tpu.pipeline_mode<synchronous>, transform_indices = @transform_1, window_bounds = array<i64: 1152, 128>}, {pipeline_mode = #tpu.pipeline_mode<synchronous>, transform_indices = @transform_2, window_bounds = array<i64: 1, 128>}, {pipeline_mode = #tpu.pipeline_mode<synchronous>, transform_indices = @transform_3, window_bounds = array<i64: 1, 128>}, {pipeline_mode = #tpu.pipeline_mode<synchronous>, transform_indices = @transform_4, window_bounds = array<i64: 1152, 128>}, {pipeline_mode = #tpu.pipeline_mode<synchronous>, transform_indices = @transform_5, window_bounds = array<i64: 1, 128>}, {pipeline_mode = #tpu.pipeline_mode<synchronous>, transform_indices = @transform_6, window_bounds = array<i64: 1, 128>}, {transform_indices = @transform_7, window_bounds = array<i64: 1, 8, 16, 128>}]} {
    %c192_i32 = arith.constant 192 : i32
    %0 = arith.muli %arg1, %c192_i32 : i32
    %c0_i32 = arith.constant 0 : i32
    %1 = tpu.memref_slice %arg2[%arg0, %0, %c0_i32] : memref<2x504x128xbf16, #tpu.memory_space<any>> -> memref<1x312x128xbf16, #tpu.memory_space<any>>
    %2 = tpu.memref_squeeze %1 : memref<1x312x128xbf16, #tpu.memory_space<any>> -> memref<312x128xbf16, #tpu.memory_space<any>>
    tpu.enqueue_dma source(%2 : memref<312x128xbf16, #tpu.memory_space<any>>) target(%arg10 : memref<312x128xbf16, #tpu.memory_space<vmem>>) target_semaphore(%arg13 : memref<!tpu.dma_semaphore, #tpu.memory_space<semaphore_mem>>)
    %c0_i32_0 = arith.constant 0 : i32
    %3 = tpu.memref_slice %arg2[%arg0, %0, %c0_i32_0] : memref<2x504x128xbf16, #tpu.memory_space<any>> -> memref<1x312x128xbf16, #tpu.memory_space<any>>
    %4 = tpu.memref_squeeze %3 : memref<1x312x128xbf16, #tpu.memory_space<any>> -> memref<312x128xbf16, #tpu.memory_space<any>>
    tpu.wait_dma2 semaphore(%arg13 : memref<!tpu.dma_semaphore, #tpu.memory_space<semaphore_mem>>) src(%4 : memref<312x128xbf16, #tpu.memory_space<any>>) dst(%arg10 : memref<312x128xbf16, #tpu.memory_space<vmem>>)
    %c0 = arith.constant 0 : index
    %c0_1 = arith.constant 0 : index
    %5 = vector.load %arg10[%c0, %c0_1] : memref<312x128xbf16, #tpu.memory_space<vmem>>, vector<312x128xbf16>
    %6 = vector.extract_strided_slice %5 {offsets = [0, 0], sizes = [240, 128], strides = [1, 1]} : vector<312x128xbf16> to vector<240x128xbf16>
    %c0_2 = arith.constant 0 : index
    %c0_3 = arith.constant 0 : index
    %7 = vector.load %arg11[%c0_2, %c0_3] : memref<240x1152xbf16, #tpu.memory_space<vmem>>, vector<240x128xbf16>
    tpu.vector_store %arg11[%c0_2, %c0_3], %6 {strides = array<i32>} : memref<240x1152xbf16, #tpu.memory_space<vmem>>, vector<240x128xbf16>,
    %8 = vector.extract_strided_slice %5 {offsets = [1, 0], sizes = [240, 128], strides = [1, 1]} : vector<312x128xbf16> to vector<240x128xbf16>
    %c0_4 = arith.constant 0 : index
    %c128 = arith.constant 128 : index
    %9 = vector.load %arg11[%c0_4, %c128] : memref<240x1152xbf16, #tpu.memory_space<vmem>>, vector<240x128xbf16>
    tpu.vector_store %arg11[%c0_4, %c128], %8 {strides = array<i32>} : memref<240x1152xbf16, #tpu.memory_space<vmem>>, vector<240x128xbf16>,
    %10 = vector.extract_strided_slice %5 {offsets = [2, 0], sizes = [240, 128], strides = [1, 1]} : vector<312x128xbf16> to vector<240x128xbf16>
    %c0_5 = arith.constant 0 : index
    %c256 = arith.constant 256 : index
    %11 = vector.load %arg11[%c0_5, %c256] : memref<240x1152xbf16, #tpu.memory_space<vmem>>, vector<240x128xbf16>
    tpu.vector_store %arg11[%c0_5, %c256], %10 {strides = array<i32>} : memref<240x1152xbf16, #tpu.memory_space<vmem>>, vector<240x128xbf16>,
    %12 = vector.extract_strided_slice %5 {offsets = [24, 0], sizes = [240, 128], strides = [1, 1]} : vector<312x128xbf16> to vector<240x128xbf16>
    %c0_6 = arith.constant 0 : index
    %c384 = arith.constant 384 : index
    %13 = vector.load %arg11[%c0_6, %c384] : memref<240x1152xbf16, #tpu.memory_space<vmem>>, vector<240x128xbf16>
    tpu.vector_store %arg11[%c0_6, %c384], %12 {strides = array<i32>} : memref<240x1152xbf16, #tpu.memory_space<vmem>>, vector<240x128xbf16>,
    %14 = vector.extract_strided_slice %5 {offsets = [25, 0], sizes = [240, 128], strides = [1, 1]} : vector<312x128xbf16> to vector<240x128xbf16>
    %c0_7 = arith.constant 0 : index
    %c512 = arith.constant 512 : index
    %15 = vector.load %arg11[%c0_7, %c512] : memref<240x1152xbf16, #tpu.memory_space<vmem>>, vector<240x128xbf16>
    tpu.vector_store %arg11[%c0_7, %c512], %14 {strides = array<i32>} : memref<240x1152xbf16, #tpu.memory_space<vmem>>, vector<240x128xbf16>,
    %16 = vector.extract_strided_slice %5 {offsets = [26, 0], sizes = [240, 128], strides = [1, 1]} : vector<312x128xbf16> to vector<240x128xbf16>
    %c0_8 = arith.constant 0 : index
    %c640 = arith.constant 640 : index
    %17 = vector.load %arg11[%c0_8, %c640] : memref<240x1152xbf16, #tpu.memory_space<vmem>>, vector<240x128xbf16>
    tpu.vector_store %arg11[%c0_8, %c640], %16 {strides = array<i32>} : memref<240x1152xbf16, #tpu.memory_space<vmem>>, vector<240x128xbf16>,
    %18 = vector.extract_strided_slice %5 {offsets = [48, 0], sizes = [240, 128], strides = [1, 1]} : vector<312x128xbf16> to vector<240x128xbf16>
    %c0_9 = arith.constant 0 : index
    %c768 = arith.constant 768 : index
    %19 = vector.load %arg11[%c0_9, %c768] : memref<240x1152xbf16, #tpu.memory_space<vmem>>, vector<240x128xbf16>
    tpu.vector_store %arg11[%c0_9, %c768], %18 {strides = array<i32>} : memref<240x1152xbf16, #tpu.memory_space<vmem>>, vector<240x128xbf16>,
    %20 = vector.extract_strided_slice %5 {offsets = [49, 0], sizes = [240, 128], strides = [1, 1]} : vector<312x128xbf16> to vector<240x128xbf16>
    %c0_10 = arith.constant 0 : index
    %c896 = arith.constant 896 : index
    %21 = vector.load %arg11[%c0_10, %c896] : memref<240x1152xbf16, #tpu.memory_space<vmem>>, vector<240x128xbf16>
    tpu.vector_store %arg11[%c0_10, %c896], %20 {strides = array<i32>} : memref<240x1152xbf16, #tpu.memory_space<vmem>>, vector<240x128xbf16>,
    %22 = vector.extract_strided_slice %5 {offsets = [50, 0], sizes = [240, 128], strides = [1, 1]} : vector<312x128xbf16> to vector<240x128xbf16>
    %c0_11 = arith.constant 0 : index
    %c1024 = arith.constant 1024 : index
    %23 = vector.load %arg11[%c0_11, %c1024] : memref<240x1152xbf16, #tpu.memory_space<vmem>>, vector<240x128xbf16>
    tpu.vector_store %arg11[%c0_11, %c1024], %22 {strides = array<i32>} : memref<240x1152xbf16, #tpu.memory_space<vmem>>, vector<240x128xbf16>,
    %c0_12 = arith.constant 0 : index
    %c0_13 = arith.constant 0 : index
    %24 = vector.load %arg11[%c0_12, %c0_13] : memref<240x1152xbf16, #tpu.memory_space<vmem>>, vector<240x1152xbf16>
    %c0_14 = arith.constant 0 : index
    %c0_15 = arith.constant 0 : index
    %25 = vector.load %arg3[%c0_14, %c0_15] : memref<1152x128xbf16, #tpu.memory_space<vmem>>, vector<1152x128xbf16>
    %cst = arith.constant dense<0.000000e+00> : vector<240x128xf32>
    %26 = tpu.matmul %24, %25, %cst {dimension_numbers = #tpu.dot_dimension_numbers<[1], [0], [0], [1], [0, 0, 1, 1], [], []>} : vector<240x1152xbf16>, vector<1152x128xbf16>, vector<240x128xf32> -> vector<240x128xf32>
    %c0_16 = arith.constant 0 : index
    %c0_17 = arith.constant 0 : index
    %27 = vector.load %arg4[%c0_16, %c0_17] : memref<1x128xf32, #tpu.memory_space<vmem>>, vector<1x128xf32>
    %28 = vector.broadcast %27 : vector<1x128xf32> to vector<240x128xf32>
    %29 = arith.mulf %26, %28 : vector<240x128xf32>
    %c0_18 = arith.constant 0 : index
    %c0_19 = arith.constant 0 : index
    %30 = vector.load %arg5[%c0_18, %c0_19] : memref<1x128xf32, #tpu.memory_space<vmem>>, vector<1x128xf32>
    %31 = vector.broadcast %30 : vector<1x128xf32> to vector<240x128xf32>
    %32 = arith.addf %29, %31 : vector<240x128xf32>
    %cst_20 = arith.constant 0.000000e+00 : f32
    %33 = vector.broadcast %cst_20 : f32 to vector<240x128xf32>
    %34 = arith.maximumf %32, %33 : vector<240x128xf32>
    %35 = tpu.iota {dimensions = array<i32: 0>} : vector<10x24x1xi32>
    %36 = tpu.iota {dimensions = array<i32: 1>} : vector<10x24x1xi32>
    %c8_i32 = arith.constant 8 : i32
    %37 = arith.muli %arg1, %c8_i32 : i32
    %c1_i32 = arith.constant 1 : i32
    %38 = arith.subi %37, %c1_i32 : i32
    %39 = vector.broadcast %38 : i32 to vector<10x24x1xi32>
    %40 = arith.addi %39, %35 : vector<10x24x1xi32>
    %c0_i32_21 = arith.constant 0 : i32
    %41 = vector.broadcast %c0_i32_21 : i32 to vector<10x24x1xi32>
    %42 = arith.cmpi sge, %40, %41 : vector<10x24x1xi32>
    %c16_i32 = arith.constant 16 : i32
    %43 = vector.broadcast %c16_i32 : i32 to vector<10x24x1xi32>
    %44 = arith.cmpi slt, %40, %43 : vector<10x24x1xi32>
    %45 = arith.andi %42, %44 : vector<10x24x1xi1>
    %c1_i32_22 = arith.constant 1 : i32
    %46 = vector.broadcast %c1_i32_22 : i32 to vector<10x24x1xi32>
    %47 = arith.cmpi sge, %36, %46 : vector<10x24x1xi32>
    %48 = arith.andi %45, %47 : vector<10x24x1xi1>
    %c16_i32_23 = arith.constant 16 : i32
    %49 = vector.broadcast %c16_i32_23 : i32 to vector<10x24x1xi32>
    %50 = arith.cmpi sle, %36, %49 : vector<10x24x1xi32>
    %51 = arith.andi %48, %50 : vector<10x24x1xi1>
    %52 = vector.shape_cast %34 : vector<240x128xf32> to vector<10x24x128xf32>
    %cst_24 = arith.constant 0.000000e+00 : f32
    %53 = vector.shape_cast %51 : vector<10x24x1xi1> to vector<10x24x1xi1>
    %54 = vector.broadcast %53 : vector<10x24x1xi1> to vector<10x24x128xi1>
    %55 = vector.broadcast %cst_24 : f32 to vector<10x24x128xf32>
    %56 = arith.select %54, %52, %55 : vector<10x24x128xi1>, vector<10x24x128xf32>
    %57 = arith.truncf %56 : vector<10x24x128xf32> to vector<10x24x128xbf16>
    %58 = vector.shape_cast %57 : vector<10x24x128xbf16> to vector<240x128xbf16>
    %cst_25 = arith.constant 0.000000e+00 : bf16
    %59 = vector.broadcast %cst_25 : bf16 to vector<24x128xbf16>
    %60 = tpu.concatenate %58, %59 in 0 : vector<240x128xbf16>, vector<24x128xbf16> -> vector<264x128xbf16>
    %61 = vector.extract_strided_slice %60 {offsets = [0, 0], sizes = [192, 128], strides = [1, 1]} : vector<264x128xbf16> to vector<192x128xbf16>
    %c0_26 = arith.constant 0 : index
    %c0_27 = arith.constant 0 : index
    %62 = vector.load %arg12[%c0_26, %c0_27] : memref<192x1152xbf16, #tpu.memory_space<vmem>>, vector<192x128xbf16>
    tpu.vector_store %arg12[%c0_26, %c0_27], %61 {strides = array<i32>} : memref<192x1152xbf16, #tpu.memory_space<vmem>>, vector<192x128xbf16>,
    %63 = vector.extract_strided_slice %60 {offsets = [1, 0], sizes = [192, 128], strides = [1, 1]} : vector<264x128xbf16> to vector<192x128xbf16>
    %c0_28 = arith.constant 0 : index
    %c128_29 = arith.constant 128 : index
    %64 = vector.load %arg12[%c0_28, %c128_29] : memref<192x1152xbf16, #tpu.memory_space<vmem>>, vector<192x128xbf16>
    tpu.vector_store %arg12[%c0_28, %c128_29], %63 {strides = array<i32>} : memref<192x1152xbf16, #tpu.memory_space<vmem>>, vector<192x128xbf16>,
    %65 = vector.extract_strided_slice %60 {offsets = [2, 0], sizes = [192, 128], strides = [1, 1]} : vector<264x128xbf16> to vector<192x128xbf16>
    %c0_30 = arith.constant 0 : index
    %c256_31 = arith.constant 256 : index
    %66 = vector.load %arg12[%c0_30, %c256_31] : memref<192x1152xbf16, #tpu.memory_space<vmem>>, vector<192x128xbf16>
    tpu.vector_store %arg12[%c0_30, %c256_31], %65 {strides = array<i32>} : memref<192x1152xbf16, #tpu.memory_space<vmem>>, vector<192x128xbf16>,
    %67 = vector.extract_strided_slice %60 {offsets = [24, 0], sizes = [192, 128], strides = [1, 1]} : vector<264x128xbf16> to vector<192x128xbf16>
    %c0_32 = arith.constant 0 : index
    %c384_33 = arith.constant 384 : index
    %68 = vector.load %arg12[%c0_32, %c384_33] : memref<192x1152xbf16, #tpu.memory_space<vmem>>, vector<192x128xbf16>
    tpu.vector_store %arg12[%c0_32, %c384_33], %67 {strides = array<i32>} : memref<192x1152xbf16, #tpu.memory_space<vmem>>, vector<192x128xbf16>,
    %69 = vector.extract_strided_slice %60 {offsets = [25, 0], sizes = [192, 128], strides = [1, 1]} : vector<264x128xbf16> to vector<192x128xbf16>
    %c0_34 = arith.constant 0 : index
    %c512_35 = arith.constant 512 : index
    %70 = vector.load %arg12[%c0_34, %c512_35] : memref<192x1152xbf16, #tpu.memory_space<vmem>>, vector<192x128xbf16>
    tpu.vector_store %arg12[%c0_34, %c512_35], %69 {strides = array<i32>} : memref<192x1152xbf16, #tpu.memory_space<vmem>>, vector<192x128xbf16>,
    %71 = vector.extract_strided_slice %60 {offsets = [26, 0], sizes = [192, 128], strides = [1, 1]} : vector<264x128xbf16> to vector<192x128xbf16>
    %c0_36 = arith.constant 0 : index
    %c640_37 = arith.constant 640 : index
    %72 = vector.load %arg12[%c0_36, %c640_37] : memref<192x1152xbf16, #tpu.memory_space<vmem>>, vector<192x128xbf16>
    tpu.vector_store %arg12[%c0_36, %c640_37], %71 {strides = array<i32>} : memref<192x1152xbf16, #tpu.memory_space<vmem>>, vector<192x128xbf16>,
    %73 = vector.extract_strided_slice %60 {offsets = [48, 0], sizes = [192, 128], strides = [1, 1]} : vector<264x128xbf16> to vector<192x128xbf16>
    %c0_38 = arith.constant 0 : index
    %c768_39 = arith.constant 768 : index
    %74 = vector.load %arg12[%c0_38, %c768_39] : memref<192x1152xbf16, #tpu.memory_space<vmem>>, vector<192x128xbf16>
    tpu.vector_store %arg12[%c0_38, %c768_39], %73 {strides = array<i32>} : memref<192x1152xbf16, #tpu.memory_space<vmem>>, vector<192x128xbf16>,
    %75 = vector.extract_strided_slice %60 {offsets = [49, 0], sizes = [192, 128], strides = [1, 1]} : vector<264x128xbf16> to vector<192x128xbf16>
    %c0_40 = arith.constant 0 : index
    %c896_41 = arith.constant 896 : index
    %76 = vector.load %arg12[%c0_40, %c896_41] : memref<192x1152xbf16, #tpu.memory_space<vmem>>, vector<192x128xbf16>
    tpu.vector_store %arg12[%c0_40, %c896_41], %75 {strides = array<i32>} : memref<192x1152xbf16, #tpu.memory_space<vmem>>, vector<192x128xbf16>,
    %77 = vector.extract_strided_slice %60 {offsets = [50, 0], sizes = [192, 128], strides = [1, 1]} : vector<264x128xbf16> to vector<192x128xbf16>
    %c0_42 = arith.constant 0 : index
    %c1024_43 = arith.constant 1024 : index
    %78 = vector.load %arg12[%c0_42, %c1024_43] : memref<192x1152xbf16, #tpu.memory_space<vmem>>, vector<192x128xbf16>
    tpu.vector_store %arg12[%c0_42, %c1024_43], %77 {strides = array<i32>} : memref<192x1152xbf16, #tpu.memory_space<vmem>>, vector<192x128xbf16>,
    %c0_44 = arith.constant 0 : index
    %c0_45 = arith.constant 0 : index
    %79 = vector.load %arg12[%c0_44, %c0_45] : memref<192x1152xbf16, #tpu.memory_space<vmem>>, vector<192x1152xbf16>
    %c0_46 = arith.constant 0 : index
    %c0_47 = arith.constant 0 : index
    %80 = vector.load %arg6[%c0_46, %c0_47] : memref<1152x128xbf16, #tpu.memory_space<vmem>>, vector<1152x128xbf16>
    %cst_48 = arith.constant dense<0.000000e+00> : vector<192x128xf32>
    %81 = tpu.matmul %79, %80, %cst_48 {dimension_numbers = #tpu.dot_dimension_numbers<[1], [0], [0], [1], [0, 0, 1, 1], [], []>} : vector<192x1152xbf16>, vector<1152x128xbf16>, vector<192x128xf32> -> vector<192x128xf32>
    %c0_49 = arith.constant 0 : index
    %c0_50 = arith.constant 0 : index
    %82 = vector.load %arg7[%c0_49, %c0_50] : memref<1x128xf32, #tpu.memory_space<vmem>>, vector<1x128xf32>
    %83 = vector.broadcast %82 : vector<1x128xf32> to vector<192x128xf32>
    %84 = arith.mulf %81, %83 : vector<192x128xf32>
    %c0_51 = arith.constant 0 : index
    %c0_52 = arith.constant 0 : index
    %85 = vector.load %arg8[%c0_51, %c0_52] : memref<1x128xf32, #tpu.memory_space<vmem>>, vector<1x128xf32>
    %86 = vector.broadcast %85 : vector<1x128xf32> to vector<192x128xf32>
    %87 = arith.addf %84, %86 : vector<192x128xf32>
    %cst_53 = arith.constant 0.000000e+00 : f32
    %88 = vector.broadcast %cst_53 : f32 to vector<192x128xf32>
    %89 = arith.maximumf %87, %88 : vector<192x128xf32>
    %90 = vector.shape_cast %89 : vector<192x128xf32> to vector<8x24x128xf32>
    %91 = vector.extract_strided_slice %90 {offsets = [0, 0, 0], sizes = [8, 16, 128], strides = [1, 1, 1]} : vector<8x24x128xf32> to vector<8x16x128xf32>
    %c0_54 = arith.constant 0 : index
    %c0_55 = arith.constant 0 : index
    %c0_56 = arith.constant 0 : index
    %c0_57 = arith.constant 0 : index
    %92 = vector.load %arg9[%c0_54, %c0_55, %c0_56, %c0_57] : memref<1x8x16x128xf32, #tpu.memory_space<vmem>>, vector<1x8x16x128xf32>
    %93 = vector.shape_cast %92 : vector<1x8x16x128xf32> to vector<8x16x128xf32>
    %94 = vector.shape_cast %91 : vector<8x16x128xf32> to vector<1x8x16x128xf32>
    tpu.vector_store %arg9[%c0_54, %c0_55, %c0_56, %c0_57], %94 {strides = array<i32>} : memref<1x8x16x128xf32, #tpu.memory_space<vmem>>, vector<1x8x16x128xf32>,
    return
  }
  func.func @transform_1(%arg0: i32, %arg1: i32) -> (i32, i32) {
    %c0_i32 = arith.constant 0 : i32
    %c0_i32_0 = arith.constant 0 : i32
    %c0_i32_1 = arith.constant 0 : i32
    return %c0_i32, %c0_i32_0 : i32, i32
  }
  func.func @transform_2(%arg0: i32, %arg1: i32) -> (i32, i32) {
    %c0_i32 = arith.constant 0 : i32
    %c0_i32_0 = arith.constant 0 : i32
    %c0_i32_1 = arith.constant 0 : i32
    return %c0_i32, %c0_i32_0 : i32, i32
  }
  func.func @transform_3(%arg0: i32, %arg1: i32) -> (i32, i32) {
    %c0_i32 = arith.constant 0 : i32
    %c0_i32_0 = arith.constant 0 : i32
    %c0_i32_1 = arith.constant 0 : i32
    return %c0_i32, %c0_i32_0 : i32, i32
  }
  func.func @transform_4(%arg0: i32, %arg1: i32) -> (i32, i32) {
    %c0_i32 = arith.constant 0 : i32
    %c0_i32_0 = arith.constant 0 : i32
    %c0_i32_1 = arith.constant 0 : i32
    return %c0_i32, %c0_i32_0 : i32, i32
  }
  func.func @transform_5(%arg0: i32, %arg1: i32) -> (i32, i32) {
    %c0_i32 = arith.constant 0 : i32
    %c0_i32_0 = arith.constant 0 : i32
    %c0_i32_1 = arith.constant 0 : i32
    return %c0_i32, %c0_i32_0 : i32, i32
  }
  func.func @transform_6(%arg0: i32, %arg1: i32) -> (i32, i32) {
    %c0_i32 = arith.constant 0 : i32
    %c0_i32_0 = arith.constant 0 : i32
    %c0_i32_1 = arith.constant 0 : i32
    return %c0_i32, %c0_i32_0 : i32, i32
  }
  func.func @transform_7(%arg0: i32, %arg1: i32) -> (i32, i32, i32, i32) {
    %c0_i32 = arith.constant 0 : i32
    %c0_i32_0 = arith.constant 0 : i32
    %c0_i32_1 = arith.constant 0 : i32
    return %arg0, %arg1, %c0_i32, %c0_i32_0 : i32, i32, i32, i32
  }
}

</mosaic_0001>

<bundles_post_ra>
// kernel: double_conv_forward.1
= control target key start
LH: loop header
LB: loop body
LE: loop exit
PB: predicated region body
PF: predicated region fallthrough
CT: control target
= control target key end

     0   :  { %s8609_s24 = smov 0   ;;  %s8611_s25 = smov 0   ;;  %s11040_s0 = inlined_call_operand.vmem [shape: bf16[2,504,128], index: 0, kind: input, shape index: {}]   ;;  %s11041_s1 = inlined_call_operand.vmem [shape: bf16[1152,128], index: 1, kind: input, shape index: {}]   ;;  %s11042_s2 = inlined_call_operand.vmem [shape: f32[1,128], index: 2, kind: input, shape index: {}]   ;;  %s11043_s3 = inlined_call_operand.vmem [shape: f32[1,128], index: 3, kind: input, shape index: {}]   ;;  %s11044_s4 = inlined_call_operand.vmem [shape: bf16[1152,128], index: 4, kind: input, shape index: {}]   ;;  %s11045_s5 = inlined_call_operand.vmem [shape: f32[1,128], index: 5, kind: input, shape index: {}]   ;;  %s11046_s6 = inlined_call_operand.vmem [shape: f32[1,128], index: 6, kind: input, shape index: {}]   ;;  %s11047_s7 = inlined_call_operand.vmem [shape: f32[2,16,16,128], index: 7, kind: output, shape index: {}]  }
   0x1   :  { %s8613_s26 = smov 0   ;;  %s8615_s27 = smov 0  }
   0x2   :  { %s8617_s28 = smov 0  }
   0x3 LB: > { %s26_s29 = sadd.s32 1, %s8558_s26  ;;  %s29_s30 = sadd.s32 1, %s8562_s27  ;;  %s8566_s28 = sphi %s8617_s28, %s17_s28   ;;  %s8562_s27 = sphi %s8615_s27, %s11174_s27   ;;  %s8558_s26 = sphi %s8613_s26, %s11173_s26   ;;  %s8554_s25 = sphi %s8611_s25, %s11172_s25   ;;  %s8550_s24 = sphi %s8609_s24, %s11171_s24  }
   0x4   : > { %p27_p0 = scmp.ge.s32.totalorder %s26_s29, 2  ;;  %p6495_p1 = scmp.ge.s32.totalorder %s8566_s28, 1 }
   0x5   : > { %p217_p2 = scmp.lt.s32.totalorder %s8566_s28, 5 }
   0x6   : > { %s11176_s29 = smov (%p27_p0, %s26_s29), 0  ;;  %s11178_s30 = smov (!%p27_p0, %s29_s30), %s8562_s27 }
   0x7   : > { %11058 = sst [smem:[#allocation8_spill]] %s11176_s29  ;;  %p218_p3 = pnand %p6495_p1, %p217_p2 }
   0x8   : > { %p31_p4 = scmp.ge.s32.totalorder %s11178_s30, 2 }
   0x9   : > { %221 = sbr.rel (%p218_p3) target bundleno = 1548 (0x60c), region = 44 }
   0xa   : > { %s11180_s30 = smov (%p31_p4, %s11178_s30), 0 }
   0xb   : > { %11059 = sst [smem:[#allocation9_spill]] %s11180_s30 }
   0xe   : > { %s8639_s8 = sshll.u32 %s8550_s24, 3  ;;  %p248_p5 = scmp.lt.s32.totalorder %s8554_s25, 1 }
   0xf   : > { %p250_p6 = scmp.lt.s32.totalorder %s8639_s8, 15  ;;  %s259_s9 = smul.u32 192, %s8550_s24 }
  0x10   : > { %s249_s10 = scalar_select %p248_p5, %s8554_s25, 1 }
  0x11   : > { %s251_s11 = scalar_select %p250_p6, %s8639_s8, 15 }
  0x12   : > { %s6498_s12 = sshll.u32 %s249_s10, 5  ;;  %s260_s13 = sshra.s32 %s259_s9, 3 }
  0x13   : > { %s6497_s14 = sshll.u32 %s251_s11, 1  ;;  %s262_s15 = smul.u32 63, %s8554_s25 }
  0x14   : > { %s254_s16 = sadd.s32 %s6498_s12, %s6497_s14 }
  0x15   : > { %s6499_s17 = sshll.u32 %s254_s16, 3  ;;  %s263_s18 = sadd.s32 %s262_s15, %s260_s13 }
  0x16   : > { %s8646_s21 = scalar_lea.vmem %s11047_s7, %s6499_s17  ;;  %s6500_s22 = sshll.u32 %s263_s18, 2 }
  0x17   : > { %s8651_s29 = scalar_lea.vmem %s11040_s0, %s6500_s22 }
  0x18   : > { %v278_v0 = vld [vmem:[%s8651_s29] sm:$0xff]  ;;  %v280_v1 = vld [vmem:[%s8651_s29 + $0x8] sm:$0xff]  ;;  %v282_v2 = vld [vmem:[%s8651_s29 + $0x10] sm:$0xff] }
  0x19   : > { %279 = vst [vmem:[#allocation2] sm:$0xff] %v278_v0  ;;  %v284_v3 = vld [vmem:[%s8651_s29 + $0x18] sm:$0xff]  ;;  %v286_v4 = vld [vmem:[%s8651_s29 + $0x20] sm:$0xff]  ;;  %v288_v5 = vld [vmem:[%s8651_s29 + $0x28] sm:$0xff] }
  0x1a   : > { %281 = vst [vmem:[#allocation2 + $0x8] sm:$0xff] %v280_v1  ;;  %v290_v6 = vld [vmem:[%s8651_s29 + $0x30] sm:$0xff]  ;;  %v292_v7 = vld [vmem:[%s8651_s29 + $0x38] sm:$0xff]  ;;  %v294_v8 = vld [vmem:[%s8651_s29 + $0x40] sm:$0xff] }
  0x1b   : > { %283 = vst [vmem:[#allocation2 + $0x10] sm:$0xff] %v282_v2  ;;  %v296_v9 = vld [vmem:[%s8651_s29 + $0x48] sm:$0xff]  ;;  %v298_v10 = vld [vmem:[%s8651_s29 + $0x50] sm:$0xff]  ;;  %v300_v11 = vld [vmem:[%s8651_s29 + $0x58] sm:$0xff] }
  0x1c   : > { %285 = vst [vmem:[#allocation2 + $0x18] sm:$0xff] %v284_v3  ;;  %v302_v12 = vld [vmem:[%s8651_s29 + $0x60] sm:$0xff]  ;;  %v304_v13 = vld [vmem:[%s8651_s29 + $0x68] sm:$0xff]  ;;  %v306_v14 = vld [vmem:[%s8651_s29 + $0x70] sm:$0xff] }
  0x1d   : > { %287 = vst [vmem:[#allocation2 + $0x20] sm:$0xff] %v286_v4  ;;  %v308_v15 = vld [vmem:[%s8651_s29 + $0x78] sm:$0xff]  ;;  %v310_v16 = vld [vmem:[%s8651_s29 + $0x80] sm:$0xff]  ;;  %v312_v17 = vld [vmem:[%s8651_s29 + $0x88] sm:$0xff] }
  0x1e   : > { %289 = vst [vmem:[#allocation2 + $0x28] sm:$0xff] %v288_v5  ;;  %v314_v18 = vld [vmem:[%s8651_s29 + $0x90] sm:$0xff] }
  0x1f   : > { %291 = vst [vmem:[#allocation2 + $0x30] sm:$0xff] %v290_v6 }
  0x20   : > { %293 = vst [vmem:[#allocation2 + $0x38] sm:$0xff] %v292_v7 }
  0x21   : > { %295 = vst [vmem:[#allocation2 + $0x40] sm:$0xff] %v294_v8 }
  0x22   : > { %297 = vst [vmem:[#allocation2 + $0x48] sm:$0xff] %v296_v9 }
  0x23   : > { %299 = vst [vmem:[#allocation2 + $0x50] sm:$0xff] %v298_v10 }
  0x24   : > { %301 = vst [vmem:[#allocation2 + $0x58] sm:$0xff] %v300_v11 }
  0x25   : > { %303 = vst [vmem:[#allocation2 + $0x60] sm:$0xff] %v302_v12 }
  0x26   : > { %305 = vst [vmem:[#allocation2 + $0x68] sm:$0xff] %v304_v13 }
  0x27   : > { %307 = vst [vmem:[#allocation2 + $0x70] sm:$0xff] %v306_v14 }
  0x28   : > { %309 = vst [vmem:[#allocation2 + $0x78] sm:$0xff] %v308_v15 }
  0x29   : > { %311 = vst [vmem:[#allocation2 + $0x80] sm:$0xff] %v310_v16 }
  0x2a   : > { %313 = vst [vmem:[#allocation2 + $0x88] sm:$0xff] %v312_v17 }
  0x2b   : > { %315 = vst [vmem:[#allocation2 + $0x90] sm:$0xff] %v314_v18 }
  0x2c   : > { %331 = vsyncadd [#allocation5], 2496 }
  0x2d   : > { %8546 = dma.done.wait [#allocation5], 2496 }
  0x2e   : > { %8547 = vsyncadd [#allocation5], 4294964800  ;;  %v8199_v19 = vld [vmem:[%s11041_s1 + $0x38] sm:$0xff]  ;;  %v8198_v21 = vld [vmem:[%s11041_s1 + $0x30] sm:$0xff]  ;;  %vm403_vm0 = vsmask.f32 3328 }
  0x2f   : > { %v8207_v20 = vld [vmem:[%s11041_s1 + $0x78] sm:$0xff]  ;;  %2647 = vmatpush.bf16.msra.mxu0 %v8199_v19  ;;  %v8206_v22 = vld [vmem:[%s11041_s1 + $0x70] sm:$0xff]  ;;  %vm404_vm1 = vsmask.f32 7440  ;;  %v8197_v23 = vld [vmem:[%s11041_s1 + $0x28] sm:$0xff]  ;;  %v11060_v47 = vmov 0 }
  0x30   : > { %2731 = vmatpush.bf16.msra.mxu1 %v8207_v20  ;;  %8444 = vmatpush.bf16.msra.mxu3 %v8207_v20  ;;  %v8687_v24 = vld [vmem:[#allocation2] sm:$0xf]  ;;  %v8689_v25 = vld [vmem:[#allocation2 + $0x4] sm:$0xf]  ;;  %v8205_v26 = vld [vmem:[%s11041_s1 + $0x68] sm:$0xff]  ;;  %vm801_vm3 = vcmask 1042432  }
  0x31   : > { %373 = vst [vmem:[#allocation3] sm:$0xf] %v8687_v24  ;;  %v407_v27 = vshrl.u32 %v8687_v24, 16  ;;  %v410_v28 = vshll.u32 %v8687_v24, 16  ;;  %v420_v29 = vshrl.u32 %v8689_v25, 16  ;;  %v416_v31 = vshll.u32 %v8689_v25, 16  ;;  %vm8727_vm2 = vmor %vm403_vm0, %vm404_vm1 }
  0x32   : > { %374 = vst [vmem:[#allocation3 + $0x24] sm:$0xf] %v8689_v25  ;;  %v8699_v30 = vld [vmem:[#allocation2 + $0x8] sm:$0xf]  ;;  %v8196_v32 = vld [vmem:[%s11041_s1 + $0x20] sm:$0xff]  ;;  %v8723_v46 = vld [vmem:[%s11041_s1 + $0xb8] sm:$0xff] }
  0x33   : > { %2648 = vmatpush.bf16.msra.mxu0 %v8198_v21  ;;  %v409_v33 = vrot.slane %v407_v27, 4  ;;  %v412_v34 = vrot.slane %v410_v28, 5  ;;  %v422_v35 = vrot.slane %v420_v29, 4  ;;  %v426_v36 = vshll.u32 %v8699_v30, 16  ;;  %375 = vst [vmem:[#allocation3 + $0x48] sm:$0xf] %v8699_v30  ;;  %8452 = vmatpush.bf16.msra.mxu2 %v8723_v46 }
  0x34   : > { %2732 = vmatpush.bf16.msra.mxu1 %v8206_v22  ;;  %8445 = vmatpush.bf16.msra.mxu3 %v8206_v22  ;;  %v8204_v37 = vld [vmem:[%s11041_s1 + $0x60] sm:$0xff]  ;;  %v418_v38 = vrot.slane %v416_v31, 5  ;;  %v8710_v39 = vld [vmem:[#allocation2 + $0x50] sm:$0xf]  ;;  %v8712_v40 = vld [vmem:[#allocation2 + $0x54] sm:$0xf] }
  0x35   : > { %v413_v41 = vor.u32 %v412_v34, %v409_v33  ;;  %v8714_v42 = vrot.slane %v426_v36, 5  ;;  %v8716_v43 = vld [vmem:[#allocation2 + $0x58] sm:$0xf]  ;;  %v606_v44 = vshll.u32 %v8710_v39, 16  ;;  %v610_v45 = vshrl.u32 %v8710_v39, 16  ;;  %v8194_v3 = vld [vmem:[%s11041_s1 + $0x10] sm:$0xff] }
  0x36   : > { %v11061_v47 = vsel %vm8727_vm2, 4294967295, %v11060_v47  ;;  %v423_v48 = vor.u32 %v422_v35, %v418_v38  ;;  %v616_v49 = vshll.u32 %v8712_v40, 16  ;;  %v620_v50 = vshrl.u32 %v8712_v40, 16  ;;  %393 = vst [vmem:[#allocation3 + $0x2d0] sm:$0xf] %v8710_v39  ;;  %v8195_v59 = vld [vmem:[%s11041_s1 + $0x18] sm:$0xff] }
  0x37   : > { %2649 = vmatpush.bf16.msra.mxu0 %v8197_v23  ;;  %11062 = vst [vmem:[#allocation10_spill] sm:$0xff] %v11061_v47  ;;  %v626_v51 = vshll.u32 %v8716_v43, 16  ;;  %v414_v52 = vrot.slane %v413_v41, 4  ;;  %v8735_v53 = vrot.slane %v606_v44, 5  ;;  %v612_v54 = vrot.slane %v610_v45, 4  ;;  %v8203_v60 = vld [vmem:[%s11041_s1 + $0x58] sm:$0xff] }
  0x38   : > { %2733 = vmatpush.bf16.msra.mxu1 %v8205_v26  ;;  %8446 = vmatpush.bf16.msra.mxu3 %v8205_v26  ;;  %394 = vst [vmem:[#allocation3 + $0x2f4] sm:$0xf] %v8712_v40  ;;  %v430_v55 = vshrl.u32 %v8699_v30, 16  ;;  %v424_v56 = vrot.slane %v423_v48, 4  ;;  %v618_v57 = vrot.slane %v616_v49, 5  ;;  %v622_v58 = vrot.slane %v620_v50, 4 }
  0x39   : > { %v419_v61 = vsel %vm8727_vm2, %v414_v52, %v418_v38  ;;  %v613_v62 = vor.u32 %v612_v54, %v8735_v53  ;;  %395 = vst [vmem:[#allocation3 + $0x318] sm:$0xf] %v8716_v43  ;;  %v8750_v63 = vld [vmem:[#allocation2 + $0xc] sm:$0xf]  ;;  %v8755_v2 = vrot.slane %v626_v51, 5  ;;  %v8202_v8 = vld [vmem:[%s11041_s1 + $0x50] sm:$0xff] }
  0x3a   : > { %v429_v0 = vsel %vm8727_vm2, %v424_v56, %v8714_v42  ;;  %740 = vst [vmem:[#allocation3 + $0x4] sm:$0xf] %v419_v61  ;;  %v623_v1 = vor.u32 %v622_v58, %v618_v57  ;;  %v432_v5 = vrot.slane %v430_v55, 4  ;;  %v436_v6 = vshll.u32 %v8750_v63, 16  ;;  %v8766_v10 = vld [vmem:[#allocation2 + $0x5c] sm:$0xf] }
  0x3b   : > { %2650 = vmatpush.bf16.msra.mxu0 %v8196_v32  ;;  %741 = vst [vmem:[#allocation3 + $0x28] sm:$0xf] %v429_v0  ;;  %v614_v4 = vrot.slane %v613_v62, 4  ;;  %v440_v7 = vshrl.u32 %v8750_v63, 16  ;;  %v8771_v12 = vld [vmem:[#allocation2 + $0x10] sm:$0xf] }
  0x3c   : > { %2734 = vmatpush.bf16.msra.mxu1 %v8204_v37  ;;  %8447 = vmatpush.bf16.msra.mxu3 %v8204_v37  ;;  %v624_v9 = vrot.slane %v623_v1, 4  ;;  %972 = vst [vmem:[#allocation3 + $0x270] sm:$0xf] %v8710_v39  ;;  %v8773_v13 = vrot.slane %v436_v6, 5  ;;  %v630_v16 = vshrl.u32 %v8716_v43, 16  ;;  %v636_v17 = vshll.u32 %v8766_v10, 16 }
  0x3d   : > { %v619_v11 = vsel %vm8727_vm2, %v614_v4, %v618_v57  ;;  %973 = vst [vmem:[#allocation3 + $0x294] sm:$0xf] %v8712_v40  ;;  %v442_v14 = vrot.slane %v440_v7, 4  ;;  %v8783_v18 = vld [vmem:[%s11041_s1 + $0xb0] sm:$0xff]  ;;  %v433_v19 = vor.u32 %v432_v5, %v8714_v42  ;;  %v640_v20 = vshrl.u32 %v8766_v10, 16  ;;  %v8193_v26 = vld [vmem:[%s11041_s1 + $0x8] sm:$0xff] }
  0x3e   : > { %v629_v15 = vsel %vm8727_vm2, %v624_v9, %v8755_v2  ;;  %760 = vst [vmem:[#allocation3 + $0x2d4] sm:$0xf] %v619_v11  ;;  %v446_v22 = vshll.u32 %v8771_v12, 16  ;;  %v632_v23 = vrot.slane %v630_v16, 4  ;;  %8453 = vmatpush.bf16.msra.mxu2 %v8783_v18  ;;  %v8201_v27 = vld [vmem:[%s11041_s1 + $0x48] sm:$0xff]  ;;  %v638_v28 = vrot.slane %v636_v17, 5 }
  0x3f   : > { %2651 = vmatpush.bf16.msra.mxu0 %v8195_v59  ;;  %761 = vst [vmem:[#allocation3 + $0x2f8] sm:$0xf] %v629_v15  ;;  %v443_v21 = vor.u32 %v442_v14, %v8773_v13  ;;  %v642_v29 = vrot.slane %v640_v20, 4  ;;  %v8797_v31 = vld [vmem:[#allocation2 + $0x60] sm:$0xf]  ;;  %v434_v36 = vrot.slane %v433_v19, 4 }
  0x40   : > { %2735 = vmatpush.bf16.msra.mxu1 %v8203_v60  ;;  %8448 = vmatpush.bf16.msra.mxu3 %v8203_v60  ;;  %974 = vst [vmem:[#allocation3 + $0x2b8] sm:$0xf] %v8716_v43  ;;  %v8192_v32 = vld [vmem:[%s11041_s1] sm:$0xff]  ;;  %v6505_v34 = vld [vmem:[#allocation3] sm:$0xf]  ;;  %v448_v42 = vrot.slane %v446_v22, 5  ;;  %v633_v44 = vor.u32 %v632_v23, %v8755_v2 }
  0x41   : > { %1035 = vst [vmem:[#allocation3 + $0x274] sm:$0xf] %v619_v11  ;;  %v8200_v33 = vld [vmem:[%s11041_s1 + $0x40] sm:$0xff]  ;;  %v8806_v37 = vld [vmem:[#allocation2 + $0x14] sm:$0xf]  ;;  %v444_v41 = vrot.slane %v443_v21, 4  ;;  %v643_v48 = vor.u32 %v642_v29, %v638_v28  ;;  %v439_v54 = vsel %vm8727_vm2, %v434_v36, %v8773_v13 }
  0x42   : > { %1036 = vst [vmem:[#allocation3 + $0x298] sm:$0xf] %v629_v15  ;;  %v8061_v35 = vld [vmem:[#allocation3 + $0x20] sm:$0xf0]  ;;  %v6507_v45 = vld [vmem:[#allocation3 + $0x24] sm:$0xf0] }
  0x43   : > { %2652 = vmatpush.bf16.msra.mxu0 %v8194_v3  ;;  %1107 = vst [vmem:[#allocation3 + $0x210] sm:$0xf] %v8710_v39  ;;  %v8057_v38 = vld [vmem:[#allocation3 + $0x4] sm:$0xf]  ;;  %v646_v49 = vshll.u32 %v8797_v31, 16  ;;  %v450_v50 = vshrl.u32 %v8771_v12, 16  ;;  %v6506_v57 = vor.u32 %v8061_v35, %v6505_v34  ;;  %v449_v59 = vsel %vm8727_vm2, %v444_v41, %v448_v42 }
  0x44   : > { %2736 = vmatpush.bf16.msra.mxu1 %v8202_v8  ;;  %8449 = vmatpush.bf16.msra.mxu3 %v8202_v8  ;;  %1108 = vst [vmem:[#allocation3 + $0x234] sm:$0xf] %v8712_v40  ;;  %v456_v55 = vshll.u32 %v8806_v37, 16  ;;  %v460_v56 = vshrl.u32 %v8806_v37, 16  ;;  %v6510_v58 = vor.u32 %v8057_v38, %v6507_v45  ;;  %v634_v60 = vrot.slane %v633_v44, 4  ;;  %v8232_v47 = vld [vmem:[%s11041_s1 + $0x140] sm:$0xff] }
  0x45   : > { %1109 = vst [vmem:[#allocation3 + $0x258] sm:$0xf] %v8716_v43  ;;  %v8147_v51 = vld [vmem:[#allocation3 + $0x2d4] sm:$0xf]  ;;  %v644_v62 = vrot.slane %v643_v48, 4  ;;  %v8822_v0 = vrot.slane %v646_v49, 5 }
  0x46   : > { %v6867_v52 = vld [vmem:[#allocation3 + $0x2f4] sm:$0xf0]  ;;  %1170 = vst [vmem:[#allocation3 + $0x214] sm:$0xf] %v619_v11  ;;  %v452_v1 = vrot.slane %v450_v50, 4  ;;  %v458_v3 = vrot.slane %v456_v55, 5  ;;  %v639_v5 = vsel %vm8727_vm2, %v634_v60, %v638_v28 }
  0x47   : > { %2653 = vmatpush.bf16.msra.mxu0 %v8193_v26  ;;  %1171 = vst [vmem:[#allocation3 + $0x238] sm:$0xf] %v629_v15  ;;  %v6870_v61 = vor.u32 %v8147_v51, %v6867_v52  ;;  %v8825_v2 = vld [vmem:[#allocation2 + $0x18] sm:$0xf]  ;;  %v462_v4 = vrot.slane %v460_v56, 4  ;;  %v650_v11 = vshrl.u32 %v8797_v31, 16 }
  0x48   : > { %2737 = vmatpush.bf16.msra.mxu1 %v8201_v27  ;;  %8450 = vmatpush.bf16.msra.mxu3 %v8201_v27  ;;  %376 = vst [vmem:[#allocation3 + $0x6c] sm:$0xf] %v8750_v63  ;;  %v453_v6 = vor.u32 %v452_v1, %v448_v42  ;;  %v466_v7 = vshll.u32 %v8825_v2, 16  ;;  %v8836_v9 = vld [vmem:[#allocation2 + $0x64] sm:$0xf]  ;;  %v470_v50 = vshrl.u32 %v8825_v2, 16 }
  0x49   : > { %955 = vst [vmem:[#allocation3 + $0xc] sm:$0xf] %v8750_v63  ;;  %v463_v8 = vor.u32 %v462_v4, %v458_v3  ;;  %v656_v15 = vshll.u32 %v8836_v9, 16  ;;  %v660_v16 = vshrl.u32 %v8836_v9, 16  ;;  %v6541_v17 = vld [vmem:[#allocation3 + $0x48] sm:$0xf] }
  0x4a   : > { %742 = vst [vmem:[#allocation3 + $0x4c] sm:$0xf] %v439_v54  ;;  %v454_v13 = vrot.slane %v453_v6, 4  ;;  %v8841_v14 = vrot.slane %v466_v7, 5  ;;  %v652_v19 = vrot.slane %v650_v11, 4  ;;  %v472_v56 = vrot.slane %v470_v50, 4 }
  0x4b   : > { %2654 = vmatpush.bf16.msra.mxu0 %v8192_v32  ;;  %743 = vst [vmem:[#allocation3 + $0x70] sm:$0xf] %v449_v59  ;;  %v8847_v23 = vld [vmem:[#allocation2 + $0x68] sm:$0xf]  ;;  %v658_v27 = vrot.slane %v656_v15, 5  ;;  %v662_v28 = vrot.slane %v660_v16, 4 }
  0x4c   : > { %2738 = vmatpush.bf16.msra.mxu1 %v8200_v33  ;;  %8451 = vmatpush.bf16.msra.mxu3 %v8200_v33  ;;  %1018 = vst [vmem:[#allocation3 + $0x10] sm:$0xf] %v449_v59  ;;  %v653_v35 = vor.u32 %v652_v19, %v8822_v0  ;;  %v459_v36 = vsel %vm8727_vm2, %v454_v13, %v458_v3  ;;  %v666_v41 = vshll.u32 %v8847_v23, 16  ;;  %v8860_v44 = vld [vmem:[#allocation2 + $0x1c] sm:$0xf]  ;;  %v8213_v4 = vld [vmem:[%s11041_s1 + $0xa8] sm:$0xff] }
  0x4d   : > { %377 = vst [vmem:[#allocation3 + $0x90] sm:$0xf] %v8771_v12  ;;  %v663_v38 = vor.u32 %v662_v28, %v658_v27  ;;  %v476_v51 = vshll.u32 %v8860_v44, 16  ;;  %v480_v52 = vshrl.u32 %v8860_v44, 16  ;;  %v8223_v1 = vld [vmem:[%s11041_s1 + $0xf8] sm:$0xff]  ;;  %v473_v6 = vor.u32 %v472_v56, %v8841_v14  ;;  %8454 = vmatpush.bf16.msra.mxu2 %v8213_v4  ;;  %v8222_v13 = vld [vmem:[%s11041_s1 + $0xf0] sm:$0xff] }
  0x4e   : > { %2655 = vmatmul.bf16.vlgmr.msra.gmra.mxu0 %v6506_v57  ;;  %956 = vst [vmem:[#allocation3 + $0x30] sm:$0xf] %v8771_v12  ;;  %v654_v45 = vrot.slane %v653_v35, 4  ;;  %v8862_v49 = vrot.slane %v666_v41, 5  ;;  %v8882_v3 = vld [vmem:[#allocation2 + $0x6c] sm:$0xf] }
  0x4f   : > { %2815 = vmatpush.bf16.msrb.mxu0 %v8723_v46  ;;  %2739 = vmatmul.bf16.vlgmr.msra.gmra.mxu1 %v6510_v58  ;;  %v649_v46 = vsel %vm8727_vm2, %v644_v62, %v8822_v0  ;;  %762 = vst [vmem:[#allocation3 + $0x31c] sm:$0xf] %v639_v5  ;;  %v8070_v20 = vld [vmem:[#allocation3 + $0x68] sm:$0xf0]  ;;  %v664_v48 = vrot.slane %v663_v38, 4  ;;  %v478_v57 = vrot.slane %v476_v51, 5 }
  0x50   : > { %2789 = vmatmul.bf16.vlgmr.msra.gmra.mxu3 %v6870_v61  ;;  %763 = vst [vmem:[#allocation3 + $0x340] sm:$0xf] %v649_v46  ;;  %v6542_v32 = vor.u32 %v8070_v20, %v6541_v17  ;;  %v659_v54 = vsel %vm8727_vm2, %v654_v45, %v658_v27  ;;  %v482_v58 = vrot.slane %v480_v52, 4  ;;  %v8876_v0 = vld [vmem:[#allocation2 + $0x20] sm:$0xf]  ;;  %v670_v7 = vshrl.u32 %v8847_v23, 16 }
  0x51   : > { %396 = vst [vmem:[#allocation3 + $0x33c] sm:$0xf] %v8766_v10  ;;  %v8066_v21 = vld [vmem:[#allocation3 + $0x4c] sm:$0xf]  ;;  %v669_v55 = vsel %vm8727_vm2, %v664_v48, %v8862_v49  ;;  %2899 = vmatpush.bf16.msrb.mxu3 %v8223_v1  ;;  %v486_v11 = vshll.u32 %v8876_v0, 16  ;;  %v8212_v15 = vld [vmem:[%s11041_s1 + $0xa0] sm:$0xff] }
  0x52   : > { %397 = vst [vmem:[#allocation3 + $0x360] sm:$0xf] %v8797_v31  ;;  %v6543_v22 = vld [vmem:[#allocation3 + $0x6c] sm:$0xf0]  ;;  %v680_v16 = vshrl.u32 %v8882_v3, 16  ;;  %v474_v19 = vrot.slane %v473_v6, 4  ;;  %8455 = vmatpush.bf16.msra.mxu2 %v8212_v15 }
  0x53   : > { %2816 = vmatpush.bf16.msrb.mxu0 %v8783_v18  ;;  %975 = vst [vmem:[#allocation3 + $0x2dc] sm:$0xf] %v8766_v10  ;;  %v464_v18 = vrot.slane %v463_v8, 4  ;;  %v6546_v33 = vor.u32 %v8066_v21, %v6543_v22  ;;  %v483_v8 = vor.u32 %v482_v58, %v478_v57  ;;  %v672_v20 = vrot.slane %v670_v7, 4  ;;  %v8221_v27 = vld [vmem:[%s11041_s1 + $0xe8] sm:$0xff]  ;;  %v8211_v28 = vld [vmem:[%s11041_s1 + $0x98] sm:$0xff] }
  0x54   : > { %976 = vst [vmem:[#allocation3 + $0x300] sm:$0xf] %v8797_v31  ;;  %v6577_v59 = vld [vmem:[#allocation3 + $0x90] sm:$0xf]  ;;  %v8220_v38 = vld [vmem:[%s11041_s1 + $0xe0] sm:$0xff]  ;;  %v8210_v6 = vld [vmem:[%s11041_s1 + $0x90] sm:$0xff] }
  0x55   : > { %1037 = vst [vmem:[#allocation3 + $0x2bc] sm:$0xf] %v639_v5  ;;  %v469_v42 = vsel %vm8727_vm2, %v464_v18, %v8841_v14  ;;  %v676_v14 = vshll.u32 %v8882_v3, 16  ;;  %v484_v22 = vrot.slane %v483_v8, 4  ;;  %2900 = vmatpush.bf16.msrb.mxu3 %v8222_v13  ;;  %v8927_v51 = vld [vmem:[#allocation2 + $0x24] sm:$0xf] }
  0x56   : > { %v8156_v26 = vld [vmem:[#allocation3 + $0x31c] sm:$0xf]  ;;  %1038 = vst [vmem:[#allocation3 + $0x2e0] sm:$0xf] %v649_v46  ;;  %8456 = vmatpush.bf16.msra.mxu2 %v8211_v28  ;;  %v500_v58 = vshrl.u32 %v8927_v51, 16  ;;  %v8209_v13 = vld [vmem:[%s11041_s1 + $0x88] sm:$0xff] }
  0x57   : > { %v6903_v29 = vld [vmem:[#allocation3 + $0x33c] sm:$0xf0]  ;;  %1110 = vst [vmem:[#allocation3 + $0x27c] sm:$0xf] %v8766_v10  ;;  %2817 = vmatpush.bf16.msrb.mxu0 %v8213_v4  ;;  %vm802_vm4 = vcmask 1046532   ;;  %s7332_s19 = sadd.s32 4294967295, %s8639_s8 }
  0x58   : > { %1111 = vst [vmem:[#allocation3 + $0x2a0] sm:$0xf] %v8797_v31  ;;  %v6906_v34 = vor.u32 %v8156_v26, %v6903_v29  ;;  %v8902_v26 = vrot.slane %v486_v11, 5  ;;  %v678_v29 = vrot.slane %v676_v14, 5  ;;  %v8219_v7 = vld [vmem:[%s11041_s1 + $0xd8] sm:$0xff]  ;;  %vm9009_vm5 = vmor %vm801_vm3, %vm802_vm4 }
  0x59   : > { %1172 = vst [vmem:[#allocation3 + $0x25c] sm:$0xf] %v639_v5  ;;  %2901 = vmatpush.bf16.msrb.mxu3 %v8221_v27  ;;  %v8951_v11 = vld [vmem:[#allocation2 + $0x74] sm:$0xf]  ;;  %v8217_v27 = vld [vmem:[%s11041_s1 + $0xc8] sm:$0xff] }
  0x5a   : > { %1173 = vst [vmem:[#allocation3 + $0x280] sm:$0xf] %v649_v46  ;;  %v489_v35 = vsel %vm8727_vm2, %v484_v22, %v8902_v26  ;;  %8457 = vmatpush.bf16.msra.mxu2 %v8210_v6 }
  0x5b   : > { %378 = vst [vmem:[#allocation3 + $0xb4] sm:$0xf] %v8806_v37  ;;  %2818 = vmatpush.bf16.msrb.mxu0 %v8212_v15  ;;  %v8218_v15 = vld [vmem:[%s11041_s1 + $0xd0] sm:$0xff] }
  0x5c   : > { %957 = vst [vmem:[#allocation3 + $0x54] sm:$0xf] %v8806_v37 }
  0x5d   : > { %744 = vst [vmem:[#allocation3 + $0x94] sm:$0xf] %v459_v36  ;;  %2902 = vmatpush.bf16.msrb.mxu3 %v8220_v38  ;;  %v8975_v38 = vld [vmem:[#allocation2 + $0x78] sm:$0xf] }
  0x5e   : > { %2660 = vmatmul.bf16.gmra.mxu0 %v6542_v32  ;;  %745 = vst [vmem:[#allocation3 + $0xb8] sm:$0xf] %v469_v42  ;;  %v682_v32 = vrot.slane %v680_v16, 4  ;;  %8458 = vmatpush.bf16.msra.mxu2 %v8209_v13 }
  0x5f   : > { %2744 = vmatmul.bf16.gmra.mxu1 %v6546_v33  ;;  %1019 = vst [vmem:[#allocation3 + $0x34] sm:$0xf] %v459_v36  ;;  %v8910_v33 = vld [vmem:[#allocation2 + $0x70] sm:$0xf]  ;;  %v673_v36 = vor.u32 %v672_v20, %v8862_v49  ;;  %2819 = vmatpush.bf16.msrb.mxu0 %v8211_v28 }
  0x60   : > { %2794 = vmatmul.bf16.gmra.mxu3 %v6906_v34  ;;  %1020 = vst [vmem:[#allocation3 + $0x58] sm:$0xf] %v469_v42  ;;  %v479_v34 = vsel %vm8727_vm2, %v474_v19, %v478_v57  ;;  %v683_v41 = vor.u32 %v682_v32, %v678_v29  ;;  %v686_v42 = vshll.u32 %v8910_v33, 16  ;;  %v496_v57 = vshll.u32 %v8927_v51, 16 }
  0x61   : > { %379 = vst [vmem:[#allocation3 + $0xd8] sm:$0xf] %v8825_v2  ;;  %v674_v48 = vrot.slane %v673_v36, 4  ;;  %2903 = vmatpush.bf16.msrb.mxu3 %v8219_v7  ;;  %v700_v19 = vshrl.u32 %v8951_v11, 16  ;;  %v9002_v7 = vld [vmem:[#allocation2 + $0x30] sm:$0xf] }
  0x62   : > { %958 = vst [vmem:[#allocation3 + $0x78] sm:$0xf] %v8825_v2  ;;  %v8079_v60 = vld [vmem:[#allocation3 + $0xb0] sm:$0xf0]  ;;  %v684_v49 = vrot.slane %v683_v41, 4  ;;  %v8925_v50 = vrot.slane %v686_v42, 5 }
  0x63   : > { %1093 = vst [vmem:[#allocation3 + $0x18] sm:$0xf] %v8825_v2  ;;  %v6578_v5 = vor.u32 %v8079_v60, %v6577_v59  ;;  %v679_v56 = vsel %vm8727_vm2, %v674_v48, %v678_v29  ;;  %v498_v4 = vrot.slane %v496_v57, 5  ;;  %2820 = vmatpush.bf16.msrb.mxu0 %v8210_v6  ;;  %v702_v36 = vrot.slane %v700_v19, 4 }
  0x64   : > { %764 = vst [vmem:[#allocation3 + $0x364] sm:$0xf] %v659_v54  ;;  %v8075_v61 = vld [vmem:[#allocation3 + $0x94] sm:$0xf]  ;;  %v689_v60 = vsel %vm8727_vm2, %v684_v49, %v8925_v50  ;;  %v706_v49 = vshll.u32 %v8975_v38, 16 }
  0x65   : > { %v6579_v62 = vld [vmem:[#allocation3 + $0xb4] sm:$0xf0]  ;;  %765 = vst [vmem:[#allocation3 + $0x388] sm:$0xf] %v669_v55  ;;  %2904 = vmatpush.bf16.msrb.mxu3 %v8218_v15  ;;  %v11063_v15 = vmov 0 }
  0x66   : > { %398 = vst [vmem:[#allocation3 + $0x384] sm:$0xf] %v8836_v9  ;;  %v6582_v46 = vor.u32 %v8075_v61, %v6579_v62  ;;  %v11064_v15 = vsel %vm9009_vm5, 4294967295, %v11063_v15 }
  0x67   : > { %399 = vst [vmem:[#allocation3 + $0x3a8] sm:$0xf] %v8847_v23  ;;  %2821 = vmatpush.bf16.msrb.mxu0 %v8209_v13 }
  0x68   : > { %977 = vst [vmem:[#allocation3 + $0x324] sm:$0xf] %v8836_v9  ;;  %v6613_v45 = vld [vmem:[#allocation3 + $0xd8] sm:$0xf] }
  0x69   : > { %978 = vst [vmem:[#allocation3 + $0x348] sm:$0xf] %v8847_v23  ;;  %2905 = vmatpush.bf16.msrb.mxu3 %v8217_v27 }
  0x6a   : > { %1039 = vst [vmem:[#allocation3 + $0x304] sm:$0xf] %v659_v54 }
  0x6b   : > { %v8165_v17 = vld [vmem:[#allocation3 + $0x364] sm:$0xf]  ;;  %1040 = vst [vmem:[#allocation3 + $0x328] sm:$0xf] %v669_v55 }
  0x6c   : > { %v6939_v18 = vld [vmem:[#allocation3 + $0x384] sm:$0xf0]  ;;  %1112 = vst [vmem:[#allocation3 + $0x2c4] sm:$0xf] %v8836_v9 }
  0x6d   : > { %v6942_v21 = vor.u32 %v8165_v17, %v6939_v18  ;;  %1113 = vst [vmem:[#allocation3 + $0x2e8] sm:$0xf] %v8847_v23  ;;  %v690_v17 = vshrl.u32 %v8910_v33, 16  ;;  %v696_v18 = vshll.u32 %v8951_v11, 16 }
  0x6e   : > { %2665 = vmatmul.bf16.gmra.mxu0 %v6578_v5  ;;  %1174 = vst [vmem:[#allocation3 + $0x2a4] sm:$0xf] %v659_v54  ;;  %v490_v54 = vshrl.u32 %v8876_v0, 16  ;;  %v502_v5 = vrot.slane %v500_v58, 4 }
  0x6f   : > { %2749 = vmatmul.bf16.gmra.mxu1 %v6582_v46  ;;  %1175 = vst [vmem:[#allocation3 + $0x2c8] sm:$0xf] %v669_v55  ;;  %v8941_v46 = vld [vmem:[#allocation2 + $0x28] sm:$0xf] }
  0x70   : > { %2799 = vmatmul.bf16.gmra.mxu3 %v6942_v21  ;;  %380 = vst [vmem:[#allocation3 + $0xfc] sm:$0xf] %v8860_v44  ;;  %v492_v62 = vrot.slane %v490_v54, 4  ;;  %v503_v14 = vor.u32 %v502_v5, %v498_v4  ;;  %v506_v16 = vshll.u32 %v8941_v46, 16  ;;  %v11049_v5 = vrot.slane %v8941_v46, 5 }
  0x71   : > { %959 = vst [vmem:[#allocation3 + $0x9c] sm:$0xf] %v8860_v44  ;;  %v510_v13 = vshrl.u32 %v8941_v46, 16 }
  0x72   : > { %1094 = vst [vmem:[#allocation3 + $0x3c] sm:$0xf] %v8860_v44  ;;  %v493_v8 = vor.u32 %v492_v62, %v8902_v26  ;;  %v8208_v26 = vld [vmem:[%s11041_s1 + $0x80] sm:$0xff]  ;;  %v504_v29 = vrot.slane %v503_v14, 4  ;;  %v8973_v32 = vrot.slane %v506_v16, 5  ;;  %v839_v16 = vrot.slane %v9002_v7, 5 }
  0x73   : > { %746 = vst [vmem:[#allocation3 + $0xdc] sm:$0xf] %v479_v34  ;;  %8459 = vmatpush.bf16.msra.mxu2 %v8208_v26  ;;  %2822 = vmatpush.bf16.msrb.mxu0 %v8208_v26  ;;  %v347_v62 = vld [vmem:[#allocation2 + $0x2c] sm:$0xf] }
  0x74   : > { %747 = vst [vmem:[#allocation3 + $0x100] sm:$0xf] %v489_v35  ;;  %v494_v21 = vrot.slane %v493_v8, 4  ;;  %v509_v42 = vsel %vm8727_vm2, %v504_v29, %v8973_v32  ;;  %v836_v6 = vrot.slane %v347_v62, 5  ;;  %v835_v8 = vrot.slane %v11049_v5, 4 }
  0x75   : > { %1156 = vst [vmem:[#allocation3 + $0x1c] sm:$0xf] %v479_v34 }
  0x76   : > { %1157 = vst [vmem:[#allocation3 + $0x40] sm:$0xf] %v489_v35  ;;  %v499_v41 = vsel %vm8727_vm2, %v494_v21, %v498_v4  ;;  %v838_v14 = vrot.slane %v836_v6, 4  ;;  %v837_v21 = vsel %vm9009_vm5, %v835_v8, %v836_v6 }
  0x77   : > { %v8088_v52 = vld [vmem:[#allocation3 + $0xf8] sm:$0xf0]  ;;  %381 = vst [vmem:[#allocation3 + $0x120] sm:$0xf] %v8876_v0 }
  0x78   : > { %v6614_v55 = vor.u32 %v8088_v52, %v6613_v45  ;;  %960 = vst [vmem:[#allocation3 + $0xc0] sm:$0xf] %v8876_v0  ;;  %v8216_v52 = vld [vmem:[%s11041_s1 + $0xc0] sm:$0xff]  ;;  %v840_v27 = vsel %vm9009_vm5, %v838_v14, %v839_v16 }
  0x79   : > { %1021 = vst [vmem:[#allocation3 + $0x7c] sm:$0xf] %v479_v34  ;;  %v692_v34 = vrot.slane %v690_v17, 4  ;;  %2906 = vmatpush.bf16.msrb.mxu3 %v8216_v52  ;;  %v516_v17 = vshll.u32 %v347_v62, 16 }
  0x7a   : > { %v8084_v59 = vld [vmem:[#allocation3 + $0xdc] sm:$0xf]  ;;  %1022 = vst [vmem:[#allocation3 + $0xa0] sm:$0xf] %v489_v35  ;;  %v698_v35 = vrot.slane %v696_v18, 5  ;;  %v520_v18 = vshrl.u32 %v347_v62, 16 }
  0x7b   : > { %v6615_v61 = vld [vmem:[#allocation3 + $0xfc] sm:$0xf0]  ;;  %1095 = vst [vmem:[#allocation3 + $0x60] sm:$0xf] %v8876_v0  ;;  %v693_v45 = vor.u32 %v692_v34, %v8925_v50 }
  0x7c   : > { %v6618_v1 = vor.u32 %v8084_v59, %v6615_v61  ;;  %766 = vst [vmem:[#allocation3 + $0x3ac] sm:$0xf] %v679_v56  ;;  %v703_v48 = vor.u32 %v702_v36, %v698_v35  ;;  %v522_v29 = vrot.slane %v520_v18, 4  ;;  %v526_v36 = vshll.u32 %v9002_v7, 16 }
  0x7d   : > { %767 = vst [vmem:[#allocation3 + $0x3d0] sm:$0xf] %v689_v60 }
  0x7e   : > { %2670 = vmatmul.bf16.gmra.mxu0 %v6614_v55  ;;  %400 = vst [vmem:[#allocation3 + $0x3cc] sm:$0xf] %v8882_v3  ;;  %v6649_v54 = vld [vmem:[#allocation3 + $0x120] sm:$0xf]  ;;  %v694_v55 = vrot.slane %v693_v45, 4  ;;  %v704_v50 = vrot.slane %v703_v48, 4 }
  0x7f   : > { %2754 = vmatmul.bf16.gmra.mxu1 %v6618_v1  ;;  %401 = vst [vmem:[#allocation3 + $0x3f0] sm:$0xf] %v8910_v33 }
  0x80   : > { %979 = vst [vmem:[#allocation3 + $0x36c] sm:$0xf] %v8882_v3  ;;  %v699_v59 = vsel %vm8727_vm2, %v694_v55, %v698_v35 }
  0x81   : > { %980 = vst [vmem:[#allocation3 + $0x390] sm:$0xf] %v8910_v33 }
  0x82   : > { %1041 = vst [vmem:[#allocation3 + $0x34c] sm:$0xf] %v679_v56 }
  0x83   : > { %v8174_v20 = vld [vmem:[#allocation3 + $0x3ac] sm:$0xf]  ;;  %1042 = vst [vmem:[#allocation3 + $0x370] sm:$0xf] %v689_v60 }
  0x84   : > { %v6975_v22 = vld [vmem:[#allocation3 + $0x3cc] sm:$0xf0]  ;;  %1114 = vst [vmem:[#allocation3 + $0x30c] sm:$0xf] %v8882_v3 }
  0x85   : > { %v6978_v28 = vor.u32 %v8174_v20, %v6975_v22  ;;  %1115 = vst [vmem:[#allocation3 + $0x330] sm:$0xf] %v8910_v33  ;;  %v512_v22 = vrot.slane %v510_v13, 4 }
  0x86   : > { %1176 = vst [vmem:[#allocation3 + $0x2ec] sm:$0xf] %v679_v56  ;;  %v8992_v56 = vrot.slane %v706_v49, 5  ;;  %v528_v49 = vrot.slane %v526_v36, 5 }
  0x87   : > { %2804 = vmatmul.bf16.gmra.mxu3 %v6978_v28  ;;  %1177 = vst [vmem:[#allocation3 + $0x310] sm:$0xf] %v689_v60  ;;  %v518_v28 = vrot.slane %v516_v17, 5  ;;  %v513_v34 = vor.u32 %v512_v22, %v8973_v32  ;;  %v6515_v32 = vld [vmem:[#allocation3 + $0x2c] sm:$0xf0] }
  0x88   : > { %382 = vst [vmem:[#allocation3 + $0x144] sm:$0xf] %v8927_v51  ;;  %v709_v61 = vsel %vm8727_vm2, %v704_v50, %v8992_v56 }
  0x89   : > { %961 = vst [vmem:[#allocation3 + $0xe4] sm:$0xf] %v8927_v51  ;;  %v523_v35 = vor.u32 %v522_v29, %v518_v28 }
  0x8a   : > { %1096 = vst [vmem:[#allocation3 + $0x84] sm:$0xf] %v8927_v51 }
  0x8b   : > { %748 = vst [vmem:[#allocation3 + $0x124] sm:$0xf] %v499_v41  ;;  %v524_v48 = vrot.slane %v523_v35, 4 }
  0x8c   : > { %749 = vst [vmem:[#allocation3 + $0x148] sm:$0xf] %v509_v42 }
  0x8d   : > { %383 = vst [vmem:[#allocation3 + $0x168] sm:$0xf] %v8941_v46 }
  0x8e   : > { %962 = vst [vmem:[#allocation3 + $0x108] sm:$0xf] %v8941_v46 }
  0x8f   : > { %v8097_v57 = vld [vmem:[#allocation3 + $0x140] sm:$0xf0]  ;;  %1023 = vst [vmem:[#allocation3 + $0xc4] sm:$0xf] %v499_v41 }
  0x90   : > { %v6650_v58 = vor.u32 %v8097_v57, %v6649_v54  ;;  %1024 = vst [vmem:[#allocation3 + $0xe8] sm:$0xf] %v509_v42  ;;  %v8058_v54 = vld [vmem:[#allocation3 + $0xc] sm:$0xf] }
  0x91   : > { %1097 = vst [vmem:[#allocation3 + $0xa8] sm:$0xf] %v8941_v46  ;;  %v6518_v13 = vor.u32 %v8058_v54, %v6515_v32 }
  0x92   : > { %2675 = vmatmul.bf16.gmra.mxu0 %v6650_v58  ;;  %v8093_v60 = vld [vmem:[#allocation3 + $0x124] sm:$0xf]  ;;  %1158 = vst [vmem:[#allocation3 + $0x64] sm:$0xf] %v499_v41  ;;  %v514_v41 = vrot.slane %v513_v34, 4 }
  0x93   : > { %v6651_v1 = vld [vmem:[#allocation3 + $0x144] sm:$0xf0]  ;;  %1159 = vst [vmem:[#allocation3 + $0x88] sm:$0xf] %v509_v42  ;;  %v9024_v42 = vld [vmem:[#allocation2 + $0x34] sm:$0xf] }
  0x94   : > { %v6654_v4 = vor.u32 %v8093_v60, %v6651_v1  ;;  %768 = vst [vmem:[#allocation3 + $0x3f4] sm:$0xf] %v699_v59  ;;  %v6685_v45 = vld [vmem:[#allocation3 + $0x168] sm:$0xf]  ;;  %v842_v50 = vrot.slane %v9024_v42, 5  ;;  %v529_v1 = vsel %vm8727_vm2, %v524_v48, %v528_v49  ;;  %v536_v6 = vshll.u32 %v9024_v42, 16 }
  0x95   : > { %769 = vst [vmem:[#allocation3 + $0x418] sm:$0xf] %v709_v61  ;;  %v9030_v60 = vld [vmem:[#allocation2 + $0x38] sm:$0xf]  ;;  %v540_v8 = vshrl.u32 %v9024_v42, 16 }
  0x96   : > { %2759 = vmatmul.bf16.gmra.mxu1 %v6654_v4  ;;  %402 = vst [vmem:[#allocation3 + $0x414] sm:$0xf] %v8951_v11  ;;  %v841_v4 = vrot.slane %v839_v16, 4  ;;  %v844_v14 = vrot.slane %v842_v50, 4  ;;  %v845_v17 = vrot.slane %v9030_v60, 5  ;;  %v538_v16 = vrot.slane %v536_v6, 5 }
  0x97   : > { %981 = vst [vmem:[#allocation3 + $0x3b4] sm:$0xf] %v8951_v11  ;;  %v6551_v48 = vld [vmem:[#allocation3 + $0x74] sm:$0xf0] }
  0x98   : > { %982 = vst [vmem:[#allocation3 + $0x3d8] sm:$0xf] %v8975_v38  ;;  %v843_v18 = vsel %vm9009_vm5, %v841_v4, %v842_v50  ;;  %v550_v4 = vshrl.u32 %v9030_v60, 16 }
  0x99   : > { %1043 = vst [vmem:[#allocation3 + $0x394] sm:$0xf] %v699_v59 }
  0x9a   : > { %11065 = vst [vmem:[#allocation11_spill] sm:$0xff] %v11064_v15 }
  0x9b   : > { %1044 = vst [vmem:[#allocation3 + $0x3b8] sm:$0xf] %v709_v61  ;;  %v8183_v19 = vld [vmem:[#allocation3 + $0x3f4] sm:$0xf] }
  0x9c   : > { %1116 = vst [vmem:[#allocation3 + $0x354] sm:$0xf] %v8951_v11  ;;  %v7011_v20 = vld [vmem:[#allocation3 + $0x414] sm:$0xf0] }
  0x9d   : > { %1117 = vst [vmem:[#allocation3 + $0x378] sm:$0xf] %v8975_v38  ;;  %v7014_v26 = vor.u32 %v8183_v19, %v7011_v20  ;;  %v542_v20 = vrot.slane %v540_v8, 4 }
  0x9e   : > { %1178 = vst [vmem:[#allocation3 + $0x334] sm:$0xf] %v699_v59  ;;  %v519_v59 = vsel %vm8727_vm2, %v514_v41, %v518_v28  ;;  %v9047_v41 = vld [vmem:[#allocation2 + $0x3c] sm:$0xf] }
  0x9f   : > { %1179 = vst [vmem:[#allocation3 + $0x358] sm:$0xf] %v709_v61  ;;  %2809 = vmatmul.bf16.gmra.mxu3 %v7014_v26  ;;  %v848_v32 = vrot.slane %v9047_v41, 5  ;;  %v556_v8 = vshll.u32 %v9047_v41, 16 }
  0xa0   : > { %935 = vst [vmem:[#allocation3 + $0x170] sm:$0xf] %v837_v21 }
  0xa1   : > { %936 = vst [vmem:[#allocation3 + $0x194] sm:$0xf] %v840_v27 }
  0xa2   : > { %384 = vst [vmem:[#allocation3 + $0x18c] sm:$0xf] %v347_v62 }
  0xa3   : > { %385 = vst [vmem:[#allocation3 + $0x1b0] sm:$0xf] %v9002_v7 }
  0xa4   : > { %963 = vst [vmem:[#allocation3 + $0x12c] sm:$0xf] %v347_v62 }
  0xa5   : > { %964 = vst [vmem:[#allocation3 + $0x150] sm:$0xf] %v9002_v7 }
  0xa6   : > { %1070 = vst [vmem:[#allocation3 + $0x110] sm:$0xf] %v837_v21 }
  0xa7   : > { %v6693_v52 = vld [vmem:[#allocation3 + $0x170] sm:$0xf]  ;;  %1071 = vst [vmem:[#allocation3 + $0x134] sm:$0xf] %v840_v27 }
  0xa8   : > { %v8107_v55 = vld [vmem:[#allocation3 + $0x190] sm:$0xf0]  ;;  %1098 = vst [vmem:[#allocation3 + $0xcc] sm:$0xf] %v347_v62  ;;  %v530_v62 = vshrl.u32 %v9002_v7, 16 }
  0xa9   : > { %v6694_v57 = vor.u32 %v8107_v55, %v6693_v52  ;;  %1099 = vst [vmem:[#allocation3 + $0xf0] sm:$0xf] %v9002_v7  ;;  %v8106_v58 = vld [vmem:[#allocation3 + $0x188] sm:$0xf0]  ;;  %v846_v7 = vsel %vm9009_vm5, %v844_v14, %v845_v17  ;;  %v552_v14 = vrot.slane %v550_v4, 4 }
  0xaa   : > { %1205 = vst [vmem:[#allocation3 + $0xb0] sm:$0xf] %v837_v21  ;;  %v6686_v61 = vor.u32 %v8106_v58, %v6685_v45  ;;  %v532_v19 = vrot.slane %v530_v62, 4  ;;  %v546_v21 = vshll.u32 %v9030_v60, 16  ;;  %v8067_v45 = vld [vmem:[#allocation3 + $0x54] sm:$0xf] }
  0xab   : > { %2848 = vmatmul.bf16.vlgmr.msra.gmra.mxu2 %v6694_v57  ;;  %1206 = vst [vmem:[#allocation3 + $0xd4] sm:$0xf] %v840_v27  ;;  %v543_v27 = vor.u32 %v542_v20, %v538_v16  ;;  %v6721_v52 = vld [vmem:[#allocation3 + $0x1b0] sm:$0xf]  ;;  %v9054_v58 = vld [vmem:[#allocation2 + $0x40] sm:$0xf] }
  0xac   : > { %2680 = vmatmul.bf16.gmra.mxu0 %v6686_v61  ;;  %750 = vst [vmem:[#allocation3 + $0x16c] sm:$0xf] %v519_v59  ;;  %v533_v26 = vor.u32 %v532_v19, %v528_v49  ;;  %v548_v34 = vrot.slane %v546_v21, 5  ;;  %v850_v62 = vrot.slane %v848_v32, 4  ;;  %v851_v6 = vrot.slane %v9054_v58, 5 }
  0xad   : > { %751 = vst [vmem:[#allocation3 + $0x190] sm:$0xf] %v529_v1  ;;  %v544_v36 = vrot.slane %v543_v27, 4 }
  0xae   : > { %1025 = vst [vmem:[#allocation3 + $0x10c] sm:$0xf] %v519_v59  ;;  %v534_v35 = vrot.slane %v533_v26, 4 }
  0xaf   : > { %1026 = vst [vmem:[#allocation3 + $0x130] sm:$0xf] %v529_v1  ;;  %2907 = vmatmul.bf16.vlgmr.msrb.gmra.mxu3 %v6518_v13  ;;  %v549_v61 = vsel %vm8727_vm2, %v544_v36, %v548_v34  ;;  %v560_v13 = vshrl.u32 %v9047_v41, 16 }
  0xb0   : > { %1160 = vst [vmem:[#allocation3 + $0xac] sm:$0xf] %v519_v59  ;;  %v539_v57 = vsel %vm8727_vm2, %v534_v35, %v538_v16  ;;  %v553_v16 = vor.u32 %v552_v14, %v548_v34  ;;  %v6587_v34 = vld [vmem:[#allocation3 + $0xbc] sm:$0xf0] }
  0xb1   : > { %1161 = vst [vmem:[#allocation3 + $0xd0] sm:$0xf] %v529_v1  ;;  %v6554_v1 = vor.u32 %v8067_v45, %v6551_v48  ;;  %v562_v19 = vrot.slane %v560_v13, 4 }
  0xb2   : > { %937 = vst [vmem:[#allocation3 + $0x1b8] sm:$0xf] %v843_v18  ;;  %v554_v27 = vrot.slane %v553_v16, 4 }
  0xb3   : > { %v8102_v22 = vld [vmem:[#allocation3 + $0x16c] sm:$0xf]  ;;  %938 = vst [vmem:[#allocation3 + $0x1dc] sm:$0xf] %v846_v7 }
  0xb4   : > { %v6687_v28 = vld [vmem:[#allocation3 + $0x18c] sm:$0xf0]  ;;  %386 = vst [vmem:[#allocation3 + $0x1d4] sm:$0xf] %v9024_v42 }
  0xb5   : > { %v6690_v29 = vor.u32 %v8102_v22, %v6687_v28  ;;  %387 = vst [vmem:[#allocation3 + $0x1f8] sm:$0xf] %v9030_v60  ;;  %v566_v22 = vshll.u32 %v9054_v58, 16  ;;  %v9070_v28 = vld [vmem:[#allocation2 + $0x44] sm:$0xf] }
  0xb6   : > { %965 = vst [vmem:[#allocation3 + $0x174] sm:$0xf] %v9024_v42  ;;  %v576_v14 = vshll.u32 %v9070_v28, 16 }
  0xb7   : > { %2764 = vmatmul.bf16.gmra.mxu1 %v6690_v29  ;;  %966 = vst [vmem:[#allocation3 + $0x198] sm:$0xf] %v9030_v60  ;;  %v8076_v29 = vld [vmem:[#allocation3 + $0x9c] sm:$0xf]  ;;  %v568_v36 = vrot.slane %v566_v22, 5 }
  0xb8   : > { %1072 = vst [vmem:[#allocation3 + $0x158] sm:$0xf] %v843_v18 }
  0xb9   : > { %v6729_v49 = vld [vmem:[#allocation3 + $0x1b8] sm:$0xf]  ;;  %1073 = vst [vmem:[#allocation3 + $0x17c] sm:$0xf] %v846_v7 }
  0xba   : > { %v8116_v54 = vld [vmem:[#allocation3 + $0x1d8] sm:$0xf0]  ;;  %1100 = vst [vmem:[#allocation3 + $0x114] sm:$0xf] %v9024_v42  ;;  %v847_v42 = vrot.slane %v845_v17, 4  ;;  %v852_v17 = vsel %vm9009_vm5, %v850_v62, %v851_v6  ;;  %v570_v62 = vshrl.u32 %v9054_v58, 16 }
  0xbb   : > { %v6730_v55 = vor.u32 %v8116_v54, %v6729_v49  ;;  %1101 = vst [vmem:[#allocation3 + $0x138] sm:$0xf] %v9030_v60  ;;  %v8115_v50 = vld [vmem:[#allocation3 + $0x1d0] sm:$0xf0] }
  0xbc   : > { %1207 = vst [vmem:[#allocation3 + $0xf8] sm:$0xf] %v843_v18  ;;  %v6722_v59 = vor.u32 %v8115_v50, %v6721_v52  ;;  %v849_v60 = vsel %vm9009_vm5, %v847_v42, %v848_v32  ;;  %v558_v18 = vrot.slane %v556_v8, 5  ;;  %v6757_v52 = vld [vmem:[#allocation3 + $0x1f8] sm:$0xf]  ;;  %v854_v50 = vrot.slane %v9070_v28, 5 }
  0xbd   : > { %2853 = vmatmul.bf16.gmra.mxu2 %v6730_v55  ;;  %1208 = vst [vmem:[#allocation3 + $0x11c] sm:$0xf] %v846_v7  ;;  %v6590_v55 = vor.u32 %v8076_v29, %v6587_v34 }
  0xbe   : > { %2685 = vmatmul.bf16.gmra.mxu0 %v6722_v59  ;;  %752 = vst [vmem:[#allocation3 + $0x1b4] sm:$0xf] %v539_v57  ;;  %v563_v21 = vor.u32 %v562_v19, %v558_v18  ;;  %v856_v8 = vrot.slane %v854_v50, 4 }
  0xbf   : > { %753 = vst [vmem:[#allocation3 + $0x1d8] sm:$0xf] %v549_v61  ;;  %2912 = vmatmul.bf16.gmra.mxu3 %v6554_v1  ;;  %v9080_v1 = vld [vmem:[#allocation2 + $0x48] sm:$0xf] }
  0xc0   : > { %1027 = vst [vmem:[#allocation3 + $0x154] sm:$0xf] %v539_v57  ;;  %v564_v35 = vrot.slane %v563_v21, 4  ;;  %v857_v13 = vrot.slane %v9080_v1, 5  ;;  %v586_v29 = vshll.u32 %v9080_v1, 16 }
  0xc1   : > { %1028 = vst [vmem:[#allocation3 + $0x178] sm:$0xf] %v549_v61 }
  0xc2   : > { %1162 = vst [vmem:[#allocation3 + $0xf4] sm:$0xf] %v539_v57  ;;  %v569_v42 = vsel %vm8727_vm2, %v564_v35, %v568_v36  ;;  %v858_v16 = vsel %vm9009_vm5, %v856_v8, %v857_v13  ;;  %v8085_v35 = vld [vmem:[#allocation3 + $0xe4] sm:$0xf] }
  0xc3   : > { %1163 = vst [vmem:[#allocation3 + $0x118] sm:$0xf] %v549_v61  ;;  %v559_v61 = vsel %vm8727_vm2, %v554_v27, %v558_v18  ;;  %v580_v18 = vshrl.u32 %v9070_v28, 16 }
  0xc4   : > { %939 = vst [vmem:[#allocation3 + $0x200] sm:$0xf] %v849_v60 }
  0xc5   : > { %v8111_v20 = vld [vmem:[#allocation3 + $0x1b4] sm:$0xf]  ;;  %940 = vst [vmem:[#allocation3 + $0x224] sm:$0xf] %v852_v17 }
  0xc6   : > { %v6723_v7 = vld [vmem:[#allocation3 + $0x1d4] sm:$0xf0]  ;;  %388 = vst [vmem:[#allocation3 + $0x21c] sm:$0xf] %v9047_v41 }
  0xc7   : > { %v6726_v26 = vor.u32 %v8111_v20, %v6723_v7  ;;  %389 = vst [vmem:[#allocation3 + $0x240] sm:$0xf] %v9054_v58  ;;  %v578_v20 = vrot.slane %v576_v14, 5  ;;  %v582_v7 = vrot.slane %v580_v18, 4 }
  0xc8   : > { %967 = vst [vmem:[#allocation3 + $0x1bc] sm:$0xf] %v9047_v41 }
  0xc9   : > { %2769 = vmatmul.bf16.gmra.mxu1 %v6726_v26  ;;  %968 = vst [vmem:[#allocation3 + $0x1e0] sm:$0xf] %v9054_v58  ;;  %v583_v27 = vor.u32 %v582_v7, %v578_v20 }
  0xca   : > { %1074 = vst [vmem:[#allocation3 + $0x1a0] sm:$0xf] %v849_v60 }
  0xcb   : > { %v2656_v45 = vpop.f32.mrf.mxu0  ;;  %v6765_v49 = vld [vmem:[#allocation3 + $0x200] sm:$0xf]  ;;  %1075 = vst [vmem:[#allocation3 + $0x1c4] sm:$0xf] %v852_v17 }
  0xcc   : > { %v2740_v48 = vpop.f32.mrf.mxu1  ;;  %v8125_v32 = vld [vmem:[#allocation3 + $0x220] sm:$0xf0]  ;;  %1102 = vst [vmem:[#allocation3 + $0x15c] sm:$0xf] %v9047_v41  ;;  %v853_v41 = vrot.slane %v851_v6, 4  ;;  %v572_v6 = vrot.slane %v570_v62, 4 }
  0xcd   : > { %v9073_v54 = vadd.f32 %v2740_v48, %v2656_v45  ;;  %v6766_v57 = vor.u32 %v8125_v32, %v6765_v49  ;;  %1103 = vst [vmem:[#allocation3 + $0x180] sm:$0xf] %v9054_v58  ;;  %v8124_v59 = vld [vmem:[#allocation3 + $0x218] sm:$0xf0]  ;;  %v6623_v45 = vld [vmem:[#allocation3 + $0x104] sm:$0xf0] }
  0xce   : > { %1209 = vst [vmem:[#allocation3 + $0x140] sm:$0xf] %v849_v60  ;;  %v6758_v4 = vor.u32 %v8124_v59, %v6757_v52  ;;  %v855_v58 = vsel %vm9009_vm5, %v853_v41, %v854_v50  ;;  %v573_v22 = vor.u32 %v572_v6, %v568_v36  ;;  %v9103_v36 = vld [vmem:[#allocation2 + $0x4c] sm:$0xf]  ;;  %v588_v50 = vrot.slane %v586_v29, 5 }
  0xcf   : > { %2858 = vmatmul.bf16.gmra.mxu2 %v6766_v57  ;;  %1210 = vst [vmem:[#allocation3 + $0x164] sm:$0xf] %v852_v17  ;;  %2917 = vmatmul.bf16.gmra.mxu3 %v6590_v55  ;;  %v584_v55 = vrot.slane %v583_v27, 4  ;;  %v6626_v57 = vor.u32 %v8085_v35, %v6623_v45  ;;  %v860_v41 = vrot.slane %v9103_v36, 5  ;;  %v590_v62 = vshrl.u32 %v9080_v1, 16 }
  0xd0   : > { %2690 = vmatmul.bf16.gmra.mxu0 %v6758_v4  ;;  %754 = vst [vmem:[#allocation3 + $0x1fc] sm:$0xf] %v559_v61  ;;  %v574_v52 = vrot.slane %v573_v22, 4  ;;  %v596_v6 = vshll.u32 %v9103_v36, 16  ;;  %v600_v7 = vshrl.u32 %v9103_v36, 16  ;;  %v859_v22 = vrot.slane %v857_v13, 4 }
  0xd1   : > { %755 = vst [vmem:[#allocation3 + $0x220] sm:$0xf] %v569_v42  ;;  %v592_v27 = vrot.slane %v590_v62, 4 }
  0xd2   : > { %1029 = vst [vmem:[#allocation3 + $0x19c] sm:$0xf] %v559_v61  ;;  %v579_v18 = vsel %vm8727_vm2, %v574_v52, %v578_v20  ;;  %v861_v35 = vsel %vm9009_vm5, %v859_v22, %v860_v41  ;;  %v6659_v52 = vld [vmem:[#allocation3 + $0x14c] sm:$0xf0] }
  0xd3   : > { %v9088_v60 = vpop.f32.mrf.mxu0  ;;  %1030 = vst [vmem:[#allocation3 + $0x1c0] sm:$0xf] %v569_v42  ;;  %v9094_v17 = vpop.f32.mrf.mxu3 }
  0xd4   : > { %v9090_v19 = vpop.f32.mrf.mxu1  ;;  %1164 = vst [vmem:[#allocation3 + $0x13c] sm:$0xf] %v559_v61  ;;  %v6793_v61 = vld [vmem:[#allocation3 + $0x240] sm:$0xf] }
  0xd5   : > { %1165 = vst [vmem:[#allocation3 + $0x160] sm:$0xf] %v569_v42 }
  0xd6   : > { %941 = vst [vmem:[#allocation3 + $0x248] sm:$0xf] %v855_v58 }
  0xd7   : > { %v8120_v21 = vld [vmem:[#allocation3 + $0x1fc] sm:$0xf]  ;;  %942 = vst [vmem:[#allocation3 + $0x26c] sm:$0xf] %v858_v16 }
  0xd8   : > { %v6759_v26 = vld [vmem:[#allocation3 + $0x21c] sm:$0xf0]  ;;  %390 = vst [vmem:[#allocation3 + $0x264] sm:$0xf] %v9070_v28 }
  0xd9   : > { %v6762_v34 = vor.u32 %v8120_v21, %v6759_v26  ;;  %391 = vst [vmem:[#allocation3 + $0x288] sm:$0xf] %v9080_v1  ;;  %v863_v26 = vrot.slane %v8710_v39, 5 }
  0xda   : > { %969 = vst [vmem:[#allocation3 + $0x204] sm:$0xf] %v9070_v28 }
  0xdb   : > { %v2661_v48 = vpop.f32.mrf.mxu0  ;;  %2774 = vmatmul.bf16.gmra.mxu1 %v6762_v34  ;;  %970 = vst [vmem:[#allocation3 + $0x228] sm:$0xf] %v9080_v1  ;;  %v9107_v4 = vpop.f32.mrf.mxu3  ;;  %v602_v34 = vrot.slane %v600_v7, 4 }
  0xdc   : > { %v2745_v49 = vpop.f32.mrf.mxu1  ;;  %1076 = vst [vmem:[#allocation3 + $0x1e8] sm:$0xf] %v855_v58 }
  0xdd   : > { %v9105_v32 = vadd.f32 %v2745_v49, %v2661_v48  ;;  %v6801_v59 = vld [vmem:[#allocation3 + $0x248] sm:$0xf]  ;;  %1077 = vst [vmem:[#allocation3 + $0x20c] sm:$0xf] %v858_v16  ;;  %v8094_v48 = vld [vmem:[#allocation3 + $0x12c] sm:$0xf] }
  0xde   : > { %v8134_v42 = vld [vmem:[#allocation3 + $0x268] sm:$0xf0]  ;;  %1104 = vst [vmem:[#allocation3 + $0x1a4] sm:$0xf] %v9070_v28  ;;  %v589_v28 = vsel %vm8727_vm2, %v584_v55, %v588_v50  ;;  %v6662_v62 = vor.u32 %v8094_v48, %v6659_v52  ;;  %v875_v48 = vrot.slane %v8797_v31, 5 }
  0xdf   : > { %v6802_v8 = vor.u32 %v8134_v42, %v6801_v59  ;;  %1105 = vst [vmem:[#allocation3 + $0x1c8] sm:$0xf] %v9080_v1  ;;  %v8133_v14 = vld [vmem:[#allocation3 + $0x260] sm:$0xf0]  ;;  %2922 = vmatmul.bf16.gmra.mxu3 %v6626_v57  ;;  %v862_v1 = vrot.slane %v860_v41, 4 }
  0xe0   : > { %1211 = vst [vmem:[#allocation3 + $0x188] sm:$0xf] %v855_v58  ;;  %v6794_v21 = vor.u32 %v8133_v14, %v6793_v61  ;;  %v598_v58 = vrot.slane %v596_v6, 5  ;;  %v6829_v6 = vld [vmem:[#allocation3 + $0x288] sm:$0xf] }
  0xe1   : > { %2863 = vmatmul.bf16.gmra.mxu2 %v6802_v8  ;;  %1212 = vst [vmem:[#allocation3 + $0x1ac] sm:$0xf] %v858_v16  ;;  %v864_v13 = vsel %vm9009_vm5, %v862_v1, %v863_v26  ;;  %v593_v16 = vor.u32 %v592_v27, %v588_v50  ;;  %v866_v8 = vrot.slane %v8712_v40, 5  ;;  %v869_v27 = vrot.slane %v8716_v43, 5  ;;  %v6695_v52 = vld [vmem:[#allocation3 + $0x194] sm:$0xf0] }
  0xe2   : > { %2695 = vmatmul.bf16.gmra.mxu0 %v6794_v21  ;;  %756 = vst [vmem:[#allocation3 + $0x244] sm:$0xf] %v579_v18  ;;  %v603_v39 = vor.u32 %v602_v34, %v598_v58  ;;  %v6865_v31 = vld [vmem:[#allocation3 + $0x2d0] sm:$0xf] }
  0xe3   : > { %v9120_v20 = vpop.f32.mrf.mxu0  ;;  %757 = vst [vmem:[#allocation3 + $0x268] sm:$0xf] %v589_v28  ;;  %v9128_v45 = vpop.f32.mrf.mxu3  ;;  %v594_v57 = vrot.slane %v593_v16, 4  ;;  %v871_v43 = vrot.slane %v869_v27, 4  ;;  %v8103_v16 = vld [vmem:[#allocation3 + $0x174] sm:$0xf] }
  0xe4   : > { %v9122_v29 = vpop.f32.mrf.mxu1  ;;  %1031 = vst [vmem:[#allocation3 + $0x1e4] sm:$0xf] %v579_v18  ;;  %v604_v41 = vrot.slane %v603_v39, 4 }
  0xe5   : > { %1032 = vst [vmem:[#allocation3 + $0x208] sm:$0xf] %v589_v28  ;;  %v599_v14 = vsel %vm8727_vm2, %v594_v57, %v598_v58 }
  0xe6   : > { %1166 = vst [vmem:[#allocation3 + $0x184] sm:$0xf] %v579_v18  ;;  %v609_v7 = vsel %vm8727_vm2, %v604_v41, %v8735_v53  ;;  %v872_v53 = vrot.slane %v8766_v10, 5 }
  0xe7   : > { %1167 = vst [vmem:[#allocation3 + $0x1a8] sm:$0xf] %v589_v28  ;;  %v865_v28 = vrot.slane %v863_v26, 4 }
  0xe8   : > { %943 = vst [vmem:[#allocation3 + $0x290] sm:$0xf] %v861_v35  ;;  %v874_v39 = vrot.slane %v872_v53, 4 }
  0xe9   : > { %v8129_v49 = vld [vmem:[#allocation3 + $0x244] sm:$0xf]  ;;  %944 = vst [vmem:[#allocation3 + $0x2b4] sm:$0xf] %v864_v13  ;;  %v867_v26 = vsel %vm9009_vm5, %v865_v28, %v866_v8 }
  0xea   : > { %v6795_v55 = vld [vmem:[#allocation3 + $0x264] sm:$0xf0]  ;;  %392 = vst [vmem:[#allocation3 + $0x2ac] sm:$0xf] %v9103_v36  ;;  %v876_v41 = vsel %vm9009_vm5, %v874_v39, %v875_v48  ;;  %v887_v39 = vrot.slane %v8910_v33, 5 }
  0xeb   : > { %v2666_v59 = vpop.f32.mrf.mxu0  ;;  %v6798_v42 = vor.u32 %v8129_v49, %v6795_v55  ;;  %971 = vst [vmem:[#allocation3 + $0x24c] sm:$0xf] %v9103_v36  ;;  %v9141_v40 = vpop.f32.mrf.mxu3  ;;  %v878_v55 = vrot.slane %v8836_v9, 5 }
  0xec   : > { %v2750_v61 = vpop.f32.mrf.mxu1  ;;  %1078 = vst [vmem:[#allocation3 + $0x230] sm:$0xf] %v861_v35 }
  0xed   : > { %v9132_v50 = vadd.f32 %v2750_v61, %v2666_v59  ;;  %2779 = vmatmul.bf16.gmra.mxu1 %v6798_v42  ;;  %1079 = vst [vmem:[#allocation3 + $0x254] sm:$0xf] %v864_v13  ;;  %v873_v59 = vsel %vm9009_vm5, %v871_v43, %v872_v53  ;;  %v8112_v53 = vld [vmem:[#allocation3 + $0x1bc] sm:$0xf]  ;;  %v884_v43 = vrot.slane %v8882_v3, 5 }
  0xee   : > { %1106 = vst [vmem:[#allocation3 + $0x1ec] sm:$0xf] %v9103_v36  ;;  %v868_v36 = vrot.slane %v866_v8, 4 }
  0xef   : > { %v6837_v18 = vld [vmem:[#allocation3 + $0x290] sm:$0xf]  ;;  %1213 = vst [vmem:[#allocation3 + $0x1d0] sm:$0xf] %v861_v35  ;;  %2927 = vmatmul.bf16.gmra.mxu3 %v6662_v62  ;;  %v6698_v62 = vor.u32 %v8103_v16, %v6695_v52 }
  0xf0   : > { %v8143_v21 = vld [vmem:[#allocation3 + $0x2b0] sm:$0xf0]  ;;  %1214 = vst [vmem:[#allocation3 + $0x1f4] sm:$0xf] %v864_v13  ;;  %v870_v13 = vsel %vm9009_vm5, %v868_v36, %v869_v27 }
  0xf1   : > { %v6838_v22 = vor.u32 %v8143_v21, %v6837_v18  ;;  %v8142_v1 = vld [vmem:[#allocation3 + $0x2a8] sm:$0xf0]  ;;  %758 = vst [vmem:[#allocation3 + $0x28c] sm:$0xf] %v599_v14  ;;  %v8151_v18 = vld [vmem:[#allocation3 + $0x2f0] sm:$0xf0] }
  0xf2   : > { %v6830_v58 = vor.u32 %v8142_v1, %v6829_v6  ;;  %759 = vst [vmem:[#allocation3 + $0x2b0] sm:$0xf] %v609_v7  ;;  %v880_v6 = vrot.slane %v878_v55, 4  ;;  %v6866_v1 = vor.u32 %v8151_v18, %v6865_v31  ;;  %v8121_v18 = vld [vmem:[#allocation3 + $0x204] sm:$0xf] }
  0xf3   : > { %v9144_v34 = vpop.f32.mrf.mxu0  ;;  %2868 = vmatmul.bf16.gmra.mxu2 %v6838_v22  ;;  %1033 = vst [vmem:[#allocation3 + $0x22c] sm:$0xf] %v599_v14  ;;  %v9157_v42 = vpop.f32.mrf.mxu3 }
  0xf4   : > { %11066 = vst [vmem:[#allocation12_spill] sm:$0xff] %v9144_v34  ;;  %v9146_v35 = vpop.f32.mrf.mxu1  ;;  %2700 = vmatmul.bf16.gmra.mxu0 %v6830_v58 }
  0xf5   : > { %11067 = vst [vmem:[#allocation13_spill] sm:$0xff] %v9146_v35  ;;  %v6565_v35 = vld [vmem:[#allocation3 + $0x60] sm:$0xf] }
  0xf6   : > { %1034 = vst [vmem:[#allocation3 + $0x250] sm:$0xf] %v609_v7 }
  0xf7   : > { %1168 = vst [vmem:[#allocation3 + $0x1cc] sm:$0xf] %v599_v14  ;;  %v877_v14 = vrot.slane %v875_v48, 4 }
  0xf8   : > { %1169 = vst [vmem:[#allocation3 + $0x1f0] sm:$0xf] %v609_v7  ;;  %v8138_v49 = vld [vmem:[#allocation3 + $0x28c] sm:$0xf]  ;;  %v881_v7 = vrot.slane %v8847_v23, 5 }
  0xf9   : > { %945 = vst [vmem:[#allocation3 + $0x2d8] sm:$0xf] %v867_v26  ;;  %v6831_v10 = vld [vmem:[#allocation3 + $0x2ac] sm:$0xf0]  ;;  %v879_v36 = vsel %vm9009_vm5, %v877_v14, %v878_v55  ;;  %v6901_v55 = vld [vmem:[#allocation3 + $0x318] sm:$0xf] }
  0xfa   : > { %946 = vst [vmem:[#allocation3 + $0x2fc] sm:$0xf] %v870_v13  ;;  %v6834_v57 = vor.u32 %v8138_v49, %v6831_v10  ;;  %v882_v27 = vsel %vm9009_vm5, %v880_v6, %v881_v7  ;;  %v883_v16 = vrot.slane %v881_v7, 4  ;;  %v886_v10 = vrot.slane %v884_v43, 4  ;;  %v6767_v6 = vld [vmem:[#allocation3 + $0x224] sm:$0xf0] }
  0xfb   : > { %1080 = vst [vmem:[#allocation3 + $0x278] sm:$0xf] %v867_v26  ;;  %v2671_v61 = vpop.f32.mrf.mxu0  ;;  %v9168_v23 = vpop.f32.mrf.mxu3  ;;  %v890_v7 = vrot.slane %v8951_v11, 5 }
  0xfc   : > { %1081 = vst [vmem:[#allocation3 + $0x29c] sm:$0xf] %v870_v13  ;;  %v2755_v8 = vpop.f32.mrf.mxu1 }
  0xfd   : > { %1215 = vst [vmem:[#allocation3 + $0x218] sm:$0xf] %v867_v26  ;;  %2784 = vmatmul.bf16.gmra.mxu1 %v6834_v57  ;;  %v9161_v9 = vadd.f32 %v2755_v8, %v2671_v61  ;;  %v6731_v26 = vld [vmem:[#allocation3 + $0x1dc] sm:$0xf0]  ;;  %v8160_v57 = vld [vmem:[#allocation3 + $0x338] sm:$0xf0]  ;;  %v888_v61 = vsel %vm9009_vm5, %v886_v10, %v887_v39 }
  0xfe   : > { %1216 = vst [vmem:[#allocation3 + $0x23c] sm:$0xf] %v870_v13  ;;  %v6734_v52 = vor.u32 %v8112_v53, %v6731_v26  ;;  %v6902_v3 = vor.u32 %v8160_v57, %v6901_v55  ;;  %v6937_v53 = vld [vmem:[#allocation3 + $0x360] sm:$0xf]  ;;  %v8169_v26 = vld [vmem:[#allocation3 + $0x380] sm:$0xf0] }
  0xff   : > { %947 = vst [vmem:[#allocation3 + $0x320] sm:$0xf] %v873_v59  ;;  %2932 = vmatmul.bf16.gmra.mxu3 %v6698_v62  ;;  %v6938_v11 = vor.u32 %v8169_v26, %v6937_v53  ;;  %v8130_v10 = vld [vmem:[#allocation3 + $0x24c] sm:$0xf]  ;;  %v6803_v55 = vld [vmem:[#allocation3 + $0x26c] sm:$0xf0] }
 0x100   : > { %v6873_v21 = vld [vmem:[#allocation3 + $0x2d8] sm:$0xf]  ;;  %948 = vst [vmem:[#allocation3 + $0x344] sm:$0xf] %v876_v41  ;;  %v806_v57 = vrot.slane %v8689_v25, 5 }
 0x101   : > { %v8152_v28 = vld [vmem:[#allocation3 + $0x2f8] sm:$0xf0]  ;;  %1082 = vst [vmem:[#allocation3 + $0x2c0] sm:$0xf] %v873_v59 }
 0x102   : > { %v6874_v22 = vor.u32 %v8152_v28, %v6873_v21  ;;  %1083 = vst [vmem:[#allocation3 + $0x2e4] sm:$0xf] %v876_v41 }
 0x103   : > { %1217 = vst [vmem:[#allocation3 + $0x260] sm:$0xf] %v873_v59  ;;  %v9170_v58 = vpop.f32.mrf.mxu0  ;;  %v885_v59 = vsel %vm9009_vm5, %v883_v16, %v884_v43 }
 0x104   : > { %1218 = vst [vmem:[#allocation3 + $0x284] sm:$0xf] %v876_v41  ;;  %2873 = vmatmul.bf16.gmra.mxu2 %v6874_v22  ;;  %2705 = vmatmul.bf16.gmra.mxu0 %v6866_v1  ;;  %v9172_v13 = vpop.f32.mrf.mxu1  ;;  %v6770_v22 = vor.u32 %v8121_v18, %v6767_v6  ;;  %v889_v1 = vrot.slane %v887_v39, 4  ;;  %v8178_v18 = vld [vmem:[#allocation3 + $0x3c8] sm:$0xf0]  ;;  %v6502_v6 = vrot.slane %v8687_v24, 9 }
 0x105   : > { %949 = vst [vmem:[#allocation3 + $0x368] sm:$0xf] %v879_v36 }
 0x106   : > { %950 = vst [vmem:[#allocation3 + $0x38c] sm:$0xf] %v882_v27  ;;  %v6909_v48 = vld [vmem:[#allocation3 + $0x320] sm:$0xf]  ;;  %v891_v43 = vsel %vm9009_vm5, %v889_v1, %v890_v7  ;;  %v809_v1 = vrot.slane %v8699_v30, 5  ;;  %v807_v25 = vsel %vm9009_vm5, %v6502_v6, %v806_v57  ;;  %v812_v6 = vrot.slane %v8750_v63, 5 }
 0x107   : > { %1084 = vst [vmem:[#allocation3 + $0x308] sm:$0xf] %v879_v36  ;;  %v8161_v49 = vld [vmem:[#allocation3 + $0x340] sm:$0xf0]  ;;  %v8139_v30 = vld [vmem:[#allocation3 + $0x294] sm:$0xf] }
 0x108   : > { %1085 = vst [vmem:[#allocation3 + $0x32c] sm:$0xf] %v882_v27  ;;  %v6910_v41 = vor.u32 %v8161_v49, %v6909_v48  ;;  %v8230_v63 = vld [vmem:[%s11041_s1 + $0x130] sm:$0xff] }
 0x109   : > { %1219 = vst [vmem:[#allocation3 + $0x2a8] sm:$0xf] %v879_v36  ;;  %v892_v36 = vrot.slane %v890_v7, 4  ;;  %v808_v7 = vrot.slane %v806_v57, 4  ;;  %v8231_v57 = vld [vmem:[%s11041_s1 + $0x138] sm:$0xff] }
 0x10a   : > { %11068 = vst [vmem:[#allocation14_spill] sm:$0xff] %v9170_v58  ;;  %v9180_v31 = vpop.f32.mrf.mxu3  ;;  %2983 = vmatpush.bf16.msra.mxu0 %v8231_v57 }
 0x10b   : > { %1220 = vst [vmem:[#allocation3 + $0x2cc] sm:$0xf] %v882_v27  ;;  %v11048_v27 = vrot.slane %v8975_v38, 5  ;;  %v810_v53 = vsel %vm9009_vm5, %v808_v7, %v809_v1 }
 0x10c   : > { %11069 = vst [vmem:[#allocation15_spill] sm:$0xff] %v9172_v13  ;;  %v6945_v21 = vld [vmem:[#allocation3 + $0x368] sm:$0xf] }
 0x10d   : > { %951 = vst [vmem:[#allocation3 + $0x3b0] sm:$0xf] %v885_v59  ;;  %v8170_v28 = vld [vmem:[#allocation3 + $0x388] sm:$0xf0]  ;;  %v894_v16 = vsel %vm9009_vm5, %v892_v36, %v11048_v27 }
 0x10e   : > { %952 = vst [vmem:[#allocation3 + $0x3d4] sm:$0xf] %v888_v61  ;;  %v6946_v48 = vor.u32 %v8170_v28, %v6945_v21  ;;  %2984 = vmatpush.bf16.msra.mxu0 %v8230_v63  ;;  %v821_v63 = vrot.slane %v8825_v2, 5  ;;  %v6911_v2 = vld [vmem:[#allocation3 + $0x344] sm:$0xf0] }
 0x10f   : > { %2937 = vmatmul.bf16.gmra.mxu3 %v6734_v52  ;;  %1086 = vst [vmem:[#allocation3 + $0x350] sm:$0xf] %v885_v59  ;;  %v2676_v33 = vpop.f32.mrf.mxu0 }
 0x110   : > { %1087 = vst [vmem:[#allocation3 + $0x374] sm:$0xf] %v888_v61  ;;  %v823_v5 = vrot.slane %v821_v63, 4 }
 0x111   : > { %1221 = vst [vmem:[#allocation3 + $0x2f0] sm:$0xf] %v885_v59 }
 0x112   : > { %1222 = vst [vmem:[#allocation3 + $0x314] sm:$0xf] %v888_v61  ;;  %v9184_v14 = vpop.f32.mrf.mxu3 }
 0x113   : > { %v2760_v62 = vpop.f32.mrf.mxu1  ;;  %953 = vst [vmem:[#allocation3 + $0x3f8] sm:$0xf] %v891_v43 }
 0x114   : > { %2878 = vmatmul.bf16.gmra.mxu2 %v6910_v41  ;;  %2710 = vmatmul.bf16.gmra.mxu0 %v6902_v3  ;;  %v9182_v8 = vadd.f32 %v2760_v62, %v2676_v33  ;;  %954 = vst [vmem:[#allocation3 + $0x41c] sm:$0xf] %v894_v16  ;;  %v6981_v41 = vld [vmem:[#allocation3 + $0x3b0] sm:$0xf]  ;;  %v6806_v33 = vor.u32 %v8130_v10, %v6803_v55  ;;  %v6973_v62 = vld [vmem:[#allocation3 + $0x3a8] sm:$0xf] }
 0x115   : > { %1088 = vst [vmem:[#allocation3 + $0x398] sm:$0xf] %v891_v43  ;;  %v8179_v3 = vld [vmem:[#allocation3 + $0x3d0] sm:$0xf0] }
 0x116   : > { %1089 = vst [vmem:[#allocation3 + $0x3bc] sm:$0xf] %v894_v16  ;;  %v6982_v28 = vor.u32 %v8179_v3, %v6981_v41 }
 0x117   : > { %v9194_v49 = vpop.f32.mrf.mxu0  ;;  %1223 = vst [vmem:[#allocation3 + $0x338] sm:$0xf] %v891_v43 }
 0x118   : > { %11070 = vst [vmem:[#allocation16_spill] sm:$0xff] %v9194_v49 }
 0x119   : > { %1224 = vst [vmem:[#allocation3 + $0x35c] sm:$0xf] %v894_v16 }
 0x11a   : > { %925 = vst [vmem:[#allocation3 + $0x8] sm:$0xf] %v807_v25  ;;  %v7017_v3 = vld [vmem:[#allocation3 + $0x3f8] sm:$0xf]  ;;  %v814_v25 = vrot.slane %v812_v6, 4 }
 0x11b   : > { %v9199_v59 = vpop.f32.mrf.mxu1  ;;  %926 = vst [vmem:[#allocation3 + $0x2c] sm:$0xf] %v810_v53  ;;  %v815_v53 = vrot.slane %v8771_v12, 5 }
 0x11c   : > { %11071 = vst [vmem:[#allocation17_spill] sm:$0xff] %v9199_v59 }
 0x11f   : > { %2942 = vmatmul.bf16.gmra.mxu3 %v6770_v22  ;;  %v6974_v22 = vor.u32 %v8178_v18, %v6973_v62  ;;  %v7009_v18 = vld [vmem:[#allocation3 + $0x3f0] sm:$0xf] }
 0x122   : > { %v9196_v39 = vpop.f32.mrf.mxu3 }
 0x124   : > { %2883 = vmatmul.bf16.gmra.mxu2 %v6946_v48  ;;  %2715 = vmatmul.bf16.gmra.mxu0 %v6938_v11  ;;  %v6839_v11 = vld [vmem:[#allocation3 + $0x2b4] sm:$0xf0] }
 0x125   : > { %v6842_v62 = vor.u32 %v8139_v30, %v6839_v11 }
 0x129   : > { %v2681_v52 = vpop.f32.mrf.mxu0 }
 0x12a   : > { %v9201_v61 = vpop.f32.mrf.mxu3 }
 0x12e   : > { %v2849_v21 = vpop.f32.mrf.mxu2 }
 0x12f   : > { %2947 = vmatmul.bf16.gmra.mxu3 %v6806_v33  ;;  %v8188_v33 = vld [vmem:[#allocation3 + $0x418] sm:$0xf0] }
 0x130   : > { %v7018_v7 = vor.u32 %v8188_v33, %v7017_v3  ;;  %v8148_v33 = vld [vmem:[#allocation3 + $0x2dc] sm:$0xf] }
 0x131   : > { %v9205_v36 = vpop.f32.mrf.mxu0 }
 0x132   : > { %v9211_v26 = vpop.f32.mrf.mxu3 }
 0x134   : > { %2888 = vmatmul.bf16.gmra.mxu2 %v6982_v28  ;;  %v2765_v24 = vpop.f32.mrf.mxu1  ;;  %2720 = vmatmul.bf16.gmra.mxu0 %v6974_v22  ;;  %v811_v22 = vrot.slane %v809_v1, 4 }
 0x135   : > { %v2766_v43 = vadd.f32 %v2765_v24, %v2681_v52  ;;  %v8187_v52 = vld [vmem:[#allocation3 + $0x410] sm:$0xf0] }
 0x136   : > { %v9213_v16 = vpop.f32.mrf.mxu2  ;;  %v7010_v28 = vor.u32 %v8187_v52, %v7009_v18  ;;  %v813_v24 = vsel %vm9009_vm5, %v811_v22, %v812_v6  ;;  %v8062_v22 = vld [vmem:[#allocation3 + $0x28] sm:$0xf0] }
 0x137   : > { %v9215_v48 = vadd.f32 %v2849_v21, %v2766_v43  ;;  %v816_v43 = vsel %vm9009_vm5, %v814_v25, %v815_v53  ;;  %927 = vst [vmem:[#allocation3 + $0x50] sm:$0xf] %v813_v24 }
 0x138   : > { %928 = vst [vmem:[#allocation3 + $0x74] sm:$0xf] %v816_v43 }
 0x139   : > { %1063 = vst [vmem:[#allocation3 + $0x14] sm:$0xf] %v816_v43 }
 0x13a   : > { %v9217_v10 = vpop.f32.mrf.mxu3 }
 0x13b   : > { %v2686_v55 = vpop.f32.mrf.mxu0 }
 0x13c   : > { %v9222_v41 = vpop.f32.mrf.mxu1 }
 0x13f   : > { %2952 = vmatmul.bf16.gmra.mxu3 %v6842_v62  ;;  %v6875_v62 = vld [vmem:[#allocation3 + $0x2fc] sm:$0xf0]  ;;  %v8071_v27 = vld [vmem:[#allocation3 + $0x70] sm:$0xf0] }
 0x140   : > { %v2854_v21 = vpop.f32.mrf.mxu2  ;;  %v6878_v52 = vor.u32 %v8148_v33, %v6875_v62 }
 0x142   : > { %v9230_v30 = vpop.f32.mrf.mxu3 }
 0x143   : > { %v9232_v11 = vpop.f32.mrf.mxu0 }
 0x144   : > { %2893 = vmatmul.bf16.gmra.mxu2 %v7018_v7  ;;  %2725 = vmatmul.bf16.gmra.mxu0 %v7010_v28  ;;  %v6513_v7 = vld [vmem:[#allocation3 + $0x8] sm:$0xf]  ;;  %v8229_v28 = vld [vmem:[%s11041_s1 + $0x128] sm:$0xff] }
 0x145   : > { %2985 = vmatpush.bf16.msra.mxu0 %v8229_v28  ;;  %v6514_v24 = vor.u32 %v8062_v22, %v6513_v7  ;;  %v8157_v7 = vld [vmem:[#allocation3 + $0x324] sm:$0xf] }
 0x146   : > { %v2770_v12 = vpop.f32.mrf.mxu1 }
 0x147   : > { %v2771_v1 = vadd.f32 %v2770_v12, %v2686_v55  ;;  %v818_v55 = vrot.slane %v8806_v37, 5 }
 0x148   : > { %v9237_v57 = vpop.f32.mrf.mxu2 }
 0x149   : > { %v9239_v3 = vadd.f32 %v2854_v21, %v2771_v1  ;;  %v817_v21 = vrot.slane %v815_v53, 4  ;;  %v820_v43 = vrot.slane %v818_v55, 4 }
 0x14a   : > { %v9241_v18 = vpop.f32.mrf.mxu3 }
 0x14b   : > { %v819_v1 = vsel %vm9009_vm5, %v817_v21, %v818_v55  ;;  %v822_v33 = vsel %vm9009_vm5, %v820_v43, %v821_v63  ;;  %v8228_v21 = vld [vmem:[%s11041_s1 + $0x120] sm:$0xff]  ;;  %v6549_v43 = vld [vmem:[#allocation3 + $0x50] sm:$0xf]  ;;  %v8226_v63 = vld [vmem:[%s11041_s1 + $0x110] sm:$0xff] }
 0x14c   : > { %929 = vst [vmem:[#allocation3 + $0x98] sm:$0xf] %v819_v1  ;;  %2986 = vmatpush.bf16.msra.mxu0 %v8228_v21 }
 0x14d   : > { %v2691_v6 = vpop.f32.mrf.mxu0  ;;  %930 = vst [vmem:[#allocation3 + $0xbc] sm:$0xf] %v822_v33 }
 0x14e   : > { %v9246_v25 = vpop.f32.mrf.mxu1  ;;  %1064 = vst [vmem:[#allocation3 + $0x38] sm:$0xf] %v819_v1  ;;  %v824_v1 = vrot.slane %v8860_v44, 5  ;;  %v8227_v44 = vld [vmem:[%s11041_s1 + $0x118] sm:$0xff] }
 0x14f   : > { %2957 = vmatmul.bf16.gmra.mxu3 %v6878_v52  ;;  %1065 = vst [vmem:[#allocation3 + $0x5c] sm:$0xf] %v822_v33 }
 0x150   : > { %v825_v59 = vsel %vm9009_vm5, %v823_v5, %v824_v1  ;;  %2987 = vmatpush.bf16.msra.mxu0 %v8227_v44  ;;  %v8255_v5 = vld [vmem:[%s11041_s1 + $0x1f8] sm:$0xff] }
 0x151   : > { %931 = vst [vmem:[#allocation3 + $0xe0] sm:$0xf] %v825_v59  ;;  %3235 = vmatpush.bf16.msra.mxu3 %v8255_v5 }
 0x152   : > { %v2859_v12 = vpop.f32.mrf.mxu2  ;;  %v9254_v62 = vpop.f32.mrf.mxu3  ;;  %1201 = vst [vmem:[#allocation3 + $0x20] sm:$0xf] %v825_v59 }
 0x153   : > { %11072 = vst [vmem:[#allocation18_spill] sm:$0xff] %v9254_v62 }
 0x154   : > { %2823 = vmatmul.bf16.vlgmr.msrb.gmra.mxu0 %v6514_v24  ;;  %v6914_v24 = vor.u32 %v8157_v7, %v6911_v2  ;;  %1066 = vst [vmem:[#allocation3 + $0x80] sm:$0xf] %v825_v59  ;;  %v8246_v59 = vld [vmem:[%s11041_s1 + $0x1b0] sm:$0xff]  ;;  %v8080_v5 = vld [vmem:[#allocation3 + $0xb8] sm:$0xf0] }
 0x155   : > { %v9256_v37 = vpop.f32.mrf.mxu0  ;;  %2988 = vmatpush.bf16.msra.mxu0 %v8226_v63  ;;  %v8253_v63 = vld [vmem:[%s11041_s1 + $0x1e8] sm:$0xff] }
 0x158   : > { %v2775_v53 = vpop.f32.mrf.mxu1 }
 0x159   : > { %v2776_v52 = vadd.f32 %v2775_v53, %v2691_v6  ;;  %v6550_v53 = vor.u32 %v8071_v27, %v6549_v43  ;;  %v8166_v43 = vld [vmem:[#allocation3 + $0x36c] sm:$0xf] }
 0x15a   : > { %v9258_v22 = vpop.f32.mrf.mxu2  ;;  %v9262_v55 = vpop.f32.mrf.mxu3 }
 0x15b   : > { %v9260_v28 = vadd.f32 %v2859_v12, %v2776_v52  ;;  %11073 = vst [vmem:[#allocation19_spill] sm:$0xff] %v9262_v55  ;;  %v826_v12 = vrot.slane %v824_v1, 4  ;;  %v827_v52 = vrot.slane %v8876_v0, 5  ;;  %v8247_v0 = vld [vmem:[%s11041_s1 + $0x1b8] sm:$0xff]  ;;  %v6947_v1 = vld [vmem:[#allocation3 + $0x38c] sm:$0xf0] }
 0x15c   : > { %3151 = vmatpush.bf16.msrb.mxu2 %v8247_v0  ;;  %v6950_v13 = vor.u32 %v8166_v43, %v6947_v1  ;;  %v6585_v0 = vld [vmem:[#allocation3 + $0x98] sm:$0xf]  ;;  %v8225_v43 = vld [vmem:[%s11041_s1 + $0x108] sm:$0xff] }
 0x15d   : > { %v828_v7 = vsel %vm9009_vm5, %v826_v12, %v827_v52  ;;  %v8254_v12 = vld [vmem:[%s11041_s1 + $0x1f0] sm:$0xff]  ;;  %v829_v1 = vrot.slane %v827_v52, 4  ;;  %2989 = vmatpush.bf16.msra.mxu0 %v8225_v43  ;;  %v9340_v43 = vld [vmem:[#allocation2 + $0x80] sm:$0xf] }
 0x15e   : > { %932 = vst [vmem:[#allocation3 + $0x104] sm:$0xf] %v828_v7  ;;  %3236 = vmatpush.bf16.msra.mxu3 %v8254_v12  ;;  %v8244_v12 = vld [vmem:[%s11041_s1 + $0x1a0] sm:$0xff] }
 0x15f   : > { %v2696_v33 = vpop.f32.mrf.mxu0  ;;  %2962 = vmatmul.bf16.gmra.mxu3 %v6914_v24  ;;  %1202 = vst [vmem:[#allocation3 + $0x44] sm:$0xf] %v828_v7  ;;  %v8239_v24 = vld [vmem:[%s11041_s1 + $0x178] sm:$0xff] }
 0x160   : > { %v9268_v6 = vpop.f32.mrf.mxu1  ;;  %1067 = vst [vmem:[#allocation3 + $0xa4] sm:$0xf] %v828_v7  ;;  %3067 = vmatpush.bf16.msrb.mxu1 %v8239_v24  ;;  %3152 = vmatpush.bf16.msrb.mxu2 %v8246_v59  ;;  %v8238_v24 = vld [vmem:[%s11041_s1 + $0x170] sm:$0xff] }
 0x161   : > { %984 = vst [vmem:[#allocation3 + $0x420] sm:$0xf] %v9340_v43 }
 0x162   : > { %v9275_v2 = vpop.f32.mrf.mxu3  ;;  %3237 = vmatpush.bf16.msra.mxu3 %v8253_v63  ;;  %v9338_v63 = vld [vmem:[#allocation2 + $0x7c] sm:$0xf]  ;;  %1119 = vst [vmem:[#allocation3 + $0x3c0] sm:$0xf] %v9340_v43 }
 0x163   : > { %11074 = vst [vmem:[#allocation20_spill] sm:$0xff] %v9275_v2  ;;  %v830_v2 = vrot.slane %v8927_v51, 5 }
 0x164   : > { %v2864_v21 = vpop.f32.mrf.mxu2  ;;  %2828 = vmatmul.bf16.gmra.mxu0 %v6550_v53  ;;  %3068 = vmatpush.bf16.msrb.mxu1 %v8238_v24  ;;  %983 = vst [vmem:[#allocation3 + $0x3fc] sm:$0xf] %v9338_v63 }
 0x165   : > { %v832_v51 = vrot.slane %v830_v2, 4  ;;  %v831_v52 = vsel %vm9009_vm5, %v829_v1, %v830_v2  ;;  %v8243_v2 = vld [vmem:[%s11041_s1 + $0x198] sm:$0xff]  ;;  %v8175_v1 = vld [vmem:[#allocation3 + $0x3b4] sm:$0xf]  ;;  %1118 = vst [vmem:[#allocation3 + $0x39c] sm:$0xf] %v9338_v63 }
 0x166   : > { %933 = vst [vmem:[#allocation3 + $0x128] sm:$0xf] %v831_v52  ;;  %v8089_v15 = vld [vmem:[#allocation3 + $0x100] sm:$0xf0] }
 0x167   : > { %v9280_v27 = vpop.f32.mrf.mxu0  ;;  %1068 = vst [vmem:[#allocation3 + $0xc8] sm:$0xf] %v831_v52 }
 0x168   : > { %1203 = vst [vmem:[#allocation3 + $0x68] sm:$0xf] %v831_v52 }
 0x16a   : > { %v2780_v53 = vpop.f32.mrf.mxu1  ;;  %v9300_v44 = vpop.f32.mrf.mxu3 }
 0x16b   : > { %v2781_v7 = vadd.f32 %v2780_v53, %v2696_v33  ;;  %11075 = vst [vmem:[#allocation21_spill] sm:$0xff] %v9300_v44  ;;  %v8245_v33 = vld [vmem:[%s11041_s1 + $0x1a8] sm:$0xff] }
 0x16c   : > { %v9302_v49 = vpop.f32.mrf.mxu2  ;;  %3153 = vmatpush.bf16.msrb.mxu2 %v8245_v33  ;;  %v8237_v53 = vld [vmem:[%s11041_s1 + $0x168] sm:$0xff] }
 0x16d   : > { %v9304_v58 = vadd.f32 %v2864_v21, %v2781_v7  ;;  %v6586_v21 = vor.u32 %v8080_v5, %v6585_v0  ;;  %v11076_v0 = vrot.slane %v8941_v46, 5  ;;  %3069 = vmatpush.bf16.msrb.mxu1 %v8237_v53  ;;  %v8236_v46 = vld [vmem:[%s11041_s1 + $0x160] sm:$0xff]  ;;  %v6983_v53 = vld [vmem:[#allocation3 + $0x3d4] sm:$0xf0] }
 0x16f   : > { %2967 = vmatmul.bf16.gmra.mxu3 %v6950_v13  ;;  %v8252_v13 = vld [vmem:[%s11041_s1 + $0x1e0] sm:$0xff]  ;;  %v834_v5 = vsel %vm9009_vm5, %v832_v51, %v11076_v0  ;;  %v8250_v0 = vld [vmem:[%s11041_s1 + $0x1d0] sm:$0xff] }
 0x170   : > { %934 = vst [vmem:[#allocation3 + $0x14c] sm:$0xf] %v834_v5  ;;  %3154 = vmatpush.bf16.msrb.mxu2 %v8244_v12  ;;  %3238 = vmatpush.bf16.msra.mxu3 %v8252_v13  ;;  %v8235_v12 = vld [vmem:[%s11041_s1 + $0x158] sm:$0xff]  ;;  %v8242_v13 = vld [vmem:[%s11041_s1 + $0x190] sm:$0xff] }
 0x171   : > { %v2701_v59 = vpop.f32.mrf.mxu0  ;;  %1069 = vst [vmem:[#allocation3 + $0xec] sm:$0xf] %v834_v5  ;;  %3070 = vmatpush.bf16.msrb.mxu1 %v8236_v46 }
 0x172   : > { %v9325_v7 = vpop.f32.mrf.mxu1  ;;  %v9336_v24 = vpop.f32.mrf.mxu3  ;;  %1204 = vst [vmem:[#allocation3 + $0x8c] sm:$0xf] %v834_v5  ;;  %v8224_v5 = vld [vmem:[%s11041_s1 + $0x100] sm:$0xff] }
 0x173   : > { %11077 = vst [vmem:[#allocation22_spill] sm:$0xff] %v9336_v24  ;;  %v6986_v24 = vor.u32 %v8175_v1, %v6983_v53  ;;  %2990 = vmatpush.bf16.msra.mxu0 %v8224_v5  ;;  %v8241_v1 = vld [vmem:[%s11041_s1 + $0x188] sm:$0xff]  ;;  %v6529_v5 = vld [vmem:[#allocation3 + $0x18] sm:$0xf] }
 0x174   : > { %2833 = vmatmul.bf16.gmra.mxu0 %v6586_v21  ;;  %v8251_v21 = vld [vmem:[%s11041_s1 + $0x1d8] sm:$0xff]  ;;  %3155 = vmatpush.bf16.msrb.mxu2 %v8243_v2 }
 0x175   : > { %3239 = vmatpush.bf16.msra.mxu3 %v8251_v21  ;;  %v6621_v21 = vld [vmem:[#allocation3 + $0xe0] sm:$0xf]  ;;  %3071 = vmatpush.bf16.msrb.mxu1 %v8235_v12  ;;  %v8233_v12 = vld [vmem:[%s11041_s1 + $0x148] sm:$0xff] }
 0x176   : > { %v2869_v33 = vpop.f32.mrf.mxu2  ;;  %v6622_v53 = vor.u32 %v8089_v15, %v6621_v21 }
 0x178   : > { %3156 = vmatpush.bf16.msrb.mxu2 %v8242_v13  ;;  %v8240_v13 = vld [vmem:[%s11041_s1 + $0x180] sm:$0xff] }
 0x179   : > { %v9351_v51 = vpop.f32.mrf.mxu0  ;;  %3240 = vmatpush.bf16.msra.mxu3 %v8250_v0  ;;  %v8248_v0 = vld [vmem:[%s11041_s1 + $0x1c0] sm:$0xff] }
 0x17a   : > { %v2785_v52 = vpop.f32.mrf.mxu1  ;;  %v9367_v2 = vpop.f32.mrf.mxu3 }
 0x17b   : > { %v2786_v46 = vadd.f32 %v2785_v52, %v2701_v59  ;;  %11078 = vst [vmem:[#allocation23_spill] sm:$0xff] %v9367_v2  ;;  %v8234_v59 = vld [vmem:[%s11041_s1 + $0x150] sm:$0xff] }
 0x17c   : > { %3072 = vmatpush.bf16.msrb.mxu1 %v8234_v59  ;;  %3157 = vmatpush.bf16.msrb.mxu2 %v8241_v1  ;;  %v2768_v1 = vadd.f32 %v9222_v41, %v9205_v36  ;;  %v6523_v36 = vld [vmem:[#allocation3 + $0x34] sm:$0xf0] }
 0x17d   : > { %v9371_v44 = vadd.f32 %v2869_v33, %v2786_v46  ;;  %v8249_v33 = vld [vmem:[%s11041_s1 + $0x1c8] sm:$0xff]  ;;  %v8064_v46 = vld [vmem:[#allocation3 + $0x38] sm:$0xf0] }
 0x17e   : > { %v9373_v55 = vpop.f32.mrf.mxu2  ;;  %3241 = vmatpush.bf16.msra.mxu3 %v8249_v33  ;;  %v6530_v59 = vor.u32 %v8064_v46, %v6529_v5  ;;  %v2852_v41 = vadd.f32 %v9213_v16, %v2768_v1 }
 0x17f   : > { %2972 = vmatmul.bf16.gmra.mxu3 %v6986_v24 }
 0x180   : > { %3073 = vmatpush.bf16.msrb.mxu1 %v8233_v12  ;;  %3158 = vmatpush.bf16.msrb.mxu2 %v8240_v13  ;;  %v8059_v12 = vld [vmem:[#allocation3 + $0x14] sm:$0xf] }
 0x181   : > { %v2706_v52 = vpop.f32.mrf.mxu0  ;;  %v6526_v13 = vor.u32 %v8059_v12, %v6523_v36  ;;  %v8068_v12 = vld [vmem:[#allocation3 + $0x5c] sm:$0xf]  ;;  %v6559_v36 = vld [vmem:[#allocation3 + $0x7c] sm:$0xf0] }
 0x182   : > { %v2791_v15 = vadd.f32 %v9094_v17, %v2706_v52  ;;  %v2933_v24 = vpop.f32.mrf.mxu3  ;;  %3242 = vmatpush.bf16.msra.mxu3 %v8248_v0  ;;  %v8184_v17 = vld [vmem:[#allocation3 + $0x3fc] sm:$0xf]  ;;  %v7019_v52 = vld [vmem:[#allocation3 + $0x41c] sm:$0xf0] }
 0x183   : > { %v9395_v21 = vadd.f32 %v2933_v24, %v9215_v48  ;;  %3159 = vmatmul.bf16.vlgmr.msrb.gmra.mxu2 %v6530_v59  ;;  %v8263_v48 = vld [vmem:[%s11041_s1 + $0x238] sm:$0xff]  ;;  %v7022_v46 = vor.u32 %v8184_v17, %v7019_v52  ;;  %v8098_v24 = vld [vmem:[#allocation3 + $0x148] sm:$0xf0]  ;;  %v2773_v17 = vadd.f32 %v9246_v25, %v9232_v11  ;;  %v8063_v11 = vld [vmem:[#allocation3 + $0x30] sm:$0xf0] }
 0x184   : > { %2838 = vmatmul.bf16.gmra.mxu0 %v6622_v53  ;;  %3074 = vmatpush.bf16.msrb.mxu1 %v8232_v47  ;;  %v8073_v47 = vld [vmem:[#allocation3 + $0x80] sm:$0xf0] }
 0x185   : > { %11079 = vst [vmem:[#allocation24_spill] sm:$0xff] %v9395_v21  ;;  %3319 = vmatpush.bf16.msrb.mxu0 %v8263_v48  ;;  %v6566_v1 = vor.u32 %v8073_v47, %v6565_v35  ;;  %v8262_v47 = vld [vmem:[%s11041_s1 + $0x230] sm:$0xff] }
 0x187   : > { %v2874_v33 = vpop.f32.mrf.mxu2  ;;  %3075 = vmatmul.bf16.vlgmr.msrb.gmra.mxu1 %v6526_v13  ;;  %v8060_v13 = vld [vmem:[#allocation3 + $0x1c] sm:$0xf] }
 0x188   : > { %v9399_v2 = vadd.f32 %v2874_v33, %v2791_v15  ;;  %v6657_v15 = vld [vmem:[#allocation3 + $0x128] sm:$0xf] }
 0x189   : > { %v9407_v53 = vpop.f32.mrf.mxu0  ;;  %v6658_v33 = vor.u32 %v8098_v24, %v6657_v15  ;;  %v6601_v24 = vld [vmem:[#allocation3 + $0xa8] sm:$0xf]  ;;  %3320 = vmatpush.bf16.msrb.mxu0 %v8262_v47  ;;  %v6637_v47 = vld [vmem:[#allocation3 + $0xf0] sm:$0xf] }
 0x18a   : > { %v2935_v0 = vpop.f32.mrf.mxu3 }
 0x18b   : > { %v9410_v5 = vadd.f32 %v2935_v0, %v2852_v41  ;;  %v6531_v0 = vld [vmem:[#allocation3 + $0x3c] sm:$0xf0] }
 0x18c   : > { %v6534_v35 = vor.u32 %v8060_v13, %v6531_v0  ;;  %v8077_v0 = vld [vmem:[#allocation3 + $0xa4] sm:$0xf] }
 0x18f   : > { %v9412_v59 = vpop.f32.mrf.mxu2  ;;  %2977 = vmatmul.bf16.gmra.mxu3 %v7022_v46 }
 0x191   : > { %v2711_v21 = vpop.f32.mrf.mxu0 }
 0x192   : > { %v2796_v34 = vadd.f32 %v9128_v45, %v2711_v21  ;;  %v2938_v62 = vpop.f32.mrf.mxu3  ;;  %v6562_v45 = vor.u32 %v8068_v12, %v6559_v36  ;;  %v2857_v21 = vadd.f32 %v9237_v57, %v2773_v17  ;;  %v2778_v12 = vadd.f32 %v9268_v6, %v9256_v37  ;;  %v8072_v37 = vld [vmem:[#allocation3 + $0x78] sm:$0xf0] }
 0x193   : > { %v9416_v16 = vadd.f32 %v2938_v62, %v9239_v3  ;;  %3164 = vmatmul.bf16.gmra.mxu2 %v6566_v1  ;;  %v6521_v62 = vld [vmem:[#allocation3 + $0x10] sm:$0xf] }
 0x194   : > { %2843 = vmatmul.bf16.gmra.mxu0 %v6658_v33  ;;  %v8082_v33 = vld [vmem:[#allocation3 + $0xc8] sm:$0xf0] }
 0x197   : > { %v2879_v48 = vpop.f32.mrf.mxu2  ;;  %3080 = vmatmul.bf16.gmra.mxu1 %v6562_v45  ;;  %v6595_v45 = vld [vmem:[#allocation3 + $0xc4] sm:$0xf0] }
 0x198   : > { %v9420_v52 = vadd.f32 %v2879_v48, %v2796_v34  ;;  %v6522_v34 = vor.u32 %v8063_v11, %v6521_v62  ;;  %v6602_v48 = vor.u32 %v8082_v33, %v6601_v24  ;;  %v2862_v62 = vadd.f32 %v9258_v22, %v2778_v12 }
 0x199   : > { %v9422_v41 = vpop.f32.mrf.mxu0 }
 0x19a   : > { %v2940_v46 = vpop.f32.mrf.mxu3 }
 0x19b   : > { %v9425_v3 = vadd.f32 %v2940_v46, %v2857_v21  ;;  %v8069_v46 = vld [vmem:[#allocation3 + $0x64] sm:$0xf] }
 0x19f   : > { %v9427_v25 = vpop.f32.mrf.mxu2  ;;  %3243 = vmatmul.bf16.vlgmr.msra.gmra.mxu3 %v6534_v35  ;;  %v6598_v35 = vor.u32 %v8077_v0, %v6595_v45  ;;  %v6631_v0 = vld [vmem:[#allocation3 + $0x10c] sm:$0xf0]  ;;  %v2783_v45 = vadd.f32 %v9325_v7, %v9280_v27  ;;  %v6593_v7 = vld [vmem:[#allocation3 + $0xa0] sm:$0xf] }
 0x1a0   : > { %v8261_v27 = vld [vmem:[%s11041_s1 + $0x228] sm:$0xff] }
 0x1a1   : > { %v2716_v15 = vpop.f32.mrf.mxu0  ;;  %3321 = vmatpush.bf16.msrb.mxu0 %v8261_v27  ;;  %v8087_v27 = vld [vmem:[#allocation3 + $0xf4] sm:$0xf] }
 0x1a2   : > { %v2801_v57 = vadd.f32 %v9157_v42, %v2716_v15  ;;  %v2943_v1 = vpop.f32.mrf.mxu3  ;;  %v6567_v42 = vld [vmem:[#allocation3 + $0x84] sm:$0xf0]  ;;  %v6557_v15 = vld [vmem:[#allocation3 + $0x58] sm:$0xf] }
 0x1a3   : > { %v9434_v17 = vadd.f32 %v2943_v1, %v9260_v28  ;;  %3169 = vmatmul.bf16.gmra.mxu2 %v6602_v48  ;;  %v6558_v24 = vor.u32 %v8072_v37, %v6557_v15 }
 0x1a4   : > { %2991 = vmatmul.bf16.vlgmr.msra.gmra.mxu0 %v6522_v34  ;;  %v6570_v34 = vor.u32 %v8069_v46, %v6567_v42 }
 0x1a7   : > { %v2884_v36 = vpop.f32.mrf.mxu2  ;;  %3085 = vmatmul.bf16.gmra.mxu1 %v6598_v35 }
 0x1a8   : > { %v9438_v13 = vadd.f32 %v2884_v36, %v2801_v57  ;;  %v8091_v57 = vld [vmem:[#allocation3 + $0x110] sm:$0xf0]  ;;  %v8086_v36 = vld [vmem:[#allocation3 + $0xec] sm:$0xf] }
 0x1a9   : > { %v9440_v21 = vpop.f32.mrf.mxu0  ;;  %v6638_v12 = vor.u32 %v8091_v57, %v6637_v47  ;;  %v6634_v35 = vor.u32 %v8086_v36, %v6631_v0 }
 0x1aa   : > { %v2945_v28 = vpop.f32.mrf.mxu3 }
 0x1ab   : > { %v9443_v11 = vadd.f32 %v2945_v28, %v2862_v62  ;;  %v8078_v28 = vld [vmem:[#allocation3 + $0xac] sm:$0xf] }
 0x1af   : > { %v9445_v6 = vpop.f32.mrf.mxu2  ;;  %3248 = vmatmul.bf16.gmra.mxu3 %v6570_v34  ;;  %v2867_v34 = vadd.f32 %v9302_v49, %v2783_v45  ;;  %v2787_v49 = vpop.f32.mrf.mxu1 }
 0x1b1   : > { %v2721_v33 = vpop.f32.mrf.mxu0 }
 0x1b2   : > { %v2806_v1 = vadd.f32 %v9180_v31, %v2721_v33  ;;  %v2948_v48 = vpop.f32.mrf.mxu3  ;;  %v6603_v31 = vld [vmem:[#allocation3 + $0xcc] sm:$0xf0] }
 0x1b3   : > { %v9449_v22 = vadd.f32 %v2948_v48, %v9304_v58  ;;  %3174 = vmatmul.bf16.gmra.mxu2 %v6638_v12  ;;  %v6606_v37 = vor.u32 %v8078_v28, %v6603_v31  ;;  %v8100_v48 = vld [vmem:[#allocation3 + $0x158] sm:$0xf0]  ;;  %v2788_v28 = vadd.f32 %v2787_v49, %v9351_v51 }
 0x1b4   : > { %2996 = vmatmul.bf16.gmra.mxu0 %v6558_v24  ;;  %v8081_v24 = vld [vmem:[#allocation3 + $0xc0] sm:$0xf0] }
 0x1b5   : > { %v6594_v47 = vor.u32 %v8081_v24, %v6593_v7  ;;  %v6639_v7 = vld [vmem:[#allocation3 + $0x114] sm:$0xf0] }
 0x1b7   : > { %v2889_v46 = vpop.f32.mrf.mxu2  ;;  %3090 = vmatmul.bf16.gmra.mxu1 %v6634_v35  ;;  %v6667_v35 = vld [vmem:[#allocation3 + $0x154] sm:$0xf0] }
 0x1b8   : > { %v9453_v42 = vadd.f32 %v2889_v46, %v2806_v1  ;;  %v6673_v1 = vld [vmem:[#allocation3 + $0x138] sm:$0xf]  ;;  %v8095_v46 = vld [vmem:[#allocation3 + $0x134] sm:$0xf] }
 0x1b9   : > { %v9455_v62 = vpop.f32.mrf.mxu0  ;;  %v6674_v45 = vor.u32 %v8100_v48, %v6673_v1  ;;  %v8090_v1 = vld [vmem:[#allocation3 + $0x108] sm:$0xf0] }
 0x1ba   : > { %v2950_v15 = vpop.f32.mrf.mxu3 }
 0x1bb   : > { %v9458_v58 = vadd.f32 %v2950_v15, %v2867_v34  ;;  %v6670_v15 = vor.u32 %v8095_v46, %v6667_v35  ;;  %v8104_v35 = vld [vmem:[#allocation3 + $0x17c] sm:$0xf] }
 0x1bf   : > { %v9463_v33 = vpop.f32.mrf.mxu2  ;;  %3253 = vmatmul.bf16.gmra.mxu3 %v6606_v37 }
 0x1c1   : > { %v2726_v57 = vpop.f32.mrf.mxu0 }
 0x1c2   : > { %v2811_v12 = vadd.f32 %v9196_v39, %v2726_v57  ;;  %v2953_v36 = vpop.f32.mrf.mxu3  ;;  %v2872_v39 = vadd.f32 %v9373_v55, %v2788_v28  ;;  %v6629_v57 = vld [vmem:[#allocation3 + $0xe8] sm:$0xf]  ;;  %v6703_v28 = vld [vmem:[#allocation3 + $0x19c] sm:$0xf0] }
 0x1c3   : > { %v9467_v0 = vadd.f32 %v2953_v36, %v9371_v44  ;;  %3179 = vmatmul.bf16.gmra.mxu2 %v6674_v45  ;;  %v6642_v44 = vor.u32 %v8087_v27, %v6639_v7  ;;  %v6630_v48 = vor.u32 %v8090_v1, %v6629_v57  ;;  %v8109_v36 = vld [vmem:[#allocation3 + $0x1a0] sm:$0xf0]  ;;  %v8096_v7 = vld [vmem:[#allocation3 + $0x13c] sm:$0xf]  ;;  %v6665_v1 = vld [vmem:[#allocation3 + $0x130] sm:$0xf] }
 0x1c4   : > { %3001 = vmatmul.bf16.gmra.mxu0 %v6594_v47 }
 0x1c7   : > { %v2894_v31 = vpop.f32.mrf.mxu2  ;;  %3095 = vmatmul.bf16.gmra.mxu1 %v6670_v15  ;;  %v6706_v15 = vor.u32 %v8104_v35, %v6703_v28  ;;  %v8113_v35 = vld [vmem:[#allocation3 + $0x1c4] sm:$0xf]  ;;  %v6739_v28 = vld [vmem:[#allocation3 + $0x1e4] sm:$0xf0] }
 0x1c8   : > { %v9470_v34 = vadd.f32 %v2894_v31, %v2811_v12  ;;  %v6709_v12 = vld [vmem:[#allocation3 + $0x180] sm:$0xf]  ;;  %v2793_v31 = vadd.f32 %v9107_v4, %v9407_v53  ;;  %v8099_v4 = vld [vmem:[#allocation3 + $0x150] sm:$0xf0] }
 0x1c9   : > { %v9472_v37 = vpop.f32.mrf.mxu0  ;;  %v6710_v55 = vor.u32 %v8109_v36, %v6709_v12  ;;  %v6666_v53 = vor.u32 %v8099_v4, %v6665_v1  ;;  %v6745_v12 = vld [vmem:[#allocation3 + $0x1c8] sm:$0xf]  ;;  %v8108_v1 = vld [vmem:[#allocation3 + $0x198] sm:$0xf0] }
 0x1ca   : > { %v2955_v24 = vpop.f32.mrf.mxu3 }
 0x1cb   : > { %v9475_v47 = vadd.f32 %v2955_v24, %v2872_v39  ;;  %v2877_v39 = vadd.f32 %v9412_v59, %v2793_v31  ;;  %v8260_v24 = vld [vmem:[%s11041_s1 + $0x220] sm:$0xff]  ;;  %v8118_v59 = vld [vmem:[#allocation3 + $0x1e8] sm:$0xf0]  ;;  %v2798_v31 = vadd.f32 %v9141_v40, %v9422_v41  ;;  %v6781_v41 = vld [vmem:[#allocation3 + $0x210] sm:$0xf] }
 0x1cc   : > { %3322 = vmatpush.bf16.msrb.mxu0 %v8260_v24 }
 0x1cf   : > { %3258 = vmatmul.bf16.gmra.mxu3 %v6642_v44 }
 0x1d1   : > { %v2824_v51 = vpop.f32.mrf.mxu0 }
 0x1d2   : > { %v9478_v49 = vadd.f32 %v2824_v51, %v9073_v54  ;;  %v2958_v45 = vpop.f32.mrf.mxu3  ;;  %v6675_v54 = vld [vmem:[#allocation3 + $0x15c] sm:$0xf0] }
 0x1d3   : > { %v9481_v46 = vadd.f32 %v2958_v45, %v9399_v2  ;;  %3184 = vmatmul.bf16.gmra.mxu2 %v6710_v55  ;;  %v6678_v57 = vor.u32 %v8096_v7, %v6675_v54  ;;  %v6746_v55 = vor.u32 %v8118_v59, %v6745_v12  ;;  %v8105_v54 = vld [vmem:[#allocation3 + $0x184] sm:$0xf] }
 0x1d4   : > { %3006 = vmatmul.bf16.gmra.mxu0 %v6630_v48 }
 0x1d7   : > { %3100 = vmatmul.bf16.gmra.mxu1 %v6706_v15  ;;  %v6742_v15 = vor.u32 %v8113_v35, %v6739_v28  ;;  %v2803_v35 = vadd.f32 %v9168_v23, %v9440_v21  ;;  %v8117_v23 = vld [vmem:[#allocation3 + $0x1e0] sm:$0xf0] }
 0x1d9   : > { %v9485_v27 = vpop.f32.mrf.mxu0 }
 0x1da   : > { %v2960_v2 = vpop.f32.mrf.mxu3 }
 0x1db   : > { %v9491_v44 = vadd.f32 %v2960_v2, %v2877_v39  ;;  %v2882_v39 = vadd.f32 %v9427_v25, %v2798_v31 }
 0x1df   : > { %3263 = vmatmul.bf16.gmra.mxu3 %v6678_v57 }
 0x1e1   : > { %v2829_v48 = vpop.f32.mrf.mxu0 }
 0x1e2   : > { %v9494_v51 = vadd.f32 %v2829_v48, %v9105_v32  ;;  %v2963_v36 = vpop.f32.mrf.mxu3  ;;  %v6711_v32 = vld [vmem:[#allocation3 + $0x1a4] sm:$0xf0]  ;;  %v8127_v48 = vld [vmem:[#allocation3 + $0x230] sm:$0xf0] }
 0x1e3   : > { %v9497_v45 = vadd.f32 %v2963_v36, %v9420_v52  ;;  %3189 = vmatmul.bf16.gmra.mxu2 %v6746_v55  ;;  %v6714_v57 = vor.u32 %v8105_v54, %v6711_v32  ;;  %v6701_v52 = vld [vmem:[#allocation3 + $0x178] sm:$0xf]  ;;  %v6782_v25 = vor.u32 %v8127_v48, %v6781_v41  ;;  %v8122_v36 = vld [vmem:[#allocation3 + $0x20c] sm:$0xf]  ;;  %v6775_v55 = vld [vmem:[#allocation3 + $0x22c] sm:$0xf0]  ;;  %v2887_v54 = vadd.f32 %v9445_v6, %v2803_v35 }
 0x1e4   : > { %3011 = vmatmul.bf16.gmra.mxu0 %v6666_v53  ;;  %v6702_v4 = vor.u32 %v8108_v1, %v6701_v52  ;;  %v6778_v28 = vor.u32 %v8122_v36, %v6775_v55  ;;  %v8259_v32 = vld [vmem:[%s11041_s1 + $0x218] sm:$0xff]  ;;  %v8131_v36 = vld [vmem:[#allocation3 + $0x254] sm:$0xf]  ;;  %v6811_v55 = vld [vmem:[#allocation3 + $0x274] sm:$0xf0] }
 0x1e5   : > { %3323 = vmatpush.bf16.msrb.mxu0 %v8259_v32  ;;  %v8136_v6 = vld [vmem:[#allocation3 + $0x278] sm:$0xf0]  ;;  %v6814_v35 = vor.u32 %v8131_v36, %v6811_v55  ;;  %v2813_v36 = vadd.f32 %v9201_v61, %v9472_v37  ;;  %v6809_v61 = vld [vmem:[#allocation3 + $0x250] sm:$0xf]  ;;  %v8135_v37 = vld [vmem:[#allocation3 + $0x270] sm:$0xf0] }
 0x1e6   : > { %v8140_v55 = vld [vmem:[#allocation3 + $0x29c] sm:$0xf] }
 0x1e7   : > { %3105 = vmatmul.bf16.gmra.mxu1 %v6742_v15  ;;  %v8114_v15 = vld [vmem:[#allocation3 + $0x1cc] sm:$0xf] }
 0x1e9   : > { %v9501_v7 = vpop.f32.mrf.mxu0 }
 0x1ea   : > { %v2965_v24 = vpop.f32.mrf.mxu3 }
 0x1eb   : > { %v9504_v2 = vadd.f32 %v2965_v24, %v2882_v39 }
 0x1ef   : > { %3268 = vmatmul.bf16.gmra.mxu3 %v6714_v57  ;;  %v6737_v57 = vld [vmem:[#allocation3 + $0x1c0] sm:$0xf] }
 0x1f0   : > { %v6738_v21 = vor.u32 %v8117_v23, %v6737_v57  ;;  %v6773_v57 = vld [vmem:[#allocation3 + $0x208] sm:$0xf]  ;;  %v8126_v23 = vld [vmem:[#allocation3 + $0x228] sm:$0xf0] }
 0x1f1   : > { %v2834_v53 = vpop.f32.mrf.mxu0 }
 0x1f2   : > { %v9507_v40 = vadd.f32 %v2834_v53, %v9132_v50  ;;  %v2968_v12 = vpop.f32.mrf.mxu3  ;;  %v6747_v50 = vld [vmem:[#allocation3 + $0x1ec] sm:$0xf0]  ;;  %v2896_v53 = vpop.f32.mrf.mxu2 }
 0x1f3   : > { %v9510_v59 = vadd.f32 %v2968_v12, %v9438_v13  ;;  %3194 = vmatmul.bf16.gmra.mxu2 %v6782_v25  ;;  %v6750_v24 = vor.u32 %v8114_v15, %v6747_v50  ;;  %v2808_v25 = vadd.f32 %v9184_v14, %v9455_v62  ;;  %v6783_v15 = vld [vmem:[#allocation3 + $0x234] sm:$0xf0]  ;;  %v6774_v14 = vor.u32 %v8126_v23, %v6773_v57 }
 0x1f4   : > { %3016 = vmatmul.bf16.gmra.mxu0 %v6702_v4  ;;  %v6817_v4 = vld [vmem:[#allocation3 + $0x258] sm:$0xf] }
 0x1f5   : > { %v6818_v12 = vor.u32 %v8136_v6, %v6817_v4  ;;  %v6853_v4 = vld [vmem:[#allocation3 + $0x2a0] sm:$0xf]  ;;  %v8145_v6 = vld [vmem:[#allocation3 + $0x2c0] sm:$0xf0]  ;;  %v8258_v57 = vld [vmem:[%s11041_s1 + $0x210] sm:$0xff] }
 0x1f6   : > { %3324 = vmatpush.bf16.msrb.mxu0 %v8258_v57 }
 0x1f7   : > { %3110 = vmatmul.bf16.gmra.mxu1 %v6778_v28 }
 0x1f9   : > { %v9514_v31 = vpop.f32.mrf.mxu0 }
 0x1fa   : > { %v2970_v13 = vpop.f32.mrf.mxu3 }
 0x1fb   : > { %v9520_v39 = vadd.f32 %v2970_v13, %v2887_v54  ;;  %v2892_v54 = vadd.f32 %v9463_v33, %v2808_v25  ;;  %v6854_v25 = vor.u32 %v8145_v6, %v6853_v4  ;;  %v2909_v4 = vadd.f32 %v9211_v26, %v9478_v49  ;;  %v8149_v49 = vld [vmem:[#allocation3 + $0x2e4] sm:$0xf] }
 0x1fc   : > { %v6810_v6 = vor.u32 %v8135_v37, %v6809_v61  ;;  %v8141_v37 = vld [vmem:[#allocation3 + $0x2a4] sm:$0xf] }
 0x1ff   : > { %3273 = vmatmul.bf16.gmra.mxu3 %v6750_v24 }
 0x201   : > { %v2839_v52 = vpop.f32.mrf.mxu0 }
 0x202   : > { %v9523_v1 = vadd.f32 %v2839_v52, %v9161_v9  ;;  %v2973_v41 = vpop.f32.mrf.mxu3  ;;  %v8123_v9 = vld [vmem:[#allocation3 + $0x214] sm:$0xf] }
 0x203   : > { %v9526_v48 = vadd.f32 %v2973_v41, %v9453_v42  ;;  %3199 = vmatmul.bf16.gmra.mxu2 %v6818_v12  ;;  %v6786_v42 = vor.u32 %v8123_v9, %v6783_v15 }
 0x204   : > { %3021 = vmatmul.bf16.gmra.mxu0 %v6738_v21  ;;  %v3076_v50 = vpop.f32.mrf.mxu1 }
 0x206   : > { %v3160_v13 = vpop.f32.mrf.mxu2 }
 0x207   : > { %3115 = vmatmul.bf16.gmra.mxu1 %v6814_v35  ;;  %v6847_v35 = vld [vmem:[#allocation3 + $0x2bc] sm:$0xf0] }
 0x208   : > { %v6850_v9 = vor.u32 %v8140_v55, %v6847_v35  ;;  %v6889_v55 = vld [vmem:[#allocation3 + $0x2e8] sm:$0xf]  ;;  %v8154_v35 = vld [vmem:[#allocation3 + $0x308] sm:$0xf0] }
 0x209   : > { %v9530_v28 = vpop.f32.mrf.mxu0  ;;  %v6890_v57 = vor.u32 %v8154_v35, %v6889_v55 }
 0x20a   : > { %v2975_v32 = vpop.f32.mrf.mxu3 }
 0x20b   : > { %v9533_v24 = vadd.f32 %v2975_v32, %v2892_v54  ;;  %v6819_v54 = vld [vmem:[#allocation3 + $0x27c] sm:$0xf0] }
 0x20c   : > { %v3078_v21 = vpop.f32.mrf.mxu1 }
 0x20e   : > { %v3162_v12 = vpop.f32.mrf.mxu2 }
 0x20f   : > { %3278 = vmatmul.bf16.gmra.mxu3 %v6786_v42  ;;  %v2897_v42 = vadd.f32 %v2896_v53, %v2813_v36 }
 0x211   : > { %v2844_v62 = vpop.f32.mrf.mxu0 }
 0x212   : > { %v9536_v52 = vadd.f32 %v2844_v62, %v9182_v8  ;;  %v2978_v41 = vpop.f32.mrf.mxu3  ;;  %v8132_v8 = vld [vmem:[#allocation3 + $0x25c] sm:$0xf] }
 0x213   : > { %v9539_v33 = vadd.f32 %v2978_v41, %v9470_v34  ;;  %3204 = vmatmul.bf16.gmra.mxu2 %v6854_v25  ;;  %v6822_v62 = vor.u32 %v8132_v8, %v6819_v54  ;;  %v2743_v25 = vadd.f32 %v9090_v19, %v9088_v60 }
 0x214   : > { %3026 = vmatmul.bf16.gmra.mxu0 %v6774_v14  ;;  %v3081_v32 = vpop.f32.mrf.mxu1 }
 0x215   : > { %11080 = vst [vmem:[#allocation25_spill] sm:$0xff] %v9539_v33 }
 0x216   : > { %v3165_v23 = vpop.f32.mrf.mxu2 }
 0x217   : > { %3120 = vmatmul.bf16.gmra.mxu1 %v6850_v9  ;;  %v2827_v9 = vadd.f32 %v9485_v27, %v2743_v25  ;;  %v8144_v25 = vld [vmem:[#allocation3 + $0x2b8] sm:$0xf0] }
 0x219   : > { %v9543_v15 = vpop.f32.mrf.mxu0  ;;  %v2911_v61 = vadd.f32 %v9217_v10, %v2827_v9  ;;  %v2914_v10 = vadd.f32 %v9230_v30, %v9494_v51 }
 0x21a   : > { %v2980_v34 = vpop.f32.mrf.mxu3 }
 0x21b   : > { %v9548_v14 = vadd.f32 %v2980_v34, %v2897_v42  ;;  %v6883_v34 = vld [vmem:[#allocation3 + $0x304] sm:$0xf0] }
 0x21c   : > { %v9552_v53 = vpop.f32.mrf.mxu1  ;;  %v6886_v60 = vor.u32 %v8149_v49, %v6883_v34  ;;  %v8379_v34 = vld [vmem:[%s11044_s4 + $0x38] sm:$0xff] }
 0x21d   : > { %11081 = vst [vmem:[#allocation26_spill] sm:$0xff] %v9548_v14  ;;  %5775 = vmatpush.bf16.msra.mxu1 %v8379_v34  ;;  %v11082_v34 = vld [vmem:[#allocation18_spill] sm:$0xff] }
 0x21e   : > { %v9556_v8 = vpop.f32.mrf.mxu2 }
 0x21f   : > { %3283 = vmatmul.bf16.gmra.mxu3 %v6822_v62 }
 0x221   : > { %v2992_v41 = vpop.f32.mrf.mxu0 }
 0x222   : > { %v2993_v36 = vadd.f32 %v2992_v41, %v2909_v4  ;;  %v3244_v42 = vpop.f32.mrf.mxu3  ;;  %v6855_v4 = vld [vmem:[#allocation3 + $0x2c4] sm:$0xf0] }
 0x223   : > { %3209 = vmatmul.bf16.gmra.mxu2 %v6890_v57 }
 0x224   : > { %v3077_v54 = vadd.f32 %v3076_v50, %v2993_v36  ;;  %3031 = vmatmul.bf16.gmra.mxu0 %v6810_v6  ;;  %v9562_v41 = vpop.f32.mrf.mxu1  ;;  %v6858_v6 = vor.u32 %v8141_v37, %v6855_v4  ;;  %v8150_v37 = vld [vmem:[#allocation3 + $0x2ec] sm:$0xf]  ;;  %v6891_v4 = vld [vmem:[#allocation3 + $0x30c] sm:$0xf0] }
 0x226   : > { %v3161_v26 = vadd.f32 %v3160_v13, %v3077_v54  ;;  %v9564_v27 = vpop.f32.mrf.mxu2  ;;  %v6845_v13 = vld [vmem:[#allocation3 + $0x298] sm:$0xf] }
 0x227   : > { %3125 = vmatmul.bf16.gmra.mxu1 %v6886_v60  ;;  %v6846_v35 = vor.u32 %v8144_v25, %v6845_v13  ;;  %v8158_v60 = vld [vmem:[#allocation3 + $0x32c] sm:$0xf]  ;;  %v991_v25 = vshll.u32 %v9338_v63, 16 }
 0x228   : > { %v9559_v62 = vadd.f32 %v3244_v42, %v3161_v26  ;;  %v8387_v42 = vld [vmem:[%s11044_s4 + $0x78] sm:$0xff] }
 0x229   : > { %v2994_v19 = vpop.f32.mrf.mxu0  ;;  %5836 = vmatpush.bf16.msra.mxu2 %v8387_v42 }
 0x22a   : > { %v2995_v14 = vadd.f32 %v2994_v19, %v2911_v61  ;;  %v3246_v33 = vpop.f32.mrf.mxu3  ;;  %v6919_v19 = vld [vmem:[#allocation3 + $0x34c] sm:$0xf0] }
 0x22c   : > { %v3079_v50 = vadd.f32 %v3078_v21, %v2995_v14  ;;  %v9573_v54 = vpop.f32.mrf.mxu1  ;;  %v2748_v21 = vadd.f32 %v9122_v29, %v9120_v20 }
 0x22e   : > { %v3163_v36 = vadd.f32 %v3162_v12, %v3079_v50  ;;  %v6925_v12 = vld [vmem:[#allocation3 + $0x330] sm:$0xf]  ;;  %v9577_v26 = vpop.f32.mrf.mxu2  ;;  %v2832_v30 = vadd.f32 %v9501_v7, %v2748_v21  ;;  %v6922_v50 = vor.u32 %v8158_v60, %v6919_v19  ;;  %v8153_v21 = vld [vmem:[#allocation3 + $0x300] sm:$0xf0] }
 0x22f   : > { %3288 = vmatmul.bf16.gmra.mxu3 %v6858_v6  ;;  %v8257_v7 = vld [vmem:[%s11041_s1 + $0x208] sm:$0xff] }
 0x230   : > { %v9566_v55 = vadd.f32 %v3246_v33, %v3163_v36  ;;  %v8163_v33 = vld [vmem:[#allocation3 + $0x350] sm:$0xf0]  ;;  %v2916_v29 = vadd.f32 %v9241_v18, %v2832_v30  ;;  %3325 = vmatpush.bf16.msrb.mxu0 %v8257_v7  ;;  %v995_v36 = vshrl.u32 %v9338_v63, 16  ;;  %v11083_v7 = vld [vmem:[#allocation12_spill] sm:$0xff] }
 0x231   : > { %v2997_v9 = vpop.f32.mrf.mxu0  ;;  %v6926_v49 = vor.u32 %v8163_v33, %v6925_v12  ;;  %v993_v12 = vrot.slane %v991_v25, 5  ;;  %v8525_v25 = vld [vmem:[%s11044_s4 + $0x180] sm:$0xff] }
 0x232   : > { %v2998_v14 = vadd.f32 %v2997_v9, %v2914_v10  ;;  %v3249_v57 = vpop.f32.mrf.mxu3  ;;  %v6881_v10 = vld [vmem:[#allocation3 + $0x2e0] sm:$0xf]  ;;  %v997_v33 = vrot.slane %v995_v36, 4 }
 0x233   : > { %3214 = vmatmul.bf16.gmra.mxu2 %v6926_v49  ;;  %v1001_v49 = vshll.u32 %v9340_v43, 16  ;;  %v6882_v60 = vor.u32 %v8153_v21, %v6881_v10 }
 0x234   : > { %v3082_v51 = vadd.f32 %v3081_v32, %v2998_v14  ;;  %3036 = vmatmul.bf16.gmra.mxu0 %v6846_v35  ;;  %v9589_v6 = vpop.f32.mrf.mxu1  ;;  %v6894_v35 = vor.u32 %v8150_v37, %v6891_v4 }
 0x235   : > { %v1003_v37 = vrot.slane %v1001_v49, 5 }
 0x236   : > { %v3166_v61 = vadd.f32 %v3165_v23, %v3082_v51  ;;  %v985_v23 = vshrl.u32 %v8975_v38, 16  ;;  %v9594_v42 = vpop.f32.mrf.mxu2  ;;  %v998_v51 = vor.u32 %v997_v33, %v993_v12  ;;  %v8167_v33 = vld [vmem:[#allocation3 + $0x374] sm:$0xf] }
 0x237   : > { %3130 = vmatmul.bf16.gmra.mxu1 %v6922_v50 }
 0x238   : > { %v9583_v20 = vadd.f32 %v3249_v57, %v3166_v61  ;;  %v987_v14 = vrot.slane %v985_v23, 4  ;;  %v2919_v61 = vadd.f32 %v11082_v34, %v9507_v40  ;;  %v8172_v23 = vld [vmem:[#allocation3 + $0x398] sm:$0xf0] }
 0x239   : > { %v2999_v32 = vpop.f32.mrf.mxu0 }
 0x23a   : > { %v3000_v13 = vadd.f32 %v2999_v32, %v2916_v29  ;;  %v3251_v18 = vpop.f32.mrf.mxu3  ;;  %v988_v30 = vor.u32 %v987_v14, %v8992_v56  ;;  %v999_v29 = vrot.slane %v998_v51, 4 }
 0x23c   : > { %v3084_v9 = vadd.f32 %v9552_v53, %v3000_v13  ;;  %v989_v53 = vrot.slane %v988_v30, 4  ;;  %v9604_v50 = vpop.f32.mrf.mxu1  ;;  %v6961_v13 = vld [vmem:[#allocation3 + $0x378] sm:$0xf]  ;;  %v1004_v40 = vsel %vm8727_vm2, %v999_v29, %v1003_v37  ;;  %v11086_v30 = vld [vmem:[#allocation19_spill] sm:$0xff]  ;;  %v1005_v29 = vshrl.u32 %v9340_v43, 16 }
 0x23d   : > { %v6962_v21 = vor.u32 %v8172_v23, %v6961_v13  ;;  %1181 = vst [vmem:[#allocation3 + $0x3a0] sm:$0xf] %v1004_v40 }
 0x23e   : > { %v3168_v57 = vadd.f32 %v9556_v8, %v3084_v9  ;;  %v11084_v8 = vld [vmem:[#allocation13_spill] sm:$0xff]  ;;  %v994_v36 = vsel %vm8727_vm2, %v989_v53, %v993_v12  ;;  %v9612_v10 = vpop.f32.mrf.mxu2  ;;  %1046 = vst [vmem:[#allocation3 + $0x400] sm:$0xf] %v1004_v40  ;;  %v6955_v12 = vld [vmem:[#allocation3 + $0x394] sm:$0xf0]  ;;  %v1007_v23 = vrot.slane %v1005_v29, 4 }
 0x23f   : > { %3293 = vmatmul.bf16.gmra.mxu3 %v6894_v35  ;;  %v2753_v32 = vadd.f32 %v11084_v8, %v11083_v7  ;;  %1180 = vst [vmem:[#allocation3 + $0x37c] sm:$0xf] %v994_v36  ;;  %v6958_v49 = vor.u32 %v8167_v33, %v6955_v12  ;;  %v8162_v40 = vld [vmem:[#allocation3 + $0x348] sm:$0xf0] }
 0x240   : > { %v9602_v19 = vadd.f32 %v3251_v18, %v3168_v57  ;;  %1045 = vst [vmem:[#allocation3 + $0x3dc] sm:$0xf] %v994_v36 }
 0x241   : > { %v3002_v4 = vpop.f32.mrf.mxu0  ;;  %v2837_v35 = vadd.f32 %v9514_v31, %v2753_v32  ;;  %v6927_v31 = vld [vmem:[#allocation3 + $0x354] sm:$0xf0] }
 0x242   : > { %v3003_v56 = vadd.f32 %v3002_v4, %v2919_v61  ;;  %v3254_v18 = vpop.f32.mrf.mxu3  ;;  %v8159_v61 = vld [vmem:[#allocation3 + $0x334] sm:$0xf] }
 0x243   : > { %v2921_v51 = vadd.f32 %v11086_v30, %v2837_v35  ;;  %3219 = vmatmul.bf16.gmra.mxu2 %v6962_v21  ;;  %v6930_v13 = vor.u32 %v8159_v61, %v6927_v31  ;;  %v8386_v21 = vld [vmem:[%s11044_s4 + $0x70] sm:$0xff] }
 0x244   : > { %v3087_v9 = vadd.f32 %v9562_v41, %v3003_v56  ;;  %3041 = vmatmul.bf16.gmra.mxu0 %v6882_v60  ;;  %v9620_v53 = vpop.f32.mrf.mxu1  ;;  %v9622_v41 = vld [vmem:[#allocation2 + $0x84] sm:$0xf]  ;;  %5837 = vmatpush.bf16.msra.mxu2 %v8386_v21  ;;  %v1052_v21 = vrot.slane %v9338_v63, 5  ;;  %v11096_v63 = vld [vmem:[#allocation21_spill] sm:$0xff] }
 0x245   : > { %1120 = vst [vmem:[#allocation3 + $0x3e4] sm:$0xf] %v9622_v41  ;;  %v1011_v8 = vshll.u32 %v9622_v41, 16  ;;  %v6917_v56 = vld [vmem:[#allocation3 + $0x328] sm:$0xf] }
 0x246   : > { %v3171_v14 = vadd.f32 %v9564_v27, %v3087_v9  ;;  %v1123_v27 = vshrl.u32 %v9622_v41, 16  ;;  %v9627_v7 = vpop.f32.mrf.mxu2 }
 0x247   : > { %11087 = vst [vmem:[#allocation18_spill] sm:$0xff] %v9627_v7  ;;  %3135 = vmatmul.bf16.gmra.mxu1 %v6958_v49  ;;  %v1013_v35 = vrot.slane %v1011_v8, 5  ;;  %v6918_v49 = vor.u32 %v8162_v40, %v6917_v56  ;;  %v11093_v56 = vrot.slane %v8975_v38, 5 }
 0x248   : > { %v9617_v57 = vadd.f32 %v3254_v18, %v3171_v14  ;;  %v1125_v36 = vrot.slane %v1123_v27, 4  ;;  %v9631_v18 = vld [vmem:[#allocation2 + $0x88] sm:$0xf]  ;;  %v1008_v14 = vor.u32 %v1007_v23, %v1003_v37  ;;  %v11091_v37 = vld [vmem:[#allocation14_spill] sm:$0xff]  ;;  %v11092_v27 = vld [vmem:[#allocation15_spill] sm:$0xff] }
 0x249   : > { %v3004_v34 = vpop.f32.mrf.mxu0  ;;  %11088 = vst [vmem:[#allocation12_spill] sm:$0xff] %v9631_v18  ;;  %v1129_v33 = vshll.u32 %v9631_v18, 16  ;;  %v2758_v29 = vadd.f32 %v11092_v27, %v11091_v37  ;;  %v1133_v27 = vshrl.u32 %v9631_v18, 16 }
 0x24a   : > { %v3005_v60 = vadd.f32 %v3004_v34, %v2921_v51  ;;  %v3256_v4 = vpop.f32.mrf.mxu3  ;;  %1121 = vst [vmem:[#allocation3 + $0x408] sm:$0xf] %v9631_v18  ;;  %v1126_v30 = vor.u32 %v1125_v36, %v1013_v35  ;;  %v1009_v34 = vrot.slane %v1008_v14, 4 }
 0x24b   : > { %v2842_v14 = vadd.f32 %v9530_v28, %v2758_v29 }
 0x24c   : > { %v3089_v32 = vadd.f32 %v9573_v54, %v3005_v60  ;;  %v11089_v54 = vld [vmem:[#allocation20_spill] sm:$0xff]  ;;  %v9643_v31 = vpop.f32.mrf.mxu1  ;;  %v1127_v60 = vrot.slane %v1126_v30, 4  ;;  %v8181_v23 = vld [vmem:[#allocation3 + $0x3e0] sm:$0xf0] }
 0x24d   : > { %v2924_v12 = vadd.f32 %v11089_v54, %v9523_v1  ;;  %11090 = vst [vmem:[#allocation13_spill] sm:$0xff] %v9643_v31  ;;  %v8378_v1 = vld [vmem:[%s11044_s4 + $0x30] sm:$0xff]  ;;  %v2926_v30 = vadd.f32 %v11096_v63, %v2842_v14 }
 0x24e   : > { %v3173_v9 = vadd.f32 %v9577_v26, %v3089_v32  ;;  %v1131_v26 = vrot.slane %v1129_v33, 5  ;;  %v6997_v32 = vld [vmem:[#allocation3 + $0x3c0] sm:$0xf]  ;;  %v9656_v40 = vpop.f32.mrf.mxu2  ;;  %5776 = vmatpush.bf16.msra.mxu1 %v8378_v1  ;;  %v6953_v1 = vld [vmem:[#allocation3 + $0x370] sm:$0xf] }
 0x24f   : > { %3298 = vmatmul.bf16.gmra.mxu3 %v6930_v13  ;;  %v1051_v13 = vrot.slane %v11093_v56, 4  ;;  %11094 = vst [vmem:[#allocation10_spill] sm:$0xff] %v9656_v40 }
 0x250   : > { %v9641_v51 = vadd.f32 %v3256_v4, %v3173_v9  ;;  %v1014_v4 = vsel %vm8727_vm2, %v1009_v34, %v1013_v35  ;;  %v1132_v9 = vsel %vm8727_vm2, %v1127_v60, %v1131_v26  ;;  %v6998_v35 = vor.u32 %v8181_v23, %v6997_v32  ;;  %v8176_v32 = vld [vmem:[#allocation3 + $0x3bc] sm:$0xf] }
 0x251   : > { %v3007_v61 = vpop.f32.mrf.mxu0  ;;  %1182 = vst [vmem:[#allocation3 + $0x3c4] sm:$0xf] %v1014_v4  ;;  %v1053_v54 = vsel %vm9009_vm5, %v1051_v13, %v1052_v21  ;;  %v1135_v13 = vrot.slane %v1133_v27, 4 }
 0x252   : > { %v3008_v8 = vadd.f32 %v3007_v61, %v2924_v12  ;;  %v9654_v36 = vpop.f32.mrf.mxu3  ;;  %1183 = vst [vmem:[#allocation3 + $0x3e8] sm:$0xf] %v1132_v9  ;;  %v8256_v12 = vld [vmem:[%s11041_s1 + $0x200] sm:$0xff]  ;;  %v9673_v61 = vld [vmem:[#allocation2 + $0x8c] sm:$0xf] }
 0x253   : > { %1047 = vst [vmem:[#allocation3 + $0x424] sm:$0xf] %v1014_v4  ;;  %3224 = vmatmul.bf16.gmra.mxu2 %v6998_v35  ;;  %3326 = vmatpush.bf16.msrb.mxu0 %v8256_v12  ;;  %v1143_v37 = vshrl.u32 %v9673_v61, 16  ;;  %v1139_v23 = vshll.u32 %v9673_v61, 16  ;;  %v8171_v4 = vld [vmem:[#allocation3 + $0x390] sm:$0xf0]  ;;  %v1136_v63 = vor.u32 %v1135_v13, %v1131_v26 }
 0x254   : > { %v9663_v33 = vadd.f32 %v9589_v6, %v3008_v8  ;;  %3046 = vmatmul.bf16.gmra.mxu0 %v6918_v49  ;;  %1090 = vst [vmem:[#allocation3 + $0x3e0] sm:$0xf] %v1053_v54  ;;  %v8168_v6 = vld [vmem:[#allocation3 + $0x37c] sm:$0xf]  ;;  %v6963_v49 = vld [vmem:[#allocation3 + $0x39c] sm:$0xf0]  ;;  %v9671_v34 = vpop.f32.mrf.mxu1  ;;  %v6954_v7 = vor.u32 %v8171_v4, %v6953_v1 }
 0x255   : > { %1225 = vst [vmem:[#allocation3 + $0x380] sm:$0xf] %v1053_v54  ;;  %v6966_v56 = vor.u32 %v8168_v6, %v6963_v49  ;;  %v1145_v9 = vrot.slane %v1143_v37, 4  ;;  %v372_v35 = vld [vmem:[#allocation2 + $0x90] sm:$0xf]  ;;  %v1141_v54 = vrot.slane %v1139_v23, 5 }
 0x256   : > { %11097 = vst [vmem:[#allocation19_spill] sm:$0xff] %v9673_v61  ;;  %v9682_v8 = vpop.f32.mrf.mxu2  ;;  %v11101_v6 = vld [vmem:[#allocation16_spill] sm:$0xff]  ;;  %v11102_v49 = vld [vmem:[#allocation17_spill] sm:$0xff]  ;;  %v1054_v1 = vrot.slane %v1052_v21, 4 }
 0x257   : > { %1122 = vst [vmem:[#allocation3 + $0x42c] sm:$0xf] %v9673_v61  ;;  %v1146_v31 = vor.u32 %v1145_v9, %v1141_v54  ;;  %v2763_v37 = vadd.f32 %v11102_v49, %v11101_v6  ;;  %v7033_v23 = vld [vmem:[#allocation3 + $0x408] sm:$0xf]  ;;  %v8385_v49 = vld [vmem:[%s11044_s4 + $0x68] sm:$0xff] }
 0x258   : > { %11099 = vst [vmem:[#allocation14_spill] sm:$0xff] %v9682_v8  ;;  %v1137_v8 = vrot.slane %v1136_v63, 4  ;;  %5838 = vmatpush.bf16.msra.mxu2 %v8385_v49  ;;  %v7025_v49 = vld [vmem:[#allocation3 + $0x400] sm:$0xf] }
 0x259   : > { %v3009_v28 = vpop.f32.mrf.mxu0 }
 0x25a   : > { %v9675_v60 = vadd.f32 %v3009_v28, %v2926_v30  ;;  %v9680_v29 = vpop.f32.mrf.mxu3  ;;  %v1149_v30 = vshll.u32 %v372_v35, 16  ;;  %v11100_v28 = vld [vmem:[#allocation22_spill] sm:$0xff] }
 0x25b   : > { %11098 = vst [vmem:[#allocation20_spill] sm:$0xff] %v9680_v29  ;;  %v6991_v14 = vld [vmem:[#allocation3 + $0x3dc] sm:$0xf0]  ;;  %v2929_v40 = vadd.f32 %v11100_v28, %v9536_v52  ;;  %v1055_v29 = vrot.slane %v9340_v43, 5  ;;  %v1142_v52 = vsel %vm8727_vm2, %v1137_v8, %v1141_v54  ;;  %v8177_v54 = vld [vmem:[#allocation3 + $0x3c4] sm:$0xf] }
 0x25c   : > { %v6994_v12 = vor.u32 %v8176_v32, %v6991_v14  ;;  %v1151_v61 = vrot.slane %v1149_v30, 5  ;;  %v9690_v18 = vpop.f32.mrf.mxu1  ;;  %v1147_v32 = vrot.slane %v1146_v31, 4  ;;  %1184 = vst [vmem:[#allocation3 + $0x40c] sm:$0xf] %v1142_v52  ;;  %v11057_v31 = vrot.slane %v9622_v41, 5 }
 0x25d   : > { %v1057_v4 = vrot.slane %v1055_v29, 4  ;;  %v1056_v21 = vsel %vm9009_vm5, %v1054_v1, %v1055_v29 }
 0x25e   : > { %3140 = vmatmul.bf16.gmra.mxu1 %v6994_v12  ;;  %v8190_v13 = vld [vmem:[#allocation3 + $0x428] sm:$0xf0]  ;;  %v9697_v43 = vpop.f32.mrf.mxu2  ;;  %v1152_v14 = vsel %vm8727_vm2, %v1147_v32, %v1151_v61  ;;  %1091 = vst [vmem:[#allocation3 + $0x404] sm:$0xf] %v1056_v21  ;;  %v11103_v61 = vld [vmem:[#allocation23_spill] sm:$0xff] }
 0x25f   : > { %3303 = vmatmul.bf16.gmra.mxu3 %v6966_v56  ;;  %v2847_v56 = vadd.f32 %v9543_v15, %v2763_v37  ;;  %v7034_v35 = vor.u32 %v8190_v13, %v7033_v23  ;;  %1185 = vst [vmem:[#allocation3 + $0x430] sm:$0xf] %v1152_v14  ;;  %v1059_v15 = vsel %vm9009_vm5, %v1057_v4, %v11057_v31  ;;  %v6989_v37 = vld [vmem:[#allocation3 + $0x3b8] sm:$0xf]  ;;  %v8377_v13 = vld [vmem:[%s11044_s4 + $0x28] sm:$0xff] }
 0x260   : > { %1092 = vst [vmem:[#allocation3 + $0x428] sm:$0xf] %v1059_v15  ;;  %v11105_v4 = vld [vmem:[#allocation24_spill] sm:$0xff]  ;;  %5777 = vmatpush.bf16.msra.mxu1 %v8377_v13 }
 0x261   : > { %v3012_v27 = vpop.f32.mrf.mxu0  ;;  %1226 = vst [vmem:[#allocation3 + $0x3a4] sm:$0xf] %v1056_v21  ;;  %v2931_v8 = vadd.f32 %v11103_v61, %v2847_v56 }
 0x262   : > { %v3013_v26 = vadd.f32 %v3012_v27, %v2929_v40  ;;  %v9695_v9 = vpop.f32.mrf.mxu3  ;;  %1227 = vst [vmem:[#allocation3 + $0x3c8] sm:$0xf] %v1059_v15  ;;  %v8180_v27 = vld [vmem:[#allocation3 + $0x3d8] sm:$0xf0] }
 0x263   : > { %3229 = vmatmul.bf16.gmra.mxu2 %v7034_v35  ;;  %v6990_v23 = vor.u32 %v8180_v27, %v6989_v37  ;;  %v8186_v61 = vld [vmem:[#allocation3 + $0x40c] sm:$0xf]  ;;  %v8189_v37 = vld [vmem:[#allocation3 + $0x420] sm:$0xf0] }
 0x264   : > { %v9703_v40 = vadd.f32 %v9620_v53, %v3013_v26  ;;  %3051 = vmatmul.bf16.gmra.mxu0 %v6954_v7  ;;  %v6999_v7 = vld [vmem:[#allocation3 + $0x3e4] sm:$0xf0]  ;;  %v3106_v12 = vpop.f32.mrf.mxu1  ;;  %v7026_v27 = vor.u32 %v8189_v37, %v7025_v49  ;;  %v6537_v49 = vld [vmem:[#allocation3 + $0x20] sm:$0xf] }
 0x265   : > { %v7002_v28 = vor.u32 %v8177_v54, %v6999_v7  ;;  %v8185_v6 = vld [vmem:[#allocation3 + $0x404] sm:$0xf] }
 0x266   : > { %v9716_v29 = vpop.f32.mrf.mxu2 }
 0x267   : > { %11104 = vst [vmem:[#allocation15_spill] sm:$0xff] %v9716_v29  ;;  %v7027_v32 = vld [vmem:[#allocation3 + $0x424] sm:$0xf0] }
 0x268   : > { %v7030_v26 = vor.u32 %v8185_v6, %v7027_v32 }
 0x269   : > { %v3014_v53 = vpop.f32.mrf.mxu0 }
 0x26a   : > { %v9712_v63 = vadd.f32 %v3014_v53, %v2931_v8  ;;  %v9714_v30 = vpop.f32.mrf.mxu3  ;;  %v7035_v8 = vld [vmem:[#allocation3 + $0x42c] sm:$0xf0] }
 0x26b   : > { %v7038_v6 = vor.u32 %v8186_v61, %v7035_v8 }
 0x26c   : > { %v3108_v1 = vpop.f32.mrf.mxu1 }
 0x26e   : > { %3145 = vmatmul.bf16.gmra.mxu1 %v7030_v26  ;;  %v3192_v35 = vpop.f32.mrf.mxu2 }
 0x26f   : > { %3308 = vmatmul.bf16.gmra.mxu3 %v7002_v28 }
 0x271   : > { %v3017_v52 = vpop.f32.mrf.mxu0 }
 0x272   : > { %v3018_v56 = vadd.f32 %v3017_v52, %v11105_v4  ;;  %v9725_v14 = vpop.f32.mrf.mxu3 }
 0x274   : > { %v9728_v21 = vadd.f32 %v9671_v34, %v3018_v56  ;;  %3056 = vmatmul.bf16.gmra.mxu0 %v6990_v23  ;;  %v3111_v53 = vpop.f32.mrf.mxu1 }
 0x276   : > { %v3195_v28 = vpop.f32.mrf.mxu2 }
 0x279   : > { %v3019_v15 = vpop.f32.mrf.mxu0 }
 0x27a   : > { %v9731_v54 = vadd.f32 %v3019_v15, %v9410_v5  ;;  %v9733_v7 = vpop.f32.mrf.mxu3  ;;  %v8384_v15 = vld [vmem:[%s11044_s4 + $0x60] sm:$0xff] }
 0x27b   : > { %5839 = vmatpush.bf16.msra.mxu2 %v8384_v15 }
 0x27c   : > { %v3113_v26 = vpop.f32.mrf.mxu1 }
 0x27e   : > { %v3197_v13 = vpop.f32.mrf.mxu2 }
 0x27f   : > { %3313 = vmatmul.bf16.gmra.mxu3 %v7038_v6 }
 0x281   : > { %v3022_v32 = vpop.f32.mrf.mxu0 }
 0x282   : > { %v3023_v34 = vadd.f32 %v3022_v32, %v9416_v16  ;;  %v9736_v23 = vpop.f32.mrf.mxu3  ;;  %v8065_v16 = vld [vmem:[#allocation3 + $0x40] sm:$0xf0] }
 0x283   : > { %11106 = vst [vmem:[#allocation11_spill] sm:$0xff] %v9736_v23  ;;  %v6538_v32 = vor.u32 %v8065_v16, %v6537_v49 }
 0x284   : > { %v9738_v52 = vadd.f32 %v3106_v12, %v3023_v34  ;;  %3061 = vmatmul.bf16.gmra.mxu0 %v7026_v27  ;;  %v3116_v4 = vpop.f32.mrf.mxu1  ;;  %v8376_v12 = vld [vmem:[%s11044_s4 + $0x20] sm:$0xff] }
 0x285   : > { %5778 = vmatpush.bf16.msra.mxu1 %v8376_v12 }
 0x286   : > { %11107 = vst [vmem:[#allocation21_spill] sm:$0xff] %v9738_v52  ;;  %v3200_v8 = vpop.f32.mrf.mxu2 }
 0x289   : > { %v3024_v5 = vpop.f32.mrf.mxu0 }
 0x28a   : > { %v3025_v56 = vadd.f32 %v3024_v5, %v9425_v3  ;;  %v3276_v61 = vpop.f32.mrf.mxu3 }
 0x28c   : > { %v3109_v6 = vadd.f32 %v3108_v1, %v3025_v56  ;;  %v3118_v31 = vpop.f32.mrf.mxu1 }
 0x28e   : > { %v3193_v37 = vadd.f32 %v3192_v35, %v3109_v6  ;;  %v3202_v1 = vpop.f32.mrf.mxu2 }
 0x290   : > { %v9747_v27 = vadd.f32 %v3276_v61, %v3193_v37  ;;  %v6573_v61 = vld [vmem:[#allocation3 + $0x68] sm:$0xf]  ;;  %v8074_v37 = vld [vmem:[#allocation3 + $0x88] sm:$0xf0] }
 0x291   : > { %v3027_v3 = vpop.f32.mrf.mxu0 }
 0x292   : > { %11108 = vst [vmem:[#allocation22_spill] sm:$0xff] %v9747_v27  ;;  %v3028_v34 = vadd.f32 %v3027_v3, %v9434_v17  ;;  %v3279_v5 = vpop.f32.mrf.mxu3  ;;  %v6574_v17 = vor.u32 %v8074_v37, %v6573_v61 }
 0x294   : > { %v3112_v23 = vadd.f32 %v3111_v53, %v3028_v34  ;;  %3327 = vmatmul.bf16.vlgmr.msrb.gmra.mxu0 %v6538_v32  ;;  %v3121_v49 = vpop.f32.mrf.mxu1 }
 0x296   : > { %v3196_v56 = vadd.f32 %v3195_v28, %v3112_v23  ;;  %v3205_v12 = vpop.f32.mrf.mxu2 }
 0x298   : > { %v9750_v15 = vadd.f32 %v3279_v5, %v3196_v56 }
 0x299   : > { %v3029_v35 = vpop.f32.mrf.mxu0 }
 0x29a   : > { %v3030_v6 = vadd.f32 %v3029_v35, %v9443_v11  ;;  %v3281_v29 = vpop.f32.mrf.mxu3  ;;  %v8383_v11 = vld [vmem:[%s11044_s4 + $0x58] sm:$0xff] }
 0x29b   : > { %5840 = vmatpush.bf16.msra.mxu2 %v8383_v11 }
 0x29c   : > { %v3114_v52 = vadd.f32 %v3113_v26, %v3030_v6  ;;  %v3123_v34 = vpop.f32.mrf.mxu1 }
 0x29e   : > { %v3198_v16 = vadd.f32 %v3197_v13, %v3114_v52  ;;  %v3207_v13 = vpop.f32.mrf.mxu2 }
 0x2a0   : > { %v9753_v27 = vadd.f32 %v3281_v29, %v3198_v16 }
 0x2a1   : > { %v3032_v3 = vpop.f32.mrf.mxu0 }
 0x2a2   : > { %v3033_v53 = vadd.f32 %v3032_v3, %v9449_v22  ;;  %v3284_v32 = vpop.f32.mrf.mxu3  ;;  %v8375_v22 = vld [vmem:[%s11044_s4 + $0x18] sm:$0xff] }
 0x2a3   : > { %5779 = vmatpush.bf16.msra.mxu1 %v8375_v22 }
 0x2a4   : > { %v3117_v28 = vadd.f32 %v3116_v4, %v3033_v53  ;;  %3332 = vmatmul.bf16.gmra.mxu0 %v6574_v17  ;;  %v6609_v4 = vld [vmem:[#allocation3 + $0xb0] sm:$0xf]  ;;  %v3126_v16 = vpop.f32.mrf.mxu1 }
 0x2a6   : > { %v3201_v23 = vadd.f32 %v3200_v8, %v3117_v28  ;;  %v8083_v8 = vld [vmem:[#allocation3 + $0xd0] sm:$0xf0] }
 0x2a7   : > { %v6610_v61 = vor.u32 %v8083_v8, %v6609_v4 }
 0x2a8   : > { %v9756_v5 = vadd.f32 %v3284_v32, %v3201_v23 }
 0x2a9   : > { %v3034_v26 = vpop.f32.mrf.mxu0 }
 0x2aa   : > { %v3035_v29 = vadd.f32 %v3034_v26, %v9458_v58  ;;  %v3286_v52 = vpop.f32.mrf.mxu3  ;;  %v3210_v58 = vpop.f32.mrf.mxu2 }
 0x2ac   : > { %v3119_v56 = vadd.f32 %v3118_v31, %v3035_v29  ;;  %v6645_v29 = vld [vmem:[#allocation3 + $0xf8] sm:$0xf] }
 0x2ae   : > { %v3203_v35 = vadd.f32 %v3202_v1, %v3119_v56  ;;  %v3128_v1 = vpop.f32.mrf.mxu1 }
 0x2b0   : > { %v9765_v6 = vadd.f32 %v3286_v52, %v3203_v35  ;;  %v8092_v52 = vld [vmem:[#allocation3 + $0x118] sm:$0xf0] }
 0x2b1   : > { %v3037_v37 = vpop.f32.mrf.mxu0 }
 0x2b2   : > { %v3038_v17 = vadd.f32 %v3037_v37, %v9467_v0  ;;  %v3289_v3 = vpop.f32.mrf.mxu3  ;;  %v3212_v56 = vpop.f32.mrf.mxu2  ;;  %v6646_v0 = vor.u32 %v8092_v52, %v6645_v29 }
 0x2b4   : > { %v3122_v53 = vadd.f32 %v3121_v49, %v3038_v17  ;;  %3337 = vmatmul.bf16.gmra.mxu0 %v6610_v61 }
 0x2b6   : > { %v3206_v31 = vadd.f32 %v3205_v12, %v3122_v53  ;;  %v3131_v61 = vpop.f32.mrf.mxu1 }
 0x2b8   : > { %v9768_v32 = vadd.f32 %v3289_v3, %v3206_v31  ;;  %v8101_v31 = vld [vmem:[#allocation3 + $0x160] sm:$0xf0] }
 0x2b9   : > { %v3039_v28 = vpop.f32.mrf.mxu0 }
 0x2ba   : > { %v3040_v23 = vadd.f32 %v3039_v28, %v9475_v47  ;;  %v3291_v11 = vpop.f32.mrf.mxu3  ;;  %v8382_v47 = vld [vmem:[%s11044_s4 + $0x50] sm:$0xff] }
 0x2bb   : > { %5841 = vmatpush.bf16.msra.mxu2 %v8382_v47  ;;  %v8395_v47 = vld [vmem:[%s11044_s4 + $0xb8] sm:$0xff] }
 0x2bc   : > { %v3124_v26 = vadd.f32 %v3123_v34, %v3040_v23  ;;  %v3215_v34 = vpop.f32.mrf.mxu2  ;;  %5897 = vmatpush.bf16.msrb.mxu3 %v8395_v47 }
 0x2be   : > { %v3208_v22 = vadd.f32 %v3207_v13, %v3124_v26  ;;  %v3133_v23 = vpop.f32.mrf.mxu1 }
 0x2c0   : > { %v9771_v4 = vadd.f32 %v3291_v11, %v3208_v22 }
 0x2c1   : > { %v3042_v8 = vpop.f32.mrf.mxu0 }
 0x2c2   : > { %v3043_v49 = vadd.f32 %v3042_v8, %v9481_v46  ;;  %v3294_v35 = vpop.f32.mrf.mxu3  ;;  %v8374_v46 = vld [vmem:[%s11044_s4 + $0x10] sm:$0xff] }
 0x2c3   : > { %5780 = vmatpush.bf16.msra.mxu1 %v8374_v46 }
 0x2c4   : > { %v3127_v12 = vadd.f32 %v3126_v16, %v3043_v49  ;;  %3342 = vmatmul.bf16.gmra.mxu0 %v6646_v0  ;;  %v3217_v29 = vpop.f32.mrf.mxu2 }
 0x2c6   : > { %v3211_v37 = vadd.f32 %v3210_v58, %v3127_v12  ;;  %v6681_v58 = vld [vmem:[#allocation3 + $0x140] sm:$0xf] }
 0x2c7   : > { %v6682_v11 = vor.u32 %v8101_v31, %v6681_v58  ;;  %v8381_v31 = vld [vmem:[%s11044_s4 + $0x48] sm:$0xff] }
 0x2c8   : > { %v9777_v17 = vadd.f32 %v3294_v35, %v3211_v37  ;;  %v3136_v35 = vpop.f32.mrf.mxu1  ;;  %5842 = vmatpush.bf16.msra.mxu2 %v8381_v31 }
 0x2c9   : > { %v3044_v13 = vpop.f32.mrf.mxu0 }
 0x2ca   : > { %v3045_v3 = vadd.f32 %v3044_v13, %v9491_v44  ;;  %v9783_v53 = vpop.f32.mrf.mxu3  ;;  %v6717_v13 = vld [vmem:[#allocation3 + $0x188] sm:$0xf] }
 0x2cc   : > { %v3129_v16 = vadd.f32 %v3128_v1, %v3045_v3 }
 0x2ce   : > { %v9785_v28 = vadd.f32 %v3212_v56, %v3129_v16  ;;  %v3220_v56 = vpop.f32.mrf.mxu2 }
 0x2d0   : > { %v3138_v58 = vpop.f32.mrf.mxu1 }
 0x2d1   : > { %v3047_v26 = vpop.f32.mrf.mxu0 }
 0x2d2   : > { %v3048_v52 = vadd.f32 %v3047_v26, %v9497_v45  ;;  %v3299_v22 = vpop.f32.mrf.mxu3  ;;  %v8110_v45 = vld [vmem:[#allocation3 + $0x1a8] sm:$0xf0] }
 0x2d4   : > { %v3132_v44 = vadd.f32 %v3131_v61, %v3048_v52  ;;  %3347 = vmatmul.bf16.gmra.mxu0 %v6682_v11  ;;  %v6718_v61 = vor.u32 %v8110_v45, %v6717_v13 }
 0x2d6   : > { %v3216_v0 = vadd.f32 %v3215_v34, %v3132_v44 }
 0x2d8   : > { %v9788_v8 = vadd.f32 %v3299_v22, %v3216_v0 }
 0x2d9   : > { %v3049_v49 = vpop.f32.mrf.mxu0 }
 0x2da   : > { %v3050_v1 = vadd.f32 %v3049_v49, %v9504_v2  ;;  %v9791_v12 = vpop.f32.mrf.mxu3  ;;  %v6753_v49 = vld [vmem:[#allocation3 + $0x1d0] sm:$0xf] }
 0x2db   : > { %v3141_v0 = vpop.f32.mrf.mxu1 }
 0x2dc   : > { %v3134_v37 = vadd.f32 %v3133_v23, %v3050_v1  ;;  %v3222_v23 = vpop.f32.mrf.mxu2 }
 0x2de   : > { %v9796_v3 = vadd.f32 %v3217_v29, %v3134_v37  ;;  %v8373_v29 = vld [vmem:[%s11044_s4 + $0x8] sm:$0xff] }
 0x2df   : > { %5781 = vmatpush.bf16.msra.mxu1 %v8373_v29  ;;  %v8128_v29 = vld [vmem:[#allocation3 + $0x238] sm:$0xf0] }
 0x2e1   : > { %v3052_v34 = vpop.f32.mrf.mxu0 }
 0x2e2   : > { %v3053_v46 = vadd.f32 %v3052_v34, %v9510_v59  ;;  %v3304_v16 = vpop.f32.mrf.mxu3 }
 0x2e4   : > { %v3137_v2 = vadd.f32 %v3136_v35, %v3053_v46  ;;  %3352 = vmatmul.bf16.gmra.mxu0 %v6718_v61  ;;  %v8119_v35 = vld [vmem:[#allocation3 + $0x1f0] sm:$0xf0]  ;;  %v3143_v46 = vpop.f32.mrf.mxu1 }
 0x2e5   : > { %v6754_v37 = vor.u32 %v8119_v35, %v6753_v49  ;;  %v11111_v49 = vld [vmem:[#allocation25_spill] sm:$0xff] }
 0x2e6   : > { %v3221_v11 = vadd.f32 %v3220_v56, %v3137_v2  ;;  %v3225_v56 = vpop.f32.mrf.mxu2 }
 0x2e8   : > { %v9802_v26 = vadd.f32 %v3304_v16, %v3221_v11 }
 0x2e9   : > { %v3054_v52 = vpop.f32.mrf.mxu0 }
 0x2ea   : > { %v3055_v59 = vadd.f32 %v3054_v52, %v9520_v39  ;;  %v9808_v22 = vpop.f32.mrf.mxu3 }
 0x2ec   : > { %v3139_v44 = vadd.f32 %v3138_v58, %v3055_v59 }
 0x2ee   : > { %v9810_v1 = vadd.f32 %v3222_v23, %v3139_v44  ;;  %v3227_v2 = vpop.f32.mrf.mxu2  ;;  %v6789_v23 = vld [vmem:[#allocation3 + $0x218] sm:$0xf] }
 0x2f1   : > { %v3057_v47 = vpop.f32.mrf.mxu0 }
 0x2f2   : > { %v3058_v13 = vadd.f32 %v3057_v47, %v9526_v48  ;;  %v3309_v45 = vpop.f32.mrf.mxu3  ;;  %v6790_v48 = vor.u32 %v8128_v29, %v6789_v23  ;;  %v9836_v23 = vld [vmem:[%s11042_s2] ss:$0 sm:$0xff] }
 0x2f4   : > { %v3142_v61 = vadd.f32 %v3141_v0, %v3058_v13  ;;  %3357 = vmatmul.bf16.gmra.mxu0 %v6754_v37  ;;  %v3146_v0 = vpop.f32.mrf.mxu1 }
 0x2f6   : > { %v3226_v34 = vadd.f32 %v3225_v56, %v3142_v61  ;;  %v3230_v56 = vpop.f32.mrf.mxu2  ;;  %v11113_v61 = vld [vmem:[#allocation26_spill] sm:$0xff] }
 0x2f8   : > { %v9813_v39 = vadd.f32 %v3309_v45, %v3226_v34 }
 0x2f9   : > { %v3059_v16 = vpop.f32.mrf.mxu0 }
 0x2fa   : > { %11109 = vst [vmem:[#allocation16_spill] sm:$0xff] %v9813_v39  ;;  %v3060_v58 = vadd.f32 %v3059_v16, %v9533_v24  ;;  %v3311_v31 = vpop.f32.mrf.mxu3  ;;  %v3501_v16 = vlaneseq }
 0x2fc   : > { %v3144_v11 = vadd.f32 %v3143_v46, %v3060_v58  ;;  %v8394_v46 = vld [vmem:[%s11044_s4 + $0xb0] sm:$0xff]  ;;  %v8137_v58 = vld [vmem:[#allocation3 + $0x280] sm:$0xf0]  ;;  %v9838_v29 = vshrl.u32 %v3501_v16, 7 }
 0x2fd   : > { %5898 = vmatpush.bf16.msrb.mxu3 %v8394_v46 }
 0x2fe   : > { %v3228_v52 = vadd.f32 %v3227_v2, %v3144_v11  ;;  %v6825_v2 = vld [vmem:[#allocation3 + $0x260] sm:$0xf]  ;;  %v8393_v11 = vld [vmem:[%s11044_s4 + $0xa8] sm:$0xff]  ;;  %vm3547_vm9 = vcmp.ge.s32.totalorder %v9838_v29, 1 }
 0x300   : > { %v9816_v59 = vadd.f32 %v3311_v31, %v3228_v52  ;;  %v9828_v31 = vstv %s7332_s19  ;;  %v6826_v52 = vor.u32 %v8137_v58, %v6825_v2  ;;  %v8390_v2 = vld [vmem:[%s11044_s4 + $0x90] sm:$0xff] }
 0x301   : > { %v3062_v44 = vpop.f32.mrf.mxu0  ;;  %5899 = vmatpush.bf16.msrb.mxu3 %v8393_v11  ;;  %vm3517_vm6 = vcmp.ge.s32.totalorder %v9828_v31, 0  ;;  %vm3527_vm7 = vcmp.lt.s32.totalorder %v9828_v31, 16 }
 0x302   : > { %11110 = vst [vmem:[#allocation17_spill] sm:$0xff] %v9816_v59  ;;  %v3063_v35 = vadd.f32 %v3062_v44, %v11111_v49  ;;  %v3314_v47 = vpop.f32.mrf.mxu3  ;;  %v8392_v49 = vld [vmem:[%s11044_s4 + $0xa0] sm:$0xff]  ;;  %vm9852_vm8 = vmand %vm3517_vm6, %vm3527_vm7 }
 0x303   : > { %vm3550_vm10 = vmand %vm9852_vm8, %vm3547_vm9 }
 0x304   : > { %v3147_v37 = vadd.f32 %v3146_v0, %v3063_v35  ;;  %3362 = vmatmul.bf16.gmra.mxu0 %v6790_v48  ;;  %v9846_v0 = vld [vmem:[%s11043_s3] ss:$0 sm:$0xff] }
 0x305   : > { %5900 = vmatpush.bf16.msrb.mxu3 %v8392_v49 }
 0x306   : > { %v3231_v13 = vadd.f32 %v3230_v56, %v3147_v37  ;;  %v8391_v37 = vld [vmem:[%s11044_s4 + $0x98] sm:$0xff] }
 0x308   : > { %v9819_v45 = vadd.f32 %v3314_v47, %v3231_v13  ;;  %v8372_v47 = vld [vmem:[%s11044_s4] sm:$0xff] }
 0x309   : > { %v3064_v24 = vpop.f32.mrf.mxu0  ;;  %5901 = vmatpush.bf16.msrb.mxu3 %v8391_v37  ;;  %5782 = vmatpush.bf16.msra.mxu1 %v8372_v47  ;;  %v9881_v37 = vadd.s32 16, %v9838_v29 }
 0x30a   : > { %11112 = vst [vmem:[#allocation23_spill] sm:$0xff] %v9819_v45  ;;  %v9822_v34 = vadd.f32 %v3064_v24, %v11113_v61  ;;  %v8380_v24 = vld [vmem:[%s11044_s4 + $0x40] sm:$0xff] }
 0x30b   : > { %5843 = vmatpush.bf16.msra.mxu2 %v8380_v24  ;;  %vm3582_vm11 = vcmp.le.s32.totalorder %v9881_v37, 16  ;;  %v8568_v37 = vmov 0  }
 0x30c   : > { %11114 = vst [vmem:[#allocation24_spill] sm:$0xff] %v9822_v34  ;;  %vm3585_vm12 = vmand %vm9852_vm8, %vm3582_vm11 }
 0x30d   : > { %5902 = vmatpush.bf16.msrb.mxu3 %v8390_v2  ;;  %v8388_v2 = vld [vmem:[%s11044_s4 + $0x80] sm:$0xff] }
 0x311   : > { %v3328_v48 = vpop.f32.mrf.mxu0 }
 0x312   : > { %v3329_v44 = vadd.f32 %v3328_v48, %v9559_v62  ;;  %v6861_v48 = vld [vmem:[#allocation3 + $0x2a8] sm:$0xf] }
 0x314   : > { %v3407_v35 = vmul.f32 %v9836_v23, %v3329_v44  ;;  %3367 = vmatmul.bf16.gmra.mxu0 %v6826_v52  ;;  %v8146_v44 = vld [vmem:[#allocation3 + $0x2c8] sm:$0xf0] }
 0x315   : > { %v6862_v47 = vor.u32 %v8146_v44, %v6861_v48  ;;  %v3508_v48 = vadd.s32 1, %v9828_v31 }
 0x316   : > { %v3441_v62 = vadd.f32 %v9846_v0, %v3407_v35  ;;  %v8389_v35 = vld [vmem:[%s11044_s4 + $0x88] sm:$0xff] }
 0x317   : > { %5903 = vmatpush.bf16.msrb.mxu3 %v8389_v35  ;;  %vm3518_vm13 = vcmp.ge.s32.totalorder %v3508_v48, 0  ;;  %vm3528_vm14 = vcmp.lt.s32.totalorder %v3508_v48, 16 }
 0x318   : > { %v3471_v13 = vmax.f32 %v3441_v62, 0.0  ;;  %vm9903_vm15 = vmand %vm3518_vm13, %vm3528_vm14 }
 0x319   : > { %v3330_v61 = vpop.f32.mrf.mxu0  ;;  %vm3553_vm0 = vmand %vm9903_vm15, %vm3547_vm9 }
 0x31a   : > { %v3673_v46 = vsel %vm3550_vm10, %v3471_v13, 0.0  ;;  %v3331_v16 = vadd.f32 %v3330_v61, %v9566_v55  ;;  %vm9944_vm1 = vmand %vm9903_vm15, %vm3582_vm11 }
 0x31b   : > { %v3703_v58 = vpack.c.bf16 %v3673_v46, %v3673_v46  ;;  %5904 = vmatpush.bf16.msrb.mxu3 %v8388_v2 }
 0x31c   : > { %v3408_v11 = vmul.f32 %v9836_v23, %v3331_v16 }
 0x31d   : > { %v3763_v52 = vunpack.c.l.b16 %v3703_v58 }
 0x31e   : > { %v3442_v49 = vadd.f32 %v9846_v0, %v3408_v11 }
 0x31f   : > { %v3793_v62 = vpack.c.b16 %v3763_v52, %v3763_v52 }
 0x320   : > { %v3472_v55 = vmax.f32 %v3442_v49, 0.0 }
 0x321   : > { %3841 = vst [vmem:[#allocation4] sm:$0xf] %v3793_v62  ;;  %v3867_v13 = vshrl.u32 %v3793_v62, 16  ;;  %v3870_v24 = vshll.u32 %v3793_v62, 16  ;;  %v3333_v61 = vpop.f32.mrf.mxu0 }
 0x322   : > { %v3674_v46 = vsel %vm9852_vm8, %v3472_v55, 0.0  ;;  %v3334_v16 = vadd.f32 %v3333_v61, %v9583_v20 }
 0x323   : > { %v3869_v58 = vrot.slane %v3867_v13, 4  ;;  %v3872_v11 = vrot.slane %v3870_v24, 5  ;;  %v3704_v52 = vpack.c.bf16 %v3674_v46, %v3674_v46  ;;  %v7333_v24 = vrot.slane %v3793_v62, 9 }
 0x324   : > { %v3409_v49 = vmul.f32 %v9836_v23, %v3334_v16  ;;  %3372 = vmatmul.bf16.gmra.mxu0 %v6862_v47 }
 0x325   : > { %v3764_v44 = vunpack.c.l.b16 %v3704_v52  ;;  %v3873_v55 = vor.u32 %v3872_v11, %v3869_v58 }
 0x326   : > { %v3443_v35 = vadd.f32 %v9846_v0, %v3409_v49 }
 0x327   : > { %v3794_v20 = vpack.c.b16 %v3764_v44, %v3764_v44  ;;  %v3874_v49 = vrot.slane %v3873_v55, 4  ;;  %v8155_v55 = vld [vmem:[#allocation3 + $0x310] sm:$0xf0] }
 0x328   : > { %v3473_v13 = vmax.f32 %v3443_v35, 0.0 }
 0x329   : > { %3842 = vst [vmem:[#allocation4 + $0x24] sm:$0xf] %v3794_v20  ;;  %v3876_v61 = vshll.u32 %v3794_v20, 16  ;;  %v3880_v47 = vshrl.u32 %v3794_v20, 16  ;;  %v4160_v46 = vrot.slane %v3794_v20, 5  ;;  %v3335_v16 = vpop.f32.mrf.mxu0 }
 0x32a   : > { %v3675_v2 = vsel %vm3585_vm12, %v3473_v13, 0.0  ;;  %v3336_v52 = vadd.f32 %v3335_v16, %v9602_v19  ;;  %v6897_v19 = vld [vmem:[#allocation3 + $0x2f0] sm:$0xf]  ;;  %v7336_v16 = vld [vmem:[#allocation4] sm:$0xf] }
 0x32b   : > { %v3878_v58 = vrot.slane %v3876_v61, 5  ;;  %v4161_v11 = vsel %vm9009_vm5, %v7333_v24, %v4160_v46  ;;  %v3882_v44 = vrot.slane %v3880_v47, 4  ;;  %v3705_v56 = vpack.c.bf16 %v3675_v2, %v3675_v2 }
 0x32c   : > { %4255 = vst [vmem:[#allocation4 + $0x8] sm:$0xf] %v4161_v11  ;;  %v3410_v35 = vmul.f32 %v9836_v23, %v3336_v52  ;;  %v6898_v52 = vor.u32 %v8155_v55, %v6897_v19  ;;  %v4162_v11 = vrot.slane %v4160_v46, 4 }
 0x32d   : > { %v3879_v20 = vsel %vm8727_vm2, %v3874_v49, %v3878_v58  ;;  %v3765_v13 = vunpack.c.l.b16 %v3705_v56  ;;  %v3883_v61 = vor.u32 %v3882_v44, %v3878_v58  ;;  %v8411_v49 = vld [vmem:[%s11044_s4 + $0x138] sm:$0xff] }
 0x32e   : > { %4134 = vst [vmem:[#allocation4 + $0x4] sm:$0xf] %v3879_v20  ;;  %v3444_v24 = vadd.f32 %v9846_v0, %v3410_v35  ;;  %6019 = vmatpush.bf16.msrb.mxu2 %v8411_v49 }
 0x32f   : > { %v3795_v48 = vpack.c.b16 %v3765_v13, %v3765_v13  ;;  %v3884_v44 = vrot.slane %v3883_v61, 4 }
 0x330   : > { %v3474_v47 = vmax.f32 %v3444_v24, 0.0  ;;  %v8268_v2 = vld [vmem:[#allocation4 + $0x20] sm:$0xf0] }
 0x331   : > { %v3338_v20 = vpop.f32.mrf.mxu0  ;;  %v7337_v56 = vor.u32 %v8268_v2, %v7336_v16  ;;  %3843 = vst [vmem:[#allocation4 + $0x48] sm:$0xf] %v3795_v48  ;;  %v3886_v35 = vshll.u32 %v3795_v48, 16  ;;  %v3890_v45 = vshrl.u32 %v3795_v48, 16  ;;  %v4163_v34 = vrot.slane %v3795_v48, 5 }
 0x332   : > { %v3676_v59 = vsel %vm3553_vm0, %v3474_v47, 0.0  ;;  %v3339_v58 = vadd.f32 %v3338_v20, %v9617_v57  ;;  %v3176_v20 = vadd.f32 %v9594_v42, %v9663_v33  ;;  %v3509_v42 = vadd.s32 2, %v9828_v31  ;;  %v6933_v33 = vld [vmem:[#allocation3 + $0x338] sm:$0xf] }
 0x333   : > { %v3706_v39 = vpack.c.bf16 %v3676_v59, %v3676_v59  ;;  %5783 = vmatmul.bf16.vlgmr.msra.gmra.mxu1 %v7337_v56  ;;  %v3888_v13 = vrot.slane %v3886_v35, 5  ;;  %v3892_v19 = vrot.slane %v3890_v45, 4  ;;  %v4164_v55 = vsel %vm9009_vm5, %v4162_v11, %v4163_v34  ;;  %v8403_v45 = vld [vmem:[%s11044_s4 + $0xf8] sm:$0xff] }
 0x334   : > { %3377 = vmatmul.bf16.gmra.mxu0 %v6898_v52  ;;  %4256 = vst [vmem:[#allocation4 + $0x2c] sm:$0xf] %v4164_v55  ;;  %v3411_v24 = vmul.f32 %v9836_v23, %v3339_v58  ;;  %v4165_v61 = vrot.slane %v4163_v34, 4  ;;  %5958 = vmatpush.bf16.msrb.mxu1 %v8403_v45  ;;  %v3260_v45 = vadd.f32 %v9654_v36, %v3176_v20  ;;  %vm3519_vm3 = vcmp.ge.s32.totalorder %v3509_v42, 0 }
 0x335   : > { %v3766_v46 = vunpack.c.l.b16 %v3706_v39  ;;  %v3889_v48 = vsel %vm8727_vm2, %v3884_v44, %v3888_v13  ;;  %v3893_v47 = vor.u32 %v3892_v19, %v3888_v13  ;;  %v7344_v44 = vld [vmem:[#allocation4 + $0x8] sm:$0xf]  ;;  %vm3529_vm4 = vcmp.lt.s32.totalorder %v3509_v42, 16 }
 0x336   : > { %4135 = vst [vmem:[#allocation4 + $0x28] sm:$0xf] %v3889_v48  ;;  %v3445_v57 = vadd.f32 %v9846_v0, %v3411_v24  ;;  %v8164_v48 = vld [vmem:[#allocation3 + $0x358] sm:$0xf0]  ;;  %vm9956_vm6 = vmand %vm3519_vm3, %vm3529_vm4 }
 0x337   : > { %v3796_v59 = vpack.c.b16 %v3766_v46, %v3766_v46  ;;  %v3894_v56 = vrot.slane %v3893_v47, 4  ;;  %vm3556_vm7 = vmand %vm9956_vm6, %vm3547_vm9 }
 0x338   : > { %v3475_v39 = vmax.f32 %v3445_v57, 0.0  ;;  %vm3591_vm8 = vmand %vm9956_vm6, %vm3582_vm11 }
 0x339   : > { %3844 = vst [vmem:[#allocation4 + $0x6c] sm:$0xf] %v3796_v59  ;;  %v3896_v16 = vshll.u32 %v3796_v59, 16  ;;  %v3900_v2 = vshrl.u32 %v3796_v59, 16  ;;  %v4166_v52 = vrot.slane %v3796_v59, 5  ;;  %v3340_v49 = vpop.f32.mrf.mxu0 }
 0x33a   : > { %4284 = vst [vmem:[#allocation4 + $0xc] sm:$0xf] %v3796_v59  ;;  %v3341_v11 = vadd.f32 %v3340_v49, %v9641_v51  ;;  %v3677_v13 = vsel %vm9903_vm15, %v3475_v39, 0.0  ;;  %v8264_v59 = vld [vmem:[#allocation4 + $0x4] sm:$0xf]  ;;  %v3094_v39 = vadd.f32 %v9604_v50, %v9675_v60 }
 0x33b   : > { %v3898_v35 = vrot.slane %v3896_v16, 5  ;;  %v4167_v58 = vsel %vm9009_vm5, %v4165_v61, %v4166_v52  ;;  %v3902_v34 = vrot.slane %v3900_v2, 4  ;;  %v8269_v55 = vld [vmem:[#allocation4 + $0x28] sm:$0xf0]  ;;  %v3707_v46 = vpack.c.bf16 %v3677_v13, %v3677_v13 }
 0x33c   : > { %4257 = vst [vmem:[#allocation4 + $0x50] sm:$0xf] %v4167_v58  ;;  %v3412_v19 = vmul.f32 %v9836_v23, %v3341_v11  ;;  %v7345_v24 = vor.u32 %v8269_v55, %v7344_v44  ;;  %v6934_v44 = vor.u32 %v8164_v48, %v6933_v33  ;;  %v4168_v13 = vrot.slane %v4166_v52, 4 }
 0x33d   : > { %v3899_v51 = vsel %vm8727_vm2, %v3894_v56, %v3898_v35  ;;  %v7338_v57 = vld [vmem:[#allocation4 + $0x24] sm:$0xf0]  ;;  %v3767_v61 = vunpack.c.l.b16 %v3707_v46  ;;  %v3903_v49 = vor.u32 %v3902_v34, %v3898_v35  ;;  %v3178_v35 = vadd.f32 %v9612_v10, %v3094_v39  ;;  %v11124_v10 = vld [vmem:[#allocation12_spill] sm:$0xff] }
 0x33e   : > { %4136 = vst [vmem:[#allocation4 + $0x4c] sm:$0xf] %v3899_v51  ;;  %v3446_v47 = vadd.f32 %v9846_v0, %v3412_v19  ;;  %5905 = vmatmul.bf16.vlgmr.msrb.gmra.mxu3 %v7345_v24  ;;  %v7341_v2 = vor.u32 %v8264_v59, %v7338_v57  ;;  %v7372_v56 = vld [vmem:[#allocation4 + $0x48] sm:$0xf]  ;;  %v11123_v33 = vrot.slane %v9622_v41, 5 }
 0x33f   : > { %v3797_v36 = vpack.c.b16 %v3767_v61, %v3767_v61  ;;  %v3904_v34 = vrot.slane %v3903_v49, 4  ;;  %v11125_v49 = vld [vmem:[#allocation20_spill] sm:$0xff] }
 0x340   : > { %v3476_v11 = vmax.f32 %v3446_v47, 0.0  ;;  %v8277_v58 = vld [vmem:[#allocation4 + $0x68] sm:$0xf0]  ;;  %5844 = vmatmul.bf16.vlgmr.msra.gmra.mxu2 %v7341_v2  ;;  %v1189_v48 = vrot.slane %v11123_v33, 4 }
 0x341   : > { %v3343_v20 = vpop.f32.mrf.mxu0  ;;  %v7373_v62 = vor.u32 %v8277_v58, %v7372_v56  ;;  %3845 = vst [vmem:[#allocation4 + $0x90] sm:$0xf] %v3797_v36  ;;  %v3906_v51 = vshll.u32 %v3797_v36, 16  ;;  %v3910_v46 = vshrl.u32 %v3797_v36, 16  ;;  %v4169_v50 = vrot.slane %v3797_v36, 5 }
 0x342   : > { %v3678_v19 = vsel %vm9944_vm1, %v3476_v11, 0.0  ;;  %v3344_v55 = vadd.f32 %v3343_v20, %v3260_v45  ;;  %4285 = vst [vmem:[#allocation4 + $0x30] sm:$0xf] %v3797_v36  ;;  %v1190_v45 = vrot.slane %v11124_v10, 5  ;;  %v3262_v11 = vadd.f32 %v11125_v49, %v3178_v35 }
 0x343   : > { %v3708_v60 = vpack.c.bf16 %v3678_v19, %v3678_v19  ;;  %5788 = vmatmul.bf16.gmra.mxu1 %v7373_v62  ;;  %v3908_v47 = vrot.slane %v3906_v51, 5  ;;  %v3912_v59 = vrot.slane %v3910_v46, 4  ;;  %v4170_v57 = vsel %vm9009_vm5, %v4168_v13, %v4169_v50  ;;  %v11126_v19 = vld [vmem:[#allocation18_spill] sm:$0xff] }
 0x344   : > { %v3413_v24 = vmul.f32 %v9836_v23, %v3344_v55  ;;  %3382 = vmatmul.bf16.gmra.mxu0 %v6934_v44  ;;  %4258 = vst [vmem:[#allocation4 + $0x74] sm:$0xf] %v4170_v57  ;;  %v4171_v56 = vrot.slane %v4169_v50, 4  ;;  %v1191_v44 = vsel %vm9009_vm5, %v1189_v48, %v1190_v45  ;;  %v3181_v55 = vadd.f32 %v11126_v19, %v9703_v40  ;;  %v8173_v50 = vld [vmem:[#allocation3 + $0x3a0] sm:$0xf0]  ;;  %v8410_v48 = vld [vmem:[%s11044_s4 + $0x130] sm:$0xff] }
 0x345   : > { %v3768_v61 = vunpack.c.l.b16 %v3708_v60  ;;  %v3909_v42 = vsel %vm8727_vm2, %v3904_v34, %v3908_v47  ;;  %4378 = vst [vmem:[#allocation4 + $0x14] sm:$0xf] %v4170_v57  ;;  %v3913_v41 = vor.u32 %v3912_v59, %v3908_v47  ;;  %v6969_v60 = vld [vmem:[#allocation3 + $0x380] sm:$0xf]  ;;  %v7380_v59 = vld [vmem:[#allocation4 + $0x50] sm:$0xf]  ;;  %6020 = vmatpush.bf16.msrb.mxu2 %v8410_v48 }
 0x346   : > { %v3447_v16 = vadd.f32 %v9846_v0, %v3413_v24  ;;  %4137 = vst [vmem:[#allocation4 + $0x70] sm:$0xf] %v3909_v42 }
 0x347   : > { %v3798_v2 = vpack.c.b16 %v3768_v61, %v3768_v61  ;;  %4342 = vst [vmem:[#allocation4 + $0x10] sm:$0xf] %v3909_v42  ;;  %v3914_v35 = vrot.slane %v3913_v41, 4  ;;  %v11127_v61 = vld [vmem:[#allocation13_spill] sm:$0xff] }
 0x348   : > { %v3477_v39 = vmax.f32 %v3447_v16, 0.0  ;;  %1228 = vst [vmem:[#allocation3 + $0x3ec] sm:$0xf] %v1191_v44  ;;  %v3099_v16 = vadd.f32 %v11127_v61, %v9712_v63 }
 0x349   : > { %v3345_v58 = vpop.f32.mrf.mxu0  ;;  %3846 = vst [vmem:[#allocation4 + $0xb4] sm:$0xf] %v3798_v2  ;;  %v3916_v36 = vshll.u32 %v3798_v2, 16  ;;  %v3920_v20 = vshrl.u32 %v3798_v2, 16  ;;  %v4172_v62 = vrot.slane %v3798_v2, 5 }
 0x34a   : > { %v3679_v13 = vsel %vm3556_vm7, %v3477_v39, 0.0  ;;  %4286 = vst [vmem:[#allocation4 + $0x54] sm:$0xf] %v3798_v2  ;;  %v3346_v46 = vadd.f32 %v3345_v58, %v3262_v11  ;;  %v8427_v2 = vld [vmem:[%s11044_s4 + $0x1b8] sm:$0xff]  ;;  %v3265_v39 = vadd.f32 %v9695_v9, %v3181_v55  ;;  %v8273_v58 = vld [vmem:[#allocation4 + $0x4c] sm:$0xf] }
 0x34b   : > { %v3709_v51 = vpack.c.bf16 %v3679_v13, %v3679_v13  ;;  %v3918_v34 = vrot.slane %v3916_v36, 5  ;;  %v3922_v24 = vrot.slane %v3920_v20, 4  ;;  %v4173_v33 = vsel %vm9009_vm5, %v4171_v56, %v4172_v62  ;;  %v8278_v57 = vld [vmem:[#allocation4 + $0x70] sm:$0xf0]  ;;  %6141 = vmatpush.bf16.msra.mxu0 %v8427_v2 }
 0x34c   : > { %4259 = vst [vmem:[#allocation4 + $0x98] sm:$0xf] %v4173_v33  ;;  %v3414_v40 = vmul.f32 %v9836_v23, %v3346_v46  ;;  %v7381_v41 = vor.u32 %v8278_v57, %v7380_v59  ;;  %v4174_v44 = vrot.slane %v4172_v62, 4  ;;  %v6970_v20 = vor.u32 %v8173_v50, %v6969_v60  ;;  %v7408_v46 = vld [vmem:[#allocation4 + $0x90] sm:$0xf]  ;;  %v11129_v60 = vld [vmem:[#allocation19_spill] sm:$0xff] }
 0x34d   : > { %v3769_v47 = vunpack.c.l.b16 %v3709_v51  ;;  %v3919_v42 = vsel %vm8727_vm2, %v3914_v35, %v3918_v34  ;;  %4379 = vst [vmem:[#allocation4 + $0x38] sm:$0xf] %v4173_v33  ;;  %v3923_v49 = vor.u32 %v3922_v24, %v3918_v34  ;;  %v7374_v63 = vld [vmem:[#allocation4 + $0x6c] sm:$0xf0]  ;;  %v11128_v35 = vld [vmem:[#allocation10_spill] sm:$0xff]  ;;  %v1193_v50 = vrot.slane %v11129_v60, 5 }
 0x34e   : > { %4138 = vst [vmem:[#allocation4 + $0x94] sm:$0xf] %v3919_v42  ;;  %v3448_v56 = vadd.f32 %v9846_v0, %v3414_v40  ;;  %5910 = vmatmul.bf16.gmra.mxu3 %v7381_v41  ;;  %v7377_v36 = vor.u32 %v8273_v58, %v7374_v63  ;;  %v3183_v34 = vadd.f32 %v11128_v35, %v3099_v16  ;;  %v3510_v40 = vadd.s32 3, %v9828_v31  ;;  %v8426_v59 = vld [vmem:[%s11044_s4 + $0x1b0] sm:$0xff] }
 0x34f   : > { %v9993_v11 = vpack.c.b16 %v3769_v47, %v3769_v47  ;;  %4343 = vst [vmem:[#allocation4 + $0x34] sm:$0xf] %v3919_v42  ;;  %v3924_v33 = vrot.slane %v3923_v49, 4  ;;  %v1192_v42 = vrot.slane %v1190_v45, 4  ;;  %v8402_v49 = vld [vmem:[%s11044_s4 + $0xf0] sm:$0xff]  ;;  %6142 = vmatpush.bf16.msra.mxu0 %v8426_v59 }
 0x350   : > { %v3478_v55 = vmax.f32 %v3448_v56, 0.0  ;;  %5849 = vmatmul.bf16.gmra.mxu2 %v7377_v36  ;;  %v8286_v24 = vld [vmem:[#allocation4 + $0xb0] sm:$0xf0]  ;;  %v8513_v45 = vld [vmem:[#allocation2 + $0x90] sm:$0xf]  ;;  %5959 = vmatpush.bf16.msrb.mxu1 %v8402_v49  ;;  %v3267_v36 = vadd.f32 %v9714_v30, %v3183_v34  ;;  %vm3520_vm10 = vcmp.ge.s32.totalorder %v3510_v40, 0 }
 0x351   : > { %3847 = vst [vmem:[#allocation4 + $0xd8] sm:$0xf] %v9993_v11  ;;  %v3926_v13 = vshll.u32 %v9993_v11, 16  ;;  %v3930_v9 = vshrl.u32 %v9993_v11, 16  ;;  %v4175_v19 = vrot.slane %v9993_v11, 5  ;;  %v3348_v51 = vpop.f32.mrf.mxu0  ;;  %v7409_v16 = vor.u32 %v8286_v24, %v7408_v46 }
 0x352   : > { %4287 = vst [vmem:[#allocation4 + $0x78] sm:$0xf] %v9993_v11  ;;  %v3349_v62 = vadd.f32 %v3348_v51, %v3265_v39  ;;  %v3680_v57 = vsel %vm9956_vm6, %v3478_v55, 0.0  ;;  %v1194_v10 = vsel %vm9009_vm5, %v1192_v42, %v1193_v50  ;;  %v1196_v58 = vrot.slane %v8513_v45, 5  ;;  %v8421_v45 = vld [vmem:[%s11044_s4 + $0x188] sm:$0xff] }
 0x353   : > { %v3928_v48 = vrot.slane %v3926_v13, 5  ;;  %v4176_v47 = vsel %vm9009_vm5, %v4174_v44, %v4175_v19  ;;  %4407 = vst [vmem:[#allocation4 + $0x18] sm:$0xf] %v9993_v11  ;;  %v3932_v2 = vrot.slane %v3930_v9, 4  ;;  %v3710_v39 = vpack.c.bf16 %v3680_v57, %v3680_v57  ;;  %5792 = vmatmul.bf16.gmra.mxu1 %v7409_v16  ;;  %v8425_v44 = vld [vmem:[%s11044_s4 + $0x1a8] sm:$0xff] }
 0x354   : > { %4260 = vst [vmem:[#allocation4 + $0xbc] sm:$0xf] %v4176_v47  ;;  %v3415_v61 = vmul.f32 %v9836_v23, %v3349_v62  ;;  %3387 = vmatmul.bf16.gmra.mxu0 %v6970_v20  ;;  %v1195_v11 = vrot.slane %v1193_v50, 4  ;;  %vm3530_vm12 = vcmp.lt.s32.totalorder %v3510_v40, 16  ;;  %v4177_v52 = vrot.slane %v4175_v19, 4 }
 0x355   : > { %v3929_v41 = vsel %vm8727_vm2, %v3924_v33, %v3928_v48  ;;  %4380 = vst [vmem:[#allocation4 + $0x5c] sm:$0xf] %v4176_v47  ;;  %v3770_v63 = vunpack.c.l.b16 %v3710_v39  ;;  %v3933_v9 = vor.u32 %v3932_v2, %v3928_v48  ;;  %6143 = vmatpush.bf16.msra.mxu0 %v8425_v44  ;;  %v7416_v34 = vld [vmem:[#allocation4 + $0x98] sm:$0xf]  ;;  %v7005_v50 = vld [vmem:[#allocation3 + $0x3c8] sm:$0xf]  ;;  %vm10038_vm13 = vmand %vm3520_vm10, %vm3530_vm12 }
 0x356   : > { %4139 = vst [vmem:[#allocation4 + $0xb8] sm:$0xf] %v3929_v41  ;;  %v3449_v56 = vadd.f32 %v9846_v0, %v3415_v61  ;;  %v1197_v13 = vsel %vm9009_vm5, %v1195_v11, %v1196_v58  ;;  %v8182_v33 = vld [vmem:[#allocation3 + $0x3e8] sm:$0xf0]  ;;  %v11130_v47 = vld [vmem:[#allocation14_spill] sm:$0xff]  ;;  %v8424_v61 = vld [vmem:[%s11044_s4 + $0x1a0] sm:$0xff] }
 0x357   : > { %4344 = vst [vmem:[#allocation4 + $0x58] sm:$0xf] %v3929_v41  ;;  %v3800_v55 = vpack.c.b16 %v3770_v63, %v3770_v63  ;;  %v3186_v48 = vadd.f32 %v11130_v47, %v9728_v21  ;;  %v3934_v16 = vrot.slane %v3933_v9, 4  ;;  %v8282_v49 = vld [vmem:[#allocation4 + $0x94] sm:$0xf]  ;;  %vm10056_vm14 = vmand %vm10038_vm13, %vm3547_vm9 }
 0x358   : > { %v3479_v20 = vmax.f32 %v3449_v56, 0.0  ;;  %1229 = vst [vmem:[#allocation3 + $0x410] sm:$0xf] %v1194_v10  ;;  %v3104_v56 = vadd.f32 %v9690_v18, %v9731_v54  ;;  %v8423_v18 = vld [vmem:[%s11044_s4 + $0x198] sm:$0xff]  ;;  %vm10107_vm15 = vmand %vm10038_vm13, %vm3582_vm11 }
 0x359   : > { %v3350_v51 = vpop.f32.mrf.mxu0  ;;  %1230 = vst [vmem:[#allocation3 + $0x434] sm:$0xf] %v1197_v13  ;;  %v3936_v62 = vshll.u32 %v3800_v55, 16  ;;  %v3940_v24 = vshrl.u32 %v3800_v55, 16  ;;  %v4178_v60 = vrot.slane %v3800_v55, 5  ;;  %6144 = vmatpush.bf16.msra.mxu0 %v8424_v61  ;;  %v3270_v54 = vadd.f32 %v9725_v14, %v3186_v48 }
 0x35a   : > { %v3681_v46 = vsel %vm3591_vm8, %v3479_v20, 0.0  ;;  %v3351_v35 = vadd.f32 %v3350_v51, %v3267_v36  ;;  %3848 = vst [vmem:[#allocation4 + $0xfc] sm:$0xf] %v3800_v55  ;;  %v7006_v20 = vor.u32 %v8182_v33, %v7005_v50 }
 0x35b   : > { %v3711_v30 = vpack.c.bf16 %v3681_v46, %v3681_v46  ;;  %4288 = vst [vmem:[#allocation4 + $0x9c] sm:$0xf] %v3800_v55  ;;  %v8287_v57 = vld [vmem:[#allocation4 + $0xb8] sm:$0xf0]  ;;  %v3938_v42 = vrot.slane %v3936_v62, 5  ;;  %v3942_v41 = vrot.slane %v3940_v24, 4  ;;  %v4179_v21 = vsel %vm9009_vm5, %v4177_v52, %v4178_v60 }
 0x35c   : > { %v3416_v59 = vmul.f32 %v9836_v23, %v3351_v35  ;;  %4408 = vst [vmem:[#allocation4 + $0x3c] sm:$0xf] %v3800_v55  ;;  %v7417_v39 = vor.u32 %v8287_v57, %v7416_v34  ;;  %v4180_v13 = vrot.slane %v4178_v60, 4  ;;  %v3188_v35 = vadd.f32 %v9697_v43, %v3104_v56  ;;  %v8422_v43 = vld [vmem:[%s11044_s4 + $0x190] sm:$0xff] }
 0x35d   : > { %4261 = vst [vmem:[#allocation4 + $0xe0] sm:$0xf] %v4179_v21  ;;  %v3771_v2 = vunpack.c.l.b16 %v3711_v30  ;;  %v7410_v11 = vld [vmem:[#allocation4 + $0xb4] sm:$0xf0]  ;;  %v3939_v10 = vsel %vm8727_vm2, %v3934_v16, %v3938_v42  ;;  %v3943_v63 = vor.u32 %v3942_v41, %v3938_v42  ;;  %6145 = vmatpush.bf16.msra.mxu0 %v8423_v18 }
 0x35e   : > { %v3450_v40 = vadd.f32 %v9846_v0, %v3416_v59  ;;  %4381 = vst [vmem:[#allocation4 + $0x80] sm:$0xf] %v4179_v21  ;;  %v7413_v58 = vor.u32 %v8282_v49, %v7410_v11  ;;  %5914 = vmatmul.bf16.gmra.mxu3 %v7417_v39  ;;  %v7444_v30 = vld [vmem:[#allocation4 + $0xd8] sm:$0xf] }
 0x35f   : > { %4140 = vst [vmem:[#allocation4 + $0xdc] sm:$0xf] %v3939_v10  ;;  %v3801_v44 = vpack.c.b16 %v3771_v2, %v3771_v2  ;;  %v3944_v14 = vrot.slane %v3943_v63, 4  ;;  %v8409_v41 = vld [vmem:[%s11044_s4 + $0x128] sm:$0xff] }
 0x360   : > { %v3480_v36 = vmax.f32 %v3450_v40, 0.0  ;;  %4345 = vst [vmem:[#allocation4 + $0x7c] sm:$0xf] %v3939_v10  ;;  %5853 = vmatmul.bf16.gmra.mxu2 %v7413_v58  ;;  %v8191_v18 = vld [vmem:[#allocation3 + $0x430] sm:$0xf0] }
 0x361   : > { %v3353_v9 = vpop.f32.mrf.mxu0  ;;  %4467 = vst [vmem:[#allocation4 + $0x1c] sm:$0xf] %v3939_v10  ;;  %v3946_v55 = vshll.u32 %v3801_v44, 16  ;;  %v3950_v51 = vshrl.u32 %v3801_v44, 16  ;;  %v4181_v52 = vrot.slane %v3801_v44, 5  ;;  %6146 = vmatpush.bf16.msra.mxu0 %v8422_v43  ;;  %6021 = vmatpush.bf16.msrb.mxu2 %v8409_v41 }
 0x362   : > { %v3682_v46 = vsel %vm10056_vm14, %v3480_v36, 0.0  ;;  %4503 = vst [vmem:[#allocation4 + $0x20] sm:$0xf] %v4179_v21  ;;  %v3354_v24 = vadd.f32 %v3353_v9, %v3270_v54  ;;  %v8295_v34 = vld [vmem:[#allocation4 + $0xf8] sm:$0xf0]  ;;  %v3272_v21 = vadd.f32 %v9733_v7, %v3188_v35 }
 0x363   : > { %v3712_v62 = vpack.c.bf16 %v3682_v46, %v3682_v46  ;;  %3849 = vst [vmem:[#allocation4 + $0x120] sm:$0xf] %v3801_v44  ;;  %v3948_v60 = vrot.slane %v3946_v55, 5  ;;  %v3952_v50 = vrot.slane %v3950_v51, 4  ;;  %v4182_v33 = vsel %vm9009_vm5, %v4180_v13, %v4181_v52  ;;  %v11135_v54 = vld [vmem:[#allocation21_spill] sm:$0xff]  ;;  %v11136_v13 = vld [vmem:[#allocation15_spill] sm:$0xff] }
 0x364   : > { %3392 = vmatmul.bf16.gmra.mxu0 %v7006_v20  ;;  %4262 = vst [vmem:[#allocation4 + $0x104] sm:$0xf] %v4182_v33  ;;  %v3417_v48 = vmul.f32 %v9836_v23, %v3354_v24  ;;  %v7445_v59 = vor.u32 %v8295_v34, %v7444_v30  ;;  %v4183_v2 = vrot.slane %v4181_v52, 4  ;;  %v7452_v36 = vld [vmem:[#allocation4 + $0xe0] sm:$0xf]  ;;  %v3191_v9 = vadd.f32 %v11136_v13, %v11135_v54 }
 0x365   : > { %v3772_v47 = vunpack.c.l.b16 %v3712_v62  ;;  %v3949_v57 = vsel %vm8727_vm2, %v3944_v14, %v3948_v60  ;;  %4289 = vst [vmem:[#allocation4 + $0xc0] sm:$0xf] %v3801_v44  ;;  %v3953_v61 = vor.u32 %v3952_v50, %v3948_v60  ;;  %v7041_v20 = vld [vmem:[#allocation3 + $0x410] sm:$0xf]  ;;  %v3511_v52 = vadd.s32 4, %v9828_v31  ;;  %6147 = vmatpush.bf16.msra.mxu0 %v8421_v45  ;;  %v8420_v60 = vld [vmem:[%s11044_s4 + $0x180] sm:$0xff] }
 0x366   : > { %4141 = vst [vmem:[#allocation4 + $0x100] sm:$0xf] %v3949_v57  ;;  %v3451_v42 = vadd.f32 %v9846_v0, %v3417_v48  ;;  %5796 = vmatmul.bf16.gmra.mxu1 %v7445_v59  ;;  %v8291_v30 = vld [vmem:[#allocation4 + $0xdc] sm:$0xf]  ;;  %v11139_v48 = vld [vmem:[#allocation11_spill] sm:$0xff] }
 0x367   : > { %v10075_v16 = vpack.c.b16 %v3772_v47, %v3772_v47  ;;  %4346 = vst [vmem:[#allocation4 + $0xa0] sm:$0xf] %v3949_v57  ;;  %v3954_v58 = vrot.slane %v3953_v61, 4  ;;  %v3275_v59 = vadd.f32 %v11139_v48, %v3191_v9  ;;  %v8401_v61 = vld [vmem:[%s11044_s4 + $0xe8] sm:$0xff]  ;;  %vm3521_vm0 = vcmp.ge.s32.totalorder %v3511_v52, 0 }
 0x368   : > { %4382 = vst [vmem:[#allocation4 + $0xa4] sm:$0xf] %v4182_v33  ;;  %v3481_v11 = vmax.f32 %v3451_v42, 0.0  ;;  %vm3531_vm1 = vcmp.lt.s32.totalorder %v3511_v52, 16  ;;  %5960 = vmatpush.bf16.msrb.mxu1 %v8401_v61 }
 0x369   : > { %v3956_v40 = vshll.u32 %v10075_v16, 16  ;;  %v3960_v39 = vshrl.u32 %v10075_v16, 16  ;;  %v4184_v49 = vrot.slane %v10075_v16, 5  ;;  %v3355_v56 = vpop.f32.mrf.mxu0  ;;  %4409 = vst [vmem:[#allocation4 + $0x60] sm:$0xf] %v3801_v44  ;;  %6148 = vmatpush.bf16.msra.mxu0 %v8420_v60  ;;  %vm10121_vm3 = vmand %vm3521_vm0, %vm3531_vm1 }
 0x36a   : > { %v3356_v10 = vadd.f32 %v3355_v56, %v3272_v21  ;;  %4468 = vst [vmem:[#allocation4 + $0x40] sm:$0xf] %v3949_v57  ;;  %v3683_v44 = vsel %vm10038_vm13, %v3481_v11, 0.0  ;;  %v7042_v57 = vor.u32 %v8191_v18, %v7041_v20  ;;  %vm3562_vm4 = vmand %vm10121_vm3, %vm3547_vm9 }
 0x36b   : > { %v3958_v7 = vrot.slane %v3956_v40, 5  ;;  %v4185_v63 = vsel %vm9009_vm5, %v4183_v2, %v4184_v49  ;;  %4504 = vst [vmem:[#allocation4 + $0x44] sm:$0xf] %v4182_v33  ;;  %v8296_v51 = vld [vmem:[#allocation4 + $0x100] sm:$0xf0]  ;;  %v3962_v35 = vrot.slane %v3960_v39, 4  ;;  %v3713_v62 = vpack.c.bf16 %v3683_v44, %v3683_v44  ;;  %vm3597_vm6 = vmand %vm10121_vm3, %vm3582_vm11 }
 0x36c   : > { %v3418_v55 = vmul.f32 %v9836_v23, %v3356_v10  ;;  %3850 = vst [vmem:[#allocation4 + $0x144] sm:$0xf] %v10075_v16  ;;  %v7453_v24 = vor.u32 %v8296_v51, %v7452_v36  ;;  %v4186_v21 = vrot.slane %v4184_v49, 4  ;;  %v7480_v49 = vld [vmem:[#allocation4 + $0x120] sm:$0xf] }
 0x36d   : > { %v3959_v46 = vsel %vm8727_vm2, %v3954_v58, %v3958_v7  ;;  %v7446_v14 = vld [vmem:[#allocation4 + $0xfc] sm:$0xf0]  ;;  %4263 = vst [vmem:[#allocation4 + $0x128] sm:$0xf] %v4185_v63  ;;  %v3773_v50 = vunpack.c.l.b16 %v3713_v62  ;;  %v3963_v42 = vor.u32 %v3962_v35, %v3958_v7 }
 0x36e   : > { %4142 = vst [vmem:[#allocation4 + $0x124] sm:$0xf] %v3959_v46  ;;  %v3452_v34 = vadd.f32 %v9846_v0, %v3418_v55  ;;  %v7449_v47 = vor.u32 %v8291_v30, %v7446_v14  ;;  %5918 = vmatmul.bf16.gmra.mxu3 %v7453_v24  ;;  %v11142_v14 = vld [vmem:[#allocation22_spill] sm:$0xff] }
 0x36f   : > { %4290 = vst [vmem:[#allocation4 + $0xe4] sm:$0xf] %v10075_v16  ;;  %v3803_v19 = vpack.c.b16 %v3773_v50, %v3773_v50  ;;  %v3964_v36 = vrot.slane %v3963_v42, 4 }
 0x370   : > { %v3482_v43 = vmax.f32 %v3452_v34, 0.0  ;;  %4347 = vst [vmem:[#allocation4 + $0xc4] sm:$0xf] %v3959_v46  ;;  %5857 = vmatmul.bf16.gmra.mxu2 %v7449_v47 }
 0x371   : > { %v3358_v41 = vpop.f32.mrf.mxu0  ;;  %4383 = vst [vmem:[#allocation4 + $0xc8] sm:$0xf] %v4185_v63  ;;  %v3966_v39 = vshll.u32 %v3803_v19, 16  ;;  %v3970_v11 = vshrl.u32 %v3803_v19, 16  ;;  %v4187_v56 = vrot.slane %v3803_v19, 5 }
 0x372   : > { %v3684_v2 = vsel %vm10107_vm15, %v3482_v43, 0.0  ;;  %v3359_v40 = vadd.f32 %v3358_v41, %v3275_v59  ;;  %4410 = vst [vmem:[#allocation4 + $0x84] sm:$0xf] %v10075_v16 }
 0x373   : > { %v3714_v10 = vpack.c.bf16 %v3684_v2, %v3684_v2  ;;  %4469 = vst [vmem:[#allocation4 + $0x64] sm:$0xf] %v3959_v46  ;;  %v8304_v7 = vld [vmem:[#allocation4 + $0x140] sm:$0xf0]  ;;  %v3968_v20 = vrot.slane %v3966_v39, 5  ;;  %v3972_v18 = vrot.slane %v3970_v11, 4  ;;  %v4188_v16 = vsel %vm9009_vm5, %v4186_v21, %v4187_v56 }
 0x374   : > { %v3419_v45 = vmul.f32 %v9836_v23, %v3359_v40  ;;  %3397 = vmatmul.bf16.gmra.mxu0 %v7042_v57  ;;  %4505 = vst [vmem:[#allocation4 + $0x68] sm:$0xf] %v4185_v63  ;;  %v7481_v9 = vor.u32 %v8304_v7, %v7480_v49  ;;  %v4189_v52 = vrot.slane %v4187_v56, 4  ;;  %v8271_v57 = vld [vmem:[#allocation4 + $0x38] sm:$0xf0] }
 0x375   : > { %3851 = vst [vmem:[#allocation4 + $0x168] sm:$0xf] %v3803_v19  ;;  %v3774_v54 = vunpack.c.l.b16 %v3714_v10  ;;  %v3969_v44 = vsel %vm8727_vm2, %v3964_v36, %v3968_v20  ;;  %v3973_v63 = vor.u32 %v3972_v18, %v3968_v20  ;;  %v7488_v42 = vld [vmem:[#allocation4 + $0x128] sm:$0xf]  ;;  %v8300_v39 = vld [vmem:[#allocation4 + $0x124] sm:$0xf] }
 0x376   : > { %v3453_v13 = vadd.f32 %v9846_v0, %v3419_v45  ;;  %4264 = vst [vmem:[#allocation4 + $0x14c] sm:$0xf] %v4188_v16  ;;  %5801 = vmatmul.bf16.gmra.mxu1 %v7481_v9 }
 0x377   : > { %4143 = vst [vmem:[#allocation4 + $0x148] sm:$0xf] %v3969_v44  ;;  %v3804_v55 = vpack.c.b16 %v3774_v54, %v3774_v54  ;;  %v3974_v50 = vrot.slane %v3973_v63, 4  ;;  %v10157_v63 = vld [vmem:[%s11042_s2] ss:$0 sm:$0xff] }
 0x378   : > { %v3483_v51 = vmax.f32 %v3453_v13, 0.0  ;;  %4291 = vst [vmem:[#allocation4 + $0x108] sm:$0xf] %v3803_v19 }
 0x379   : > { %v3360_v46 = vpop.f32.mrf.mxu0  ;;  %4348 = vst [vmem:[#allocation4 + $0xe8] sm:$0xf] %v3969_v44  ;;  %v3976_v35 = vshll.u32 %v3804_v55, 16  ;;  %v3980_v62 = vshrl.u32 %v3804_v55, 16  ;;  %v4190_v24 = vrot.slane %v3804_v55, 5 }
 0x37a   : > { %v3685_v30 = vsel %vm3562_vm4, %v3483_v51, 0.0  ;;  %4384 = vst [vmem:[#allocation4 + $0xec] sm:$0xf] %v4188_v16  ;;  %v3361_v60 = vadd.f32 %v3360_v46, %v11142_v14 }
 0x37b   : > { %v3715_v34 = vpack.c.bf16 %v3685_v30, %v3685_v30  ;;  %4411 = vst [vmem:[#allocation4 + $0xa8] sm:$0xf] %v3803_v19  ;;  %v3978_v33 = vrot.slane %v3976_v35, 5  ;;  %v3982_v47 = vrot.slane %v3980_v62, 4  ;;  %v4191_v48 = vsel %vm9009_vm5, %v4189_v52, %v4190_v24  ;;  %v10166_v62 = vld [vmem:[%s11043_s3] ss:$0 sm:$0xff] }
 0x37c   : > { %4470 = vst [vmem:[#allocation4 + $0x88] sm:$0xf] %v3969_v44  ;;  %v3420_v43 = vmul.f32 %v9836_v23, %v3361_v60  ;;  %v4192_v56 = vrot.slane %v4190_v24, 4  ;;  %v7360_v23 = vld [vmem:[#allocation4 + $0x18] sm:$0xf]  ;;  %v3512_v35 = vadd.s32 5, %v9828_v31 }
 0x37d   : > { %v3775_v59 = vunpack.c.l.b16 %v3715_v34  ;;  %4506 = vst [vmem:[#allocation4 + $0x8c] sm:$0xf] %v4188_v16  ;;  %v3979_v61 = vsel %vm8727_vm2, %v3974_v50, %v3978_v33  ;;  %v8305_v41 = vld [vmem:[#allocation4 + $0x148] sm:$0xf0]  ;;  %v3983_v21 = vor.u32 %v3982_v47, %v3978_v33  ;;  %v7361_v18 = vor.u32 %v8271_v57, %v7360_v23  ;;  %v7516_v30 = vld [vmem:[#allocation4 + $0x168] sm:$0xf] }
 0x37e   : > { %3852 = vst [vmem:[#allocation4 + $0x18c] sm:$0xf] %v3804_v55  ;;  %v3454_v19 = vadd.f32 %v9846_v0, %v3420_v43  ;;  %v7489_v40 = vor.u32 %v8305_v41, %v7488_v42  ;;  %v7482_v11 = vld [vmem:[#allocation4 + $0x144] sm:$0xf0]  ;;  %v8408_v16 = vld [vmem:[%s11044_s4 + $0x120] sm:$0xff]  ;;  %vm3522_vm7 = vcmp.ge.s32.totalorder %v3512_v35, 0 }
 0x37f   : > { %v10140_v2 = vpack.c.b16 %v3775_v59, %v3775_v59  ;;  %4144 = vst [vmem:[#allocation4 + $0x16c] sm:$0xf] %v3979_v61  ;;  %v7485_v10 = vor.u32 %v8300_v39, %v7482_v11  ;;  %v3984_v54 = vrot.slane %v3983_v21, 4  ;;  %6022 = vmatpush.bf16.msrb.mxu2 %v8408_v16  ;;  %vm3532_vm8 = vcmp.lt.s32.totalorder %v3512_v35, 16  ;;  %v8400_v41 = vld [vmem:[%s11044_s4 + $0xe0] sm:$0xff] }
 0x380   : > { %4265 = vst [vmem:[#allocation4 + $0x170] sm:$0xf] %v4191_v48  ;;  %v3484_v36 = vmax.f32 %v3454_v19, 0.0  ;;  %5923 = vmatmul.bf16.gmra.mxu3 %v7489_v40  ;;  %vm10185_vm10 = vmand %vm3522_vm7, %vm3532_vm8  ;;  %5961 = vmatpush.bf16.msrb.mxu1 %v8400_v41  ;;  %v8280_v23 = vld [vmem:[#allocation4 + $0x80] sm:$0xf0] }
 0x381   : > { %v3986_v45 = vshll.u32 %v10140_v2, 16  ;;  %v3990_v49 = vshrl.u32 %v10140_v2, 16  ;;  %v4193_v7 = vrot.slane %v10140_v2, 5  ;;  %v3363_v20 = vpop.f32.mrf.mxu0  ;;  %4292 = vst [vmem:[#allocation4 + $0x12c] sm:$0xf] %v3804_v55  ;;  %5862 = vmatmul.bf16.gmra.mxu2 %v7485_v10  ;;  %vm10199_vm12 = vmand %vm10185_vm10, %vm3547_vm9 }
 0x382   : > { %v3364_v0 = vadd.f32 %v3363_v20, %v9750_v15  ;;  %4349 = vst [vmem:[#allocation4 + $0x10c] sm:$0xf] %v3979_v61  ;;  %v3686_v44 = vsel %vm10121_vm3, %v3484_v36, 0.0  ;;  %v7396_v36 = vld [vmem:[#allocation4 + $0x60] sm:$0xf]  ;;  %vm3600_vm13 = vmand %vm10185_vm10, %vm3582_vm11 }
 0x383   : > { %v3988_v13 = vrot.slane %v3986_v45, 5  ;;  %v4194_v9 = vsel %vm9009_vm5, %v4192_v56, %v4193_v7  ;;  %4385 = vst [vmem:[#allocation4 + $0x110] sm:$0xf] %v4191_v48  ;;  %v3992_v52 = vrot.slane %v3990_v49, 4  ;;  %v3716_v46 = vpack.c.bf16 %v3686_v44, %v3686_v44 }
 0x384   : > { %v3421_v15 = vmul.f32 %v10157_v63, %v3364_v0  ;;  %6149 = vmatmul.bf16.vlgmr.msra.gmra.mxu0 %v7361_v18  ;;  %4412 = vst [vmem:[#allocation4 + $0xcc] sm:$0xf] %v3804_v55  ;;  %v4195_v59 = vrot.slane %v4193_v7, 4 }
 0x385   : > { %v3989_v51 = vsel %vm8727_vm2, %v3984_v54, %v3988_v13  ;;  %4471 = vst [vmem:[#allocation4 + $0xac] sm:$0xf] %v3979_v61  ;;  %v8313_v34 = vld [vmem:[#allocation4 + $0x188] sm:$0xf0]  ;;  %v3776_v14 = vunpack.c.l.b16 %v3716_v46  ;;  %v3993_v50 = vor.u32 %v3992_v52, %v3988_v13 }
 0x386   : > { %v3455_v24 = vadd.f32 %v10166_v62, %v3421_v15  ;;  %4507 = vst [vmem:[#allocation4 + $0xb0] sm:$0xf] %v4191_v48  ;;  %v7517_v55 = vor.u32 %v8313_v34, %v7516_v30  ;;  %v8309_v7 = vld [vmem:[#allocation4 + $0x16c] sm:$0xf] }
 0x387   : > { %3853 = vst [vmem:[#allocation4 + $0x1b0] sm:$0xf] %v10140_v2  ;;  %v10174_v33 = vpack.c.b16 %v3776_v14, %v3776_v14  ;;  %v7524_v18 = vld [vmem:[#allocation4 + $0x170] sm:$0xf] }
 0x388   : > { %v3485_v60 = vmax.f32 %v3455_v24, 0.0  ;;  %4145 = vst [vmem:[#allocation4 + $0x190] sm:$0xf] %v3989_v51  ;;  %5805 = vmatmul.bf16.gmra.mxu1 %v7517_v55 }
 0x389   : > { %v3365_v47 = vpop.f32.mrf.mxu0  ;;  %4266 = vst [vmem:[#allocation4 + $0x194] sm:$0xf] %v4194_v9  ;;  %v3996_v58 = vshll.u32 %v10174_v33, 16  ;;  %v4000_v57 = vshrl.u32 %v10174_v33, 16  ;;  %v4196_v61 = vrot.slane %v10174_v33, 5 }
 0x38a   : > { %v3687_v48 = vsel %vm3597_vm6, %v3485_v60, 0.0  ;;  %v3366_v43 = vadd.f32 %v3365_v47, %v9753_v27  ;;  %4293 = vst [vmem:[#allocation4 + $0x150] sm:$0xf] %v10140_v2  ;;  %v3994_v27 = vrot.slane %v3993_v50, 4 }
 0x38b   : > { %v3717_v42 = vpack.c.bf16 %v3687_v48, %v3687_v48  ;;  %4350 = vst [vmem:[#allocation4 + $0x130] sm:$0xf] %v3989_v51  ;;  %v3998_v40 = vrot.slane %v3996_v58, 5  ;;  %v4002_v39 = vrot.slane %v4000_v57, 4  ;;  %v4197_v11 = vsel %vm9009_vm5, %v4195_v59, %v4196_v61 }
 0x38c   : > { %v3422_v21 = vmul.f32 %v10157_v63, %v3366_v43  ;;  %4386 = vst [vmem:[#allocation4 + $0x134] sm:$0xf] %v4194_v9  ;;  %v4198_v54 = vrot.slane %v4196_v61, 4 }
 0x38d   : > { %4413 = vst [vmem:[#allocation4 + $0xf0] sm:$0xf] %v10140_v2  ;;  %v3777_v56 = vunpack.c.l.b16 %v3717_v42  ;;  %v3999_v45 = vsel %vm8727_vm2, %v3994_v27, %v3998_v40  ;;  %v4003_v2 = vor.u32 %v4002_v39, %v3998_v40 }
 0x38e   : > { %v3456_v10 = vadd.f32 %v10166_v62, %v3422_v21  ;;  %4472 = vst [vmem:[#allocation4 + $0xd0] sm:$0xf] %v3989_v51  ;;  %v7397_v51 = vor.u32 %v8280_v23, %v7396_v36  ;;  %v7552_v57 = vld [vmem:[#allocation4 + $0x1b0] sm:$0xf] }
 0x38f   : > { %4508 = vst [vmem:[#allocation4 + $0xd4] sm:$0xf] %v4194_v9  ;;  %v10203_v20 = vpack.c.b16 %v3777_v56, %v3777_v56  ;;  %v7518_v16 = vld [vmem:[#allocation4 + $0x18c] sm:$0xf0]  ;;  %v4004_v14 = vrot.slane %v4003_v2, 4  ;;  %v8407_v2 = vld [vmem:[%s11044_s4 + $0x118] sm:$0xff] }
 0x390   : > { %v3486_v0 = vmax.f32 %v3456_v10, 0.0  ;;  %3854 = vst [vmem:[#allocation4 + $0x1d4] sm:$0xf] %v10174_v33  ;;  %v8314_v13 = vld [vmem:[#allocation4 + $0x190] sm:$0xf0]  ;;  %v7521_v44 = vor.u32 %v8309_v7, %v7518_v16  ;;  %6023 = vmatpush.bf16.msrb.mxu2 %v8407_v2 }
 0x391   : > { %v3368_v15 = vpop.f32.mrf.mxu0  ;;  %4146 = vst [vmem:[#allocation4 + $0x1b4] sm:$0xf] %v3999_v45  ;;  %v4006_v52 = vshll.u32 %v10203_v20, 16  ;;  %v4010_v46 = vshrl.u32 %v10203_v20, 16  ;;  %v4199_v9 = vrot.slane %v10203_v20, 5  ;;  %v7525_v30 = vor.u32 %v8314_v13, %v7524_v18 }
 0x392   : > { %v3688_v35 = vsel %vm10199_vm12, %v3486_v0, 0.0  ;;  %4267 = vst [vmem:[#allocation4 + $0x1b8] sm:$0xf] %v4197_v11  ;;  %5866 = vmatmul.bf16.gmra.mxu2 %v7521_v44  ;;  %v3369_v34 = vadd.f32 %v3368_v15, %v9756_v5  ;;  %v3513_v0 = vadd.s32 6, %v9828_v31  ;;  %v7432_v44 = vld [vmem:[#allocation4 + $0xa8] sm:$0xf] }
 0x393   : > { %v3718_v24 = vpack.c.bf16 %v3688_v35, %v3688_v35  ;;  %4294 = vst [vmem:[#allocation4 + $0x174] sm:$0xf] %v10174_v33  ;;  %v4008_v55 = vrot.slane %v4006_v52, 5  ;;  %v4012_v60 = vrot.slane %v4010_v46, 4  ;;  %v4200_v50 = vsel %vm9009_vm5, %v4198_v54, %v4199_v9  ;;  %5927 = vmatmul.bf16.gmra.mxu3 %v7525_v30  ;;  %v8289_v54 = vld [vmem:[#allocation4 + $0xc8] sm:$0xf0] }
 0x394   : > { %6154 = vmatmul.bf16.gmra.mxu0 %v7397_v51  ;;  %4351 = vst [vmem:[#allocation4 + $0x154] sm:$0xf] %v3999_v45  ;;  %v3423_v59 = vmul.f32 %v10157_v63, %v3369_v34  ;;  %v4201_v61 = vrot.slane %v4199_v9, 4  ;;  %vm3523_vm14 = vcmp.ge.s32.totalorder %v3513_v0, 0  ;;  %vm3533_vm15 = vcmp.lt.s32.totalorder %v3513_v0, 16 }
 0x395   : > { %v3778_v47 = vunpack.c.l.b16 %v3718_v24  ;;  %4387 = vst [vmem:[#allocation4 + $0x158] sm:$0xf] %v4197_v11  ;;  %v4009_v48 = vsel %vm8727_vm2, %v4004_v14, %v4008_v55  ;;  %v4013_v5 = vor.u32 %v4012_v60, %v4008_v55  ;;  %v7433_v30 = vor.u32 %v8289_v54, %v7432_v44  ;;  %vm10260_vm0 = vmand %vm3523_vm14, %vm3533_vm15 }
 0x396   : > { %4414 = vst [vmem:[#allocation4 + $0x114] sm:$0xf] %v10174_v33  ;;  %v3457_v58 = vadd.f32 %v10166_v62, %v3423_v59  ;;  %vm3568_vm1 = vmand %vm10260_vm0, %vm3547_vm9 }
 0x397   : > { %v10219_v43 = vpack.c.b16 %v3778_v47, %v3778_v47  ;;  %4473 = vst [vmem:[#allocation4 + $0xf4] sm:$0xf] %v3999_v45  ;;  %v8322_v42 = vld [vmem:[#allocation4 + $0x1d0] sm:$0xf0]  ;;  %v4014_v10 = vrot.slane %v4013_v5, 4  ;;  %vm10337_vm3 = vmand %vm10260_vm0, %vm3582_vm11 }
 0x398   : > { %4509 = vst [vmem:[#allocation4 + $0xf8] sm:$0xf] %v4197_v11  ;;  %v3487_v40 = vmax.f32 %v3457_v58, 0.0  ;;  %v7553_v33 = vor.u32 %v8322_v42, %v7552_v57  ;;  %v8318_v52 = vld [vmem:[#allocation4 + $0x1b4] sm:$0xf] }
 0x399   : > { %v4016_v41 = vshll.u32 %v10219_v43, 16  ;;  %v4020_v21 = vshrl.u32 %v10219_v43, 16  ;;  %v4202_v27 = vrot.slane %v10219_v43, 5  ;;  %v3370_v39 = vpop.f32.mrf.mxu0  ;;  %3855 = vst [vmem:[#allocation4 + $0x1f8] sm:$0xf] %v10203_v20 }
 0x39a   : > { %v3371_v56 = vadd.f32 %v3370_v39, %v9765_v6  ;;  %4147 = vst [vmem:[#allocation4 + $0x1d8] sm:$0xf] %v4009_v48  ;;  %v3689_v11 = vsel %vm10185_vm10, %v3487_v40, 0.0  ;;  %5809 = vmatmul.bf16.gmra.mxu1 %v7553_v33  ;;  %v7560_v60 = vld [vmem:[#allocation4 + $0x1b8] sm:$0xf]  ;;  %v10281_v40 = vpop.f32.mrf.mxu1 }
 0x39b   : > { %v4018_v23 = vrot.slane %v4016_v41, 5  ;;  %v10229_v45 = vsel %vm9009_vm5, %v4201_v61, %v4202_v27  ;;  %4268 = vst [vmem:[#allocation4 + $0x1dc] sm:$0xf] %v4200_v50  ;;  %v4022_v6 = vrot.slane %v4020_v21, 4  ;;  %v3719_v36 = vpack.c.bf16 %v3689_v11, %v3689_v11  ;;  %v8399_v21 = vld [vmem:[%s11044_s4 + $0xd8] sm:$0xff] }
 0x39c   : > { %v3424_v49 = vmul.f32 %v10157_v63, %v3371_v56  ;;  %4295 = vst [vmem:[#allocation4 + $0x198] sm:$0xf] %v10203_v20  ;;  %v4204_v9 = vrot.slane %v4202_v27, 4  ;;  %5962 = vmatpush.bf16.msrb.mxu1 %v8399_v21 }
 0x39d   : > { %v10237_v7 = vsel %vm8727_vm2, %v4014_v10, %v4018_v23  ;;  %4352 = vst [vmem:[#allocation4 + $0x178] sm:$0xf] %v4009_v48  ;;  %v3779_v16 = vunpack.c.l.b16 %v3719_v36  ;;  %v4023_v15 = vor.u32 %v4022_v6, %v4018_v23 }
 0x39e   : > { %v3458_v18 = vadd.f32 %v10166_v62, %v3424_v49  ;;  %4388 = vst [vmem:[#allocation4 + $0x17c] sm:$0xf] %v4200_v50 }
 0x39f   : > { %4415 = vst [vmem:[#allocation4 + $0x138] sm:$0xf] %v10203_v20  ;;  %v10249_v51 = vpack.c.b16 %v3779_v16, %v3779_v16 }
 0x3a0   : > { %v3488_v13 = vmax.f32 %v3458_v18, 0.0  ;;  %4474 = vst [vmem:[#allocation4 + $0x118] sm:$0xf] %v4009_v48  ;;  %v4024_v48 = vrot.slane %v4023_v15, 4  ;;  %v7588_v0 = vld [vmem:[#allocation4 + $0x1f8] sm:$0xf] }
 0x3a1   : > { %v3373_v46 = vpop.f32.mrf.mxu0  ;;  %4510 = vst [vmem:[#allocation4 + $0x11c] sm:$0xf] %v4200_v50  ;;  %v7554_v24 = vld [vmem:[#allocation4 + $0x1d4] sm:$0xf0]  ;;  %v4026_v20 = vshll.u32 %v10249_v51, 16  ;;  %v4030_v34 = vshrl.u32 %v10249_v51, 16 }
 0x3a2   : > { %v3690_v35 = vsel %vm3600_vm13, %v3488_v13, 0.0  ;;  %v3374_v19 = vadd.f32 %v3373_v46, %v9768_v32  ;;  %3856 = vst [vmem:[#allocation4 + $0x21c] sm:$0xf] %v10219_v43  ;;  %v4205_v14 = vrot.slane %v10249_v51, 5  ;;  %v8323_v47 = vld [vmem:[#allocation4 + $0x1d8] sm:$0xf0]  ;;  %v7557_v50 = vor.u32 %v8318_v52, %v7554_v24 }
 0x3a3   : > { %v3720_v55 = vpack.c.bf16 %v3690_v35, %v3690_v35  ;;  %4148 = vst [vmem:[#allocation4 + $0x1fc] sm:$0xf] %v10237_v7  ;;  %v4028_v5 = vrot.slane %v4026_v20, 5  ;;  %v4032_v58 = vrot.slane %v4030_v34, 4  ;;  %v7561_v42 = vor.u32 %v8323_v47, %v7560_v60  ;;  %v8298_v35 = vld [vmem:[#allocation4 + $0x110] sm:$0xf0] }
 0x3a4   : > { %v3425_v59 = vmul.f32 %v10157_v63, %v3374_v19  ;;  %6158 = vmatmul.bf16.gmra.mxu0 %v7433_v30  ;;  %4269 = vst [vmem:[#allocation4 + $0x200] sm:$0xf] %v10229_v45  ;;  %v10267_v57 = vsel %vm9009_vm5, %v4204_v9, %v4205_v14  ;;  %5870 = vmatmul.bf16.gmra.mxu2 %v7557_v50  ;;  %v4207_v10 = vrot.slane %v4205_v14, 4  ;;  %v7468_v30 = vld [vmem:[#allocation4 + $0xf0] sm:$0xf] }
 0x3a5   : > { %4296 = vst [vmem:[#allocation4 + $0x1bc] sm:$0xf] %v10219_v43  ;;  %v3780_v61 = vunpack.c.l.b16 %v3720_v55  ;;  %v4029_v27 = vsel %vm8727_vm2, %v4024_v48, %v4028_v5  ;;  %v4033_v39 = vor.u32 %v4032_v58, %v4028_v5  ;;  %5931 = vmatmul.bf16.gmra.mxu3 %v7561_v42 }
 0x3a6   : > { %v3459_v41 = vadd.f32 %v10166_v62, %v3425_v59  ;;  %4353 = vst [vmem:[#allocation4 + $0x19c] sm:$0xf] %v10237_v7  ;;  %v7469_v59 = vor.u32 %v8298_v35, %v7468_v30 }
 0x3a7   : > { %4389 = vst [vmem:[#allocation4 + $0x1a0] sm:$0xf] %v10229_v45  ;;  %v10284_v33 = vpack.c.b16 %v3780_v61, %v3780_v61 }
 0x3a8   : > { %v3489_v56 = vmax.f32 %v3459_v41, 0.0  ;;  %4416 = vst [vmem:[#allocation4 + $0x15c] sm:$0xf] %v10219_v43  ;;  %v4034_v43 = vrot.slane %v4033_v39, 4 }
 0x3a9   : > { %v3375_v23 = vpop.f32.mrf.mxu0  ;;  %4475 = vst [vmem:[#allocation4 + $0x13c] sm:$0xf] %v10237_v7  ;;  %v4036_v11 = vshll.u32 %v10284_v33, 16  ;;  %v4040_v49 = vshrl.u32 %v10284_v33, 16  ;;  %v4208_v6 = vrot.slane %v10284_v33, 5 }
 0x3aa   : > { %v3691_v36 = vsel %vm3568_vm1, %v3489_v56, 0.0  ;;  %4511 = vst [vmem:[#allocation4 + $0x140] sm:$0xf] %v10229_v45  ;;  %v8331_v18 = vld [vmem:[#allocation4 + $0x218] sm:$0xf0]  ;;  %v3376_v16 = vadd.f32 %v3375_v23, %v9771_v4 }
 0x3ab   : > { %v3721_v2 = vpack.c.bf16 %v3691_v36, %v3691_v36  ;;  %3857 = vst [vmem:[#allocation4 + $0x240] sm:$0xf] %v10249_v51  ;;  %v4038_v54 = vrot.slane %v4036_v11, 5  ;;  %v4042_v13 = vrot.slane %v4040_v49, 4  ;;  %v10296_v7 = vsel %vm9009_vm5, %v4207_v10, %v4208_v6  ;;  %v8327_v47 = vld [vmem:[#allocation4 + $0x1fc] sm:$0xf] }
 0x3ac   : > { %4149 = vst [vmem:[#allocation4 + $0x220] sm:$0xf] %v4029_v27  ;;  %v7589_v15 = vor.u32 %v8331_v18, %v7588_v0  ;;  %v3426_v52 = vmul.f32 %v10157_v63, %v3376_v16  ;;  %v4210_v24 = vrot.slane %v4208_v6, 4  ;;  %v7596_v61 = vld [vmem:[#allocation4 + $0x200] sm:$0xf]  ;;  %v3297_v6 = vadd.f32 %v9783_v53, %v9785_v28 }
 0x3ad   : > { %v3781_v44 = vunpack.c.l.b16 %v3721_v2  ;;  %4270 = vst [vmem:[#allocation4 + $0x224] sm:$0xf] %v10267_v57  ;;  %v10302_v45 = vsel %vm8727_vm2, %v4034_v43, %v4038_v54  ;;  %v4043_v4 = vor.u32 %v4042_v13, %v4038_v54  ;;  %v8406_v0 = vld [vmem:[%s11044_s4 + $0x110] sm:$0xff]  ;;  %v10352_v43 = vpop.f32.mrf.mxu3 }
 0x3ae   : > { %4297 = vst [vmem:[#allocation4 + $0x1e0] sm:$0xf] %v10249_v51  ;;  %5814 = vmatmul.bf16.gmra.mxu1 %v7589_v15  ;;  %v3460_v9 = vadd.f32 %v10166_v62, %v3426_v52  ;;  %6024 = vmatpush.bf16.msrb.mxu2 %v8406_v0 }
 0x3af   : > { %v10305_v46 = vpack.c.b16 %v3781_v44, %v3781_v44  ;;  %4354 = vst [vmem:[#allocation4 + $0x1c0] sm:$0xf] %v4029_v27  ;;  %v4044_v48 = vrot.slane %v4043_v4, 4  ;;  %v10361_v4 = vpop.f32.mrf.mxu2 }
 0x3b0   : > { %v10308_v19 = vpop.f32.mrf.mxu1  ;;  %4390 = vst [vmem:[#allocation4 + $0x1c4] sm:$0xf] %v10267_v57  ;;  %v3490_v55 = vmax.f32 %v3460_v9, 0.0 }
 0x3b1   : > { %v4046_v20 = vshll.u32 %v10305_v46, 16  ;;  %v4050_v34 = vshrl.u32 %v10305_v46, 16  ;;  %v4211_v14 = vrot.slane %v10305_v46, 5  ;;  %v3378_v60 = vpop.f32.mrf.mxu0  ;;  %4417 = vst [vmem:[#allocation4 + $0x180] sm:$0xf] %v10249_v51 }
 0x3b2   : > { %v3379_v50 = vadd.f32 %v3378_v60, %v9777_v17  ;;  %4476 = vst [vmem:[#allocation4 + $0x160] sm:$0xf] %v4029_v27  ;;  %v3692_v42 = vsel %vm10260_vm0, %v3490_v55, 0.0  ;;  %v3514_v17 = vadd.s32 7, %v9828_v31  ;;  %v7624_v9 = vld [vmem:[#allocation4 + $0x240] sm:$0xf] }
 0x3b3   : > { %v4048_v5 = vrot.slane %v4046_v20, 5  ;;  %v10318_v58 = vsel %vm9009_vm5, %v4210_v24, %v4211_v14  ;;  %4512 = vst [vmem:[#allocation4 + $0x164] sm:$0xf] %v10267_v57  ;;  %v7590_v41 = vld [vmem:[#allocation4 + $0x21c] sm:$0xf0]  ;;  %v4052_v27 = vrot.slane %v4050_v34, 4  ;;  %v3722_v39 = vpack.c.bf16 %v3692_v42, %v3692_v42 }
 0x3b4   : > { %v3427_v51 = vmul.f32 %v10157_v63, %v3379_v50  ;;  %6162 = vmatmul.bf16.gmra.mxu0 %v7469_v59  ;;  %3858 = vst [vmem:[#allocation4 + $0x264] sm:$0xf] %v10284_v33  ;;  %v8332_v56 = vld [vmem:[#allocation4 + $0x220] sm:$0xf0]  ;;  %v7593_v10 = vor.u32 %v8327_v47, %v7590_v41  ;;  %vm3524_vm4 = vcmp.ge.s32.totalorder %v3514_v17, 0  ;;  %vm3534_vm6 = vcmp.lt.s32.totalorder %v3514_v17, 16 }
 0x3b5   : > { %v10328_v21 = vsel %vm8727_vm2, %v4044_v48, %v4048_v5  ;;  %4150 = vst [vmem:[#allocation4 + $0x244] sm:$0xf] %v10302_v45  ;;  %v7597_v57 = vor.u32 %v8332_v56, %v7596_v61  ;;  %v3782_v11 = vunpack.c.l.b16 %v3722_v39  ;;  %v4053_v32 = vor.u32 %v4052_v27, %v4048_v5  ;;  %vm10367_vm7 = vmand %vm3524_vm4, %vm3534_vm6  ;;  %v8307_v47 = vld [vmem:[#allocation4 + $0x158] sm:$0xf0]  ;;  %v7504_v42 = vld [vmem:[#allocation4 + $0x138] sm:$0xf] }
 0x3b6   : > { %v3461_v23 = vadd.f32 %v10166_v62, %v3427_v51  ;;  %4271 = vst [vmem:[#allocation4 + $0x248] sm:$0xf] %v10296_v7  ;;  %5875 = vmatmul.bf16.gmra.mxu2 %v7593_v10  ;;  %v4213_v53 = vrot.slane %v4211_v14, 4  ;;  %vm10387_vm8 = vmand %vm10367_vm7, %vm3547_vm9  ;;  %v8398_v51 = vld [vmem:[%s11044_s4 + $0xd0] sm:$0xff]  ;;  %v7505_v27 = vor.u32 %v8307_v47, %v7504_v42 }
 0x3b7   : > { %4298 = vst [vmem:[#allocation4 + $0x204] sm:$0xf] %v10284_v33  ;;  %5936 = vmatmul.bf16.gmra.mxu3 %v7597_v57  ;;  %v10350_v18 = vpack.c.b16 %v3782_v11, %v3782_v11  ;;  %5963 = vmatpush.bf16.msrb.mxu1 %v8398_v51  ;;  %vm3606_vm10 = vmand %vm10367_vm7, %vm3582_vm11 }
 0x3b8   : > { %v3491_v36 = vmax.f32 %v3461_v23, 0.0  ;;  %v10344_v2 = vpop.f32.mrf.mxu1  ;;  %4355 = vst [vmem:[#allocation4 + $0x1e4] sm:$0xf] %v10302_v45 }
 0x3b9   : > { %v3380_v16 = vpop.f32.mrf.mxu0  ;;  %4391 = vst [vmem:[#allocation4 + $0x1e8] sm:$0xf] %v10296_v7  ;;  %v4056_v13 = vshll.u32 %v10350_v18, 16  ;;  %v4060_v44 = vshrl.u32 %v10350_v18, 16  ;;  %v4214_v15 = vrot.slane %v10350_v18, 5 }
 0x3ba   : > { %v3693_v28 = vsel %vm10337_vm3, %v3491_v36, 0.0  ;;  %v3381_v54 = vadd.f32 %v3380_v16, %v3297_v6  ;;  %4418 = vst [vmem:[#allocation4 + $0x1a4] sm:$0xf] %v10284_v33  ;;  %v4054_v33 = vrot.slane %v4053_v32, 4 }
 0x3bb   : > { %v3723_v52 = vpack.c.bf16 %v3693_v28, %v3693_v28  ;;  %4477 = vst [vmem:[#allocation4 + $0x184] sm:$0xf] %v10302_v45  ;;  %v8340_v35 = vld [vmem:[#allocation4 + $0x260] sm:$0xf0]  ;;  %v4058_v20 = vrot.slane %v4056_v13, 5  ;;  %v4062_v34 = vrot.slane %v4060_v44, 4  ;;  %v10374_v14 = vsel %vm9009_vm5, %v4213_v53, %v4214_v15 }
 0x3bc   : > { %v3428_v24 = vmul.f32 %v10157_v63, %v3381_v54  ;;  %4513 = vst [vmem:[#allocation4 + $0x188] sm:$0xf] %v10296_v7  ;;  %v7625_v55 = vor.u32 %v8340_v35, %v7624_v9  ;;  %v4216_v41 = vrot.slane %v4214_v15, 4  ;;  %v8336_v13 = vld [vmem:[#allocation4 + $0x244] sm:$0xf] }
 0x3bd   : > { %3859 = vst [vmem:[#allocation4 + $0x288] sm:$0xf] %v10305_v46  ;;  %v3783_v45 = vunpack.c.l.b16 %v3723_v52  ;;  %v10381_v50 = vsel %vm8727_vm2, %v4054_v33, %v4058_v20  ;;  %v4063_v59 = vor.u32 %v4062_v34, %v4058_v20  ;;  %v7632_v52 = vld [vmem:[#allocation4 + $0x248] sm:$0xf] }
 0x3be   : > { %v3462_v60 = vadd.f32 %v10166_v62, %v3428_v24  ;;  %4151 = vst [vmem:[#allocation4 + $0x268] sm:$0xf] %v10328_v21  ;;  %5818 = vmatmul.bf16.gmra.mxu1 %v7625_v55 }
 0x3bf   : > { %4272 = vst [vmem:[#allocation4 + $0x26c] sm:$0xf] %v10318_v58  ;;  %v10392_v48 = vpack.c.b16 %v3783_v45, %v3783_v45  ;;  %v4064_v6 = vrot.slane %v4063_v59, 4 }
 0x3c0   : > { %v3492_v5 = vmax.f32 %v3462_v60, 0.0  ;;  %v5789_v61 = vpop.f32.mrf.mxu1  ;;  %4299 = vst [vmem:[#allocation4 + $0x228] sm:$0xf] %v10305_v46 }
 0x3c1   : > { %v3383_v17 = vpop.f32.mrf.mxu0  ;;  %4356 = vst [vmem:[#allocation4 + $0x208] sm:$0xf] %v10328_v21  ;;  %v4066_v39 = vshll.u32 %v10392_v48, 16  ;;  %v4070_v56 = vshrl.u32 %v10392_v48, 16  ;;  %v4217_v10 = vrot.slane %v10392_v48, 5  ;;  %v5906_v23 = vpop.f32.mrf.mxu3 }
 0x3c2   : > { %v3694_v57 = vsel %vm10387_vm8, %v3492_v5, 0.0  ;;  %4392 = vst [vmem:[#allocation4 + $0x20c] sm:$0xf] %v10318_v58  ;;  %v3384_v49 = vadd.f32 %v3383_v17, %v9788_v8  ;;  %v8316_v51 = vld [vmem:[#allocation4 + $0x1a0] sm:$0xf0] }
 0x3c3   : > { %v3724_v11 = vpack.c.bf16 %v3694_v57, %v3694_v57  ;;  %4419 = vst [vmem:[#allocation4 + $0x1c8] sm:$0xf] %v10305_v46  ;;  %v4068_v36 = vrot.slane %v4066_v39, 5  ;;  %v4072_v0 = vrot.slane %v4070_v56, 4  ;;  %v10409_v32 = vsel %vm9009_vm5, %v4216_v41, %v4217_v10  ;;  %v5845_v16 = vpop.f32.mrf.mxu2 }
 0x3c4   : > { %6167 = vmatmul.bf16.gmra.mxu0 %v7505_v27  ;;  %4478 = vst [vmem:[#allocation4 + $0x1a8] sm:$0xf] %v10328_v21  ;;  %v3429_v28 = vmul.f32 %v10157_v63, %v3384_v49  ;;  %v5846_v54 = vadd.f32 %v5845_v16, %v10308_v19  ;;  %v3302_v19 = vadd.f32 %v9791_v12, %v9796_v3  ;;  %v7660_v56 = vld [vmem:[#allocation4 + $0x288] sm:$0xf] }
 0x3c5   : > { %v3784_v53 = vunpack.c.l.b16 %v3724_v11  ;;  %4514 = vst [vmem:[#allocation4 + $0x1ac] sm:$0xf] %v10318_v58  ;;  %v10417_v8 = vsel %vm8727_vm2, %v4064_v6, %v4068_v36  ;;  %v4073_v46 = vor.u32 %v4072_v0, %v4068_v36  ;;  %v7626_v44 = vld [vmem:[#allocation4 + $0x264] sm:$0xf0]  ;;  %v4219_v58 = vrot.slane %v4217_v10, 4 }
 0x3c6   : > { %3860 = vst [vmem:[#allocation4 + $0x2ac] sm:$0xf] %v10350_v18  ;;  %v8341_v21 = vld [vmem:[#allocation4 + $0x268] sm:$0xf0]  ;;  %v7629_v9 = vor.u32 %v8336_v13, %v7626_v44  ;;  %v3463_v35 = vadd.f32 %v10166_v62, %v3429_v28  ;;  %v10423_v24 = vadd.f32 %v5906_v23, %v5846_v54  ;;  %v3515_v23 = vadd.s32 8, %v9828_v31 }
 0x3c7   : > { %v10420_v15 = vpack.c.b16 %v3784_v53, %v3784_v53  ;;  %4152 = vst [vmem:[#allocation4 + $0x28c] sm:$0xf] %v10381_v50  ;;  %v7633_v33 = vor.u32 %v8341_v21, %v7632_v52  ;;  %v4074_v7 = vrot.slane %v4073_v46, 4  ;;  %v7540_v6 = vld [vmem:[#allocation4 + $0x180] sm:$0xf]  ;;  %v8405_v52 = vld [vmem:[%s11044_s4 + $0x108] sm:$0xff] }
 0x3c8   : > { %4273 = vst [vmem:[#allocation4 + $0x290] sm:$0xf] %v10374_v14  ;;  %5879 = vmatmul.bf16.gmra.mxu2 %v7629_v9  ;;  %v3493_v55 = vmax.f32 %v3463_v35, 0.0  ;;  %v10432_v60 = vpop.f32.mrf.mxu1  ;;  %vm3525_vm12 = vcmp.ge.s32.totalorder %v3515_v23, 0  ;;  %vm3535_vm13 = vcmp.lt.s32.totalorder %v3515_v23, 16 }
 0x3c9   : > { %v4076_v20 = vshll.u32 %v10420_v15, 16  ;;  %v4080_v34 = vshrl.u32 %v10420_v15, 16  ;;  %v4220_v45 = vrot.slane %v10420_v15, 5  ;;  %v3385_v47 = vpop.f32.mrf.mxu0  ;;  %4300 = vst [vmem:[#allocation4 + $0x24c] sm:$0xf] %v10350_v18  ;;  %5940 = vmatmul.bf16.gmra.mxu3 %v7633_v33  ;;  %v10435_v3 = vpop.f32.mrf.mxu3  ;;  %6025 = vmatpush.bf16.msrb.mxu2 %v8405_v52  ;;  %vm10485_vm14 = vmand %vm3525_vm12, %vm3535_vm13 }
 0x3ca   : > { %v3386_v12 = vadd.f32 %v3385_v47, %v3302_v19  ;;  %4357 = vst [vmem:[#allocation4 + $0x22c] sm:$0xf] %v10381_v50  ;;  %v3695_v61 = vsel %vm10367_vm7, %v3493_v55, 0.0  ;;  %vm3574_vm15 = vmand %vm10485_vm14, %vm3547_vm9 }
 0x3cb   : > { %v4078_v59 = vrot.slane %v4076_v20, 5  ;;  %v10440_v5 = vsel %vm9009_vm5, %v4219_v58, %v4220_v45  ;;  %4393 = vst [vmem:[#allocation4 + $0x230] sm:$0xf] %v10374_v14  ;;  %v10446_v41 = vpop.f32.mrf.mxu2  ;;  %v4082_v27 = vrot.slane %v4080_v34, 4  ;;  %v3725_v39 = vpack.c.bf16 %v3695_v61, %v3695_v61  ;;  %v8419_v34 = vld [vmem:[%s11044_s4 + $0x178] sm:$0xff]  ;;  %vm10584_vm0 = vmand %vm10485_vm14, %vm3582_vm11 }
 0x3cc   : > { %v3430_v42 = vmul.f32 %v10157_v63, %v3386_v12  ;;  %4420 = vst [vmem:[#allocation4 + $0x1ec] sm:$0xf] %v10350_v18  ;;  %v4222_v36 = vrot.slane %v4220_v45, 4  ;;  %6080 = vmatpush.bf16.msra.mxu3 %v8419_v34 }
 0x3cd   : > { %v10451_v17 = vsel %vm8727_vm2, %v4074_v7, %v4078_v59  ;;  %4479 = vst [vmem:[#allocation4 + $0x1cc] sm:$0xf] %v10381_v50  ;;  %v8349_v10 = vld [vmem:[#allocation4 + $0x2a8] sm:$0xf0]  ;;  %v3785_v11 = vunpack.c.l.b16 %v3725_v39  ;;  %v4083_v50 = vor.u32 %v4082_v27, %v4078_v59 }
 0x3ce   : > { %v3464_v57 = vadd.f32 %v10166_v62, %v3430_v42  ;;  %4515 = vst [vmem:[#allocation4 + $0x1d0] sm:$0xf] %v10374_v14  ;;  %v7661_v49 = vor.u32 %v8349_v10, %v7660_v56  ;;  %v7541_v14 = vor.u32 %v8316_v51, %v7540_v6  ;;  %v8345_v7 = vld [vmem:[#allocation4 + $0x28c] sm:$0xf] }
 0x3cf   : > { %3861 = vst [vmem:[#allocation4 + $0x2d0] sm:$0xf] %v10392_v48  ;;  %v10463_v0 = vpack.c.b16 %v3785_v11, %v3785_v11  ;;  %v4084_v9 = vrot.slane %v4083_v50, 4  ;;  %v7668_v12 = vld [vmem:[#allocation4 + $0x290] sm:$0xf] }
 0x3d0   : > { %v3494_v18 = vmax.f32 %v3464_v57, 0.0  ;;  %4153 = vst [vmem:[#allocation4 + $0x2b0] sm:$0xf] %v10417_v8  ;;  %5822 = vmatmul.bf16.gmra.mxu1 %v7661_v49  ;;  %v10471_v44 = vpop.f32.mrf.mxu1 }
 0x3d1   : > { %v3388_v16 = vpop.f32.mrf.mxu0  ;;  %4274 = vst [vmem:[#allocation4 + $0x2b4] sm:$0xf] %v10409_v32  ;;  %v4086_v30 = vshll.u32 %v10463_v0, 16  ;;  %v4090_v54 = vshrl.u32 %v10463_v0, 16  ;;  %v4223_v46 = vrot.slane %v10463_v0, 5  ;;  %v5911_v21 = vpop.f32.mrf.mxu3 }
 0x3d2   : > { %v3696_v53 = vsel %vm3606_vm10, %v3494_v18, 0.0  ;;  %v3389_v28 = vadd.f32 %v3388_v16, %v9802_v26  ;;  %4301 = vst [vmem:[#allocation4 + $0x270] sm:$0xf] %v10392_v48 }
 0x3d3   : > { %v3726_v13 = vpack.c.bf16 %v3696_v53, %v3696_v53  ;;  %4358 = vst [vmem:[#allocation4 + $0x250] sm:$0xf] %v10417_v8  ;;  %v4088_v35 = vrot.slane %v4086_v30, 5  ;;  %v4092_v19 = vrot.slane %v4090_v54, 4  ;;  %v10481_v58 = vsel %vm9009_vm5, %v4222_v36, %v4223_v46  ;;  %v5850_v20 = vpop.f32.mrf.mxu2  ;;  %v8417_v54 = vld [vmem:[%s11044_s4 + $0x168] sm:$0xff] }
 0x3d4   : > { %v3431_v26 = vmul.f32 %v10157_v63, %v3389_v28  ;;  %6171 = vmatmul.bf16.gmra.mxu0 %v7541_v14  ;;  %4394 = vst [vmem:[#allocation4 + $0x254] sm:$0xf] %v10409_v32  ;;  %v8325_v21 = vld [vmem:[#allocation4 + $0x1e8] sm:$0xf0] }
 0x3d5   : > { %4421 = vst [vmem:[#allocation4 + $0x210] sm:$0xf] %v10392_v48  ;;  %v3786_v45 = vunpack.c.l.b16 %v3726_v13  ;;  %v10497_v47 = vsel %vm8727_vm2, %v4084_v9, %v4088_v35  ;;  %v4093_v59 = vor.u32 %v4092_v19, %v4088_v35  ;;  %v3307_v48 = vadd.f32 %v9808_v22, %v9810_v1  ;;  %v8397_v1 = vld [vmem:[%s11044_s4 + $0xc8] sm:$0xff] }
 0x3d6   : > { %v3465_v55 = vadd.f32 %v10166_v62, %v3431_v26  ;;  %4480 = vst [vmem:[#allocation4 + $0x1f0] sm:$0xf] %v10417_v8  ;;  %v4225_v8 = vrot.slane %v4223_v46, 4  ;;  %5964 = vmatpush.bf16.msrb.mxu1 %v8397_v1  ;;  %v7696_v26 = vld [vmem:[#allocation4 + $0x2d0] sm:$0xf] }
 0x3d7   : > { %4516 = vst [vmem:[#allocation4 + $0x1f4] sm:$0xf] %v10409_v32  ;;  %v10500_v61 = vpack.c.b16 %v3786_v45, %v3786_v45  ;;  %v7662_v42 = vld [vmem:[#allocation4 + $0x2ac] sm:$0xf0]  ;;  %v8418_v32 = vld [vmem:[%s11044_s4 + $0x170] sm:$0xff]  ;;  %v4094_v50 = vrot.slane %v4093_v59, 4 }
 0x3d8   : > { %v3495_v51 = vmax.f32 %v3465_v55, 0.0  ;;  %3862 = vst [vmem:[#allocation4 + $0x2f4] sm:$0xf] %v10420_v15  ;;  %v8350_v27 = vld [vmem:[#allocation4 + $0x2b0] sm:$0xf0]  ;;  %v7665_v39 = vor.u32 %v8345_v7, %v7662_v42  ;;  %v5795_v49 = vpop.f32.mrf.mxu1  ;;  %6081 = vmatpush.bf16.msra.mxu3 %v8418_v32 }
 0x3d9   : > { %v3390_v56 = vpop.f32.mrf.mxu0  ;;  %4154 = vst [vmem:[#allocation4 + $0x2d4] sm:$0xf] %v10451_v17  ;;  %v4096_v10 = vshll.u32 %v10500_v61, 16  ;;  %v4100_v57 = vshrl.u32 %v10500_v61, 16  ;;  %v4226_v23 = vrot.slane %v10500_v61, 5  ;;  %v7669_v11 = vor.u32 %v8350_v27, %v7668_v12  ;;  %v10520_v6 = vpop.f32.mrf.mxu3  ;;  %v11157_v7 = vld [vmem:[#allocation16_spill] sm:$0xff] }
 0x3da   : > { %4275 = vst [vmem:[#allocation4 + $0x2d8] sm:$0xf] %v10440_v5  ;;  %5883 = vmatmul.bf16.gmra.mxu2 %v7665_v39  ;;  %v3697_v22 = vsel %vm3574_vm15, %v3495_v51, 0.0  ;;  %v3391_v18 = vadd.f32 %v3390_v56, %v3307_v48  ;;  %v7576_v55 = vld [vmem:[#allocation4 + $0x1c8] sm:$0xf] }
 0x3db   : > { %4302 = vst [vmem:[#allocation4 + $0x294] sm:$0xf] %v10420_v15  ;;  %v4098_v36 = vrot.slane %v4096_v10, 5  ;;  %v10525_v16 = vsel %vm9009_vm5, %v4225_v8, %v4226_v23  ;;  %5944 = vmatmul.bf16.gmra.mxu3 %v7669_v11  ;;  %v4102_v14 = vrot.slane %v4100_v57, 4  ;;  %v3727_v53 = vpack.c.bf16 %v3697_v22, %v3697_v22  ;;  %v10529_v30 = vpop.f32.mrf.mxu2  ;;  %v8415_v22 = vld [vmem:[%s11044_s4 + $0x158] sm:$0xff] }
 0x3dc   : > { %4359 = vst [vmem:[#allocation4 + $0x274] sm:$0xf] %v10451_v17  ;;  %v3432_v28 = vmul.f32 %v10157_v63, %v3391_v18  ;;  %6082 = vmatpush.bf16.msra.mxu3 %v8417_v54  ;;  %v4228_v12 = vrot.slane %v4226_v23, 4  ;;  %v7577_v59 = vor.u32 %v8325_v21, %v7576_v55  ;;  %v3516_v18 = vadd.s32 9, %v9828_v31  ;;  %v8404_v31 = vld [vmem:[%s11044_s4 + $0x100] sm:$0xff]  ;;  %v8414_v54 = vld [vmem:[%s11044_s4 + $0x150] sm:$0xff] }
 0x3dd   : > { %4395 = vst [vmem:[#allocation4 + $0x278] sm:$0xf] %v10440_v5  ;;  %v10537_v46 = vsel %vm8727_vm2, %v4094_v50, %v4098_v36  ;;  %v3787_v13 = vunpack.c.l.b16 %v3727_v53  ;;  %v4103_v35 = vor.u32 %v4102_v14, %v4098_v36  ;;  %v8396_v50 = vld [vmem:[%s11044_s4 + $0xc0] sm:$0xff]  ;;  %6026 = vmatpush.bf16.msrb.mxu2 %v8404_v31 }
 0x3de   : > { %4422 = vst [vmem:[#allocation4 + $0x234] sm:$0xf] %v10420_v15  ;;  %v3466_v52 = vadd.f32 %v10166_v62, %v3432_v28  ;;  %v8416_v15 = vld [vmem:[%s11044_s4 + $0x160] sm:$0xff]  ;;  %5965 = vmatpush.bf16.msrb.mxu1 %v8396_v50  ;;  %vm3526_vm1 = vcmp.ge.s32.totalorder %v3516_v18, 0  ;;  %vm3536_vm3 = vcmp.lt.s32.totalorder %v3516_v18, 16 }
 0x3df   : > { %4481 = vst [vmem:[#allocation4 + $0x214] sm:$0xf] %v10451_v17  ;;  %v8358_v9 = vld [vmem:[#allocation4 + $0x2f0] sm:$0xf0]  ;;  %v10543_v19 = vpack.c.b16 %v3787_v13, %v3787_v13  ;;  %v4104_v32 = vrot.slane %v4103_v35, 4  ;;  %vm10632_vm4 = vmand %vm3526_vm1, %vm3536_vm3 }
 0x3e0   : > { %4517 = vst [vmem:[#allocation4 + $0x218] sm:$0xf] %v10440_v5  ;;  %v7697_v20 = vor.u32 %v8358_v9, %v7696_v26  ;;  %v3496_v34 = vmax.f32 %v3466_v52, 0.0  ;;  %6083 = vmatpush.bf16.msra.mxu3 %v8416_v15  ;;  %v8354_v26 = vld [vmem:[#allocation4 + $0x2d4] sm:$0xf]  ;;  %vm10656_vm6 = vmand %vm10632_vm4, %vm3547_vm9 }
 0x3e1   : > { %v3393_v45 = vpop.f32.mrf.mxu0  ;;  %3863 = vst [vmem:[#allocation4 + $0x318] sm:$0xf] %v10463_v0  ;;  %v4106_v5 = vshll.u32 %v10543_v19, 16  ;;  %v4229_v42 = vrot.slane %v10543_v19, 5  ;;  %v4309_v51 = vshrl.u32 %v10543_v19, 16  ;;  %v5915_v8 = vpop.f32.mrf.mxu3  ;;  %vm10734_vm9 = vmand %vm10632_vm4, %vm3582_vm11 }
 0x3e2   : > { %v3394_v17 = vadd.f32 %v3393_v45, %v11157_v7  ;;  %4155 = vst [vmem:[#allocation4 + $0x2f8] sm:$0xf] %v10497_v47  ;;  %5827 = vmatmul.bf16.gmra.mxu1 %v7697_v20  ;;  %v3698_v48 = vsel %vm10485_vm14, %v3496_v34, 0.0  ;;  %v11160_v45 = vld [vmem:[#allocation17_spill] sm:$0xff] }
 0x3e3   : > { %4276 = vst [vmem:[#allocation4 + $0x2fc] sm:$0xf] %v10481_v58  ;;  %v3728_v27 = vpack.c.bf16 %v3698_v48, %v3698_v48  ;;  %v10557_v39 = vpop.f32.mrf.mxu1  ;;  %v4108_v10 = vrot.slane %v4106_v5, 5  ;;  %v10563_v57 = vsel %vm9009_vm5, %v4228_v12, %v4229_v42  ;;  %v4311_v23 = vrot.slane %v4309_v51, 4  ;;  %v5854_v11 = vpop.f32.mrf.mxu2  ;;  %v10619_v48 = vld [vmem:[%s11042_s2] ss:$0 sm:$0xff] }
 0x3e4   : > { %v3433_v56 = vmul.f32 %v10157_v63, %v3394_v17  ;;  %6175 = vmatmul.bf16.gmra.mxu0 %v7577_v59  ;;  %4303 = vst [vmem:[#allocation4 + $0x2b8] sm:$0xf] %v10463_v0  ;;  %v5855_v49 = vadd.f32 %v5854_v11, %v10471_v44  ;;  %6084 = vmatpush.bf16.msra.mxu3 %v8415_v22  ;;  %v4366_v28 = vrot.slane %v4229_v42, 4  ;;  %v10642_v22 = vld [vmem:[%s11043_s3] ss:$0 sm:$0xff] }
 0x3e5   : > { %4360 = vst [vmem:[#allocation4 + $0x298] sm:$0xf] %v10497_v47  ;;  %v3788_v1 = vunpack.c.l.b16 %v3728_v27  ;;  %v10578_v36 = vsel %vm8727_vm2, %v4104_v32, %v4108_v10  ;;  %v4312_v44 = vor.u32 %v4311_v23, %v4108_v10 }
 0x3e6   : > { %v3467_v63 = vadd.f32 %v10166_v62, %v3433_v56  ;;  %4396 = vst [vmem:[#allocation4 + $0x29c] sm:$0xf] %v10481_v58  ;;  %v10598_v13 = vadd.f32 %v5915_v8, %v5855_v49  ;;  %v8413_v56 = vld [vmem:[%s11044_s4 + $0x148] sm:$0xff]  ;;  %v7612_v62 = vld [vmem:[#allocation4 + $0x210] sm:$0xf] }
 0x3e7   : > { %4423 = vst [vmem:[#allocation4 + $0x258] sm:$0xf] %v10463_v0  ;;  %v10592_v14 = vpack.c.b16 %v3788_v1, %v3788_v1  ;;  %v11163_v49 = vld [vmem:[#allocation24_spill] sm:$0xff] }
 0x3e8   : > { %v3497_v53 = vmax.f32 %v3467_v63, 0.0  ;;  %4482 = vst [vmem:[#allocation4 + $0x238] sm:$0xf] %v10497_v47  ;;  %v7704_v47 = vld [vmem:[#allocation4 + $0x2d8] sm:$0xf]  ;;  %6085 = vmatpush.bf16.msra.mxu3 %v8414_v54  ;;  %v3149_v18 = vadd.f32 %v10281_v40, %v11163_v49 }
 0x3e9   : > { %v3395_v33 = vpop.f32.mrf.mxu0  ;;  %4518 = vst [vmem:[#allocation4 + $0x23c] sm:$0xf] %v10481_v58  ;;  %v4315_v0 = vshll.u32 %v10592_v14, 16  ;;  %v4319_v52 = vshrl.u32 %v10592_v14, 16  ;;  %v4367_v21 = vrot.slane %v10592_v14, 5  ;;  %v5917_v15 = vpop.f32.mrf.mxu3  ;;  %v4313_v58 = vrot.slane %v4312_v44, 4 }
 0x3ea   : > { %v3699_v9 = vsel %vm10584_vm0, %v3497_v53, 0.0  ;;  %3864 = vst [vmem:[#allocation4 + $0x33c] sm:$0xf] %v10500_v61  ;;  %v8359_v35 = vld [vmem:[#allocation4 + $0x2f8] sm:$0xf0]  ;;  %v3396_v55 = vadd.f32 %v3395_v33, %v11160_v45 }
 0x3eb   : > { %v7698_v20 = vld [vmem:[#allocation4 + $0x2f4] sm:$0xf0]  ;;  %v3729_v34 = vpack.c.bf16 %v3699_v9, %v3699_v9  ;;  %4156 = vst [vmem:[#allocation4 + $0x31c] sm:$0xf] %v10537_v46  ;;  %v4317_v12 = vrot.slane %v4315_v0, 5  ;;  %v4321_v7 = vrot.slane %v4319_v52, 4  ;;  %v10611_v17 = vsel %vm9009_vm5, %v4366_v28, %v4367_v21  ;;  %v10613_v59 = vpop.f32.mrf.mxu1  ;;  %v5856_v27 = vpop.f32.mrf.mxu2 }
 0x3ec   : > { %4277 = vst [vmem:[#allocation4 + $0x320] sm:$0xf] %v10525_v16  ;;  %v7705_v5 = vor.u32 %v8359_v35, %v7704_v47  ;;  %v7701_v42 = vor.u32 %v8354_v26, %v7698_v20  ;;  %v3434_v8 = vmul.f32 %v10619_v48, %v3396_v55  ;;  %v8334_v63 = vld [vmem:[#allocation4 + $0x230] sm:$0xf0]  ;;  %v4369_v50 = vrot.slane %v4367_v21, 4  ;;  %6086 = vmatpush.bf16.msra.mxu3 %v8413_v56  ;;  %v8412_v21 = vld [vmem:[%s11044_s4 + $0x140] sm:$0xff] }
 0x3ed   : > { %v3789_v51 = vunpack.c.l.b16 %v3729_v34  ;;  %4304 = vst [vmem:[#allocation4 + $0x2dc] sm:$0xf] %v10500_v61  ;;  %v10628_v32 = vsel %vm8727_vm2, %v4313_v58, %v4317_v12  ;;  %v4322_v23 = vor.u32 %v4321_v7, %v4317_v12  ;;  %v7613_v52 = vor.u32 %v8334_v63, %v7612_v62  ;;  %v7732_v9 = vld [vmem:[#allocation4 + $0x318] sm:$0xf] }
 0x3ee   : > { %4361 = vst [vmem:[#allocation4 + $0x2bc] sm:$0xf] %v10537_v46  ;;  %5949 = vmatmul.bf16.gmra.mxu3 %v7705_v5  ;;  %5888 = vmatmul.bf16.gmra.mxu2 %v7701_v42  ;;  %v3468_v1 = vadd.f32 %v10642_v22, %v3434_v8  ;;  %v8435_v42 = vld [vmem:[%s11044_s4 + $0x1f8] sm:$0xff] }
 0x3ef   : > { %v10637_v11 = vpack.c.b16 %v3789_v51, %v3789_v51  ;;  %4397 = vst [vmem:[#allocation4 + $0x2c0] sm:$0xf] %v10525_v16  ;;  %v4323_v29 = vrot.slane %v4322_v23, 4  ;;  %v8518_v8 = vld [vmem:[%s11044_s4 + $0x1b8] sm:$0xff]  ;;  %6202 = vmatpush.bf16.msra.mxu1 %v8435_v42 }
 0x3f0   : > { %4424 = vst [vmem:[#allocation4 + $0x27c] sm:$0xf] %v10500_v61  ;;  %v3498_v28 = vmax.f32 %v3468_v1, 0.0  ;;  %v11166_v61 = vld [vmem:[#allocation23_spill] sm:$0xff]  ;;  %6087 = vmatpush.bf16.msra.mxu3 %v8412_v21 }
 0x3f1   : > { %v4325_v31 = vshll.u32 %v10637_v11, 16  ;;  %v4329_v44 = vshrl.u32 %v10637_v11, 16  ;;  %v4370_v53 = vrot.slane %v10637_v11, 5  ;;  %v3398_v33 = vpop.f32.mrf.mxu0  ;;  %4483 = vst [vmem:[#allocation4 + $0x25c] sm:$0xf] %v10537_v46  ;;  %v5919_v35 = vpop.f32.mrf.mxu3  ;;  %v3233_v46 = vadd.f32 %v10361_v4, %v3149_v18 }
 0x3f2   : > { %v8367_v54 = vld [vmem:[#allocation4 + $0x338] sm:$0xf0]  ;;  %v3399_v0 = vadd.f32 %v3398_v33, %v11166_v61  ;;  %4519 = vst [vmem:[#allocation4 + $0x260] sm:$0xf] %v10525_v16  ;;  %v3700_v34 = vsel %vm10656_vm6, %v3498_v28, 0.0  ;;  %v8443_v16 = vld [vmem:[%s11044_s4 + $0x238] sm:$0xff] }
 0x3f3   : > { %v4327_v47 = vrot.slane %v4325_v31, 5  ;;  %v10668_v26 = vsel %vm9009_vm5, %v4369_v50, %v4370_v53  ;;  %4157 = vst [vmem:[#allocation4 + $0x340] sm:$0xf] %v10578_v36  ;;  %v7733_v20 = vor.u32 %v8367_v54, %v7732_v9  ;;  %v4331_v4 = vrot.slane %v4329_v44, 4  ;;  %v5802_v58 = vpop.f32.mrf.mxu1  ;;  %v5858_v12 = vpop.f32.mrf.mxu2  ;;  %6263 = vmatpush.bf16.msra.mxu2 %v8443_v16  ;;  %v8363_v44 = vld [vmem:[#allocation4 + $0x31c] sm:$0xf] }
 0x3f4   : > { %v3435_v45 = vmul.f32 %v10619_v48, %v3399_v0  ;;  %6180 = vmatmul.bf16.gmra.mxu0 %v7613_v52  ;;  %4278 = vst [vmem:[#allocation4 + $0x344] sm:$0xf] %v10563_v57  ;;  %v3730_v15 = vpack.c.bf16 %v3700_v34, %v3700_v34  ;;  %v5859_v5 = vadd.f32 %v5858_v12, %v10557_v39  ;;  %v4372_v49 = vrot.slane %v4370_v53, 4  ;;  %v7346_v34 = vld [vmem:[#allocation4 + $0x2c] sm:$0xf0] }
 0x3f5   : > { %v10681_v55 = vsel %vm8727_vm2, %v4323_v29, %v4327_v47  ;;  %4305 = vst [vmem:[#allocation4 + $0x300] sm:$0xf] %v10543_v19  ;;  %5831 = vmatmul.bf16.gmra.mxu1 %v7733_v20  ;;  %8460 = vmatpush.bf16.msrb.mxu3 %v8518_v8  ;;  %v3317_v27 = vadd.f32 %v10352_v43, %v3233_v46  ;;  %v8265_v58 = vld [vmem:[#allocation4 + $0xc] sm:$0xf]  ;;  %v4432_v12 = vunpack.c.l.b16 %v8568_v37  ;;  %v8523_v37 = vld [vmem:[%s11044_s4 + $0x190] sm:$0xff] }
 0x3f6   : > { %v3469_v7 = vadd.f32 %v10642_v22, %v3435_v45  ;;  %4362 = vst [vmem:[#allocation4 + $0x2e0] sm:$0xf] %v10578_v36  ;;  %v3790_v51 = vunpack.c.l.b16 %v3730_v15  ;;  %v10695_v39 = vadd.f32 %v5919_v35, %v5859_v5  ;;  %v4332_v23 = vor.u32 %v4331_v4, %v4327_v47  ;;  %v7648_v4 = vld [vmem:[#allocation4 + $0x258] sm:$0xf] }
 0x3f7   : > { %4398 = vst [vmem:[#allocation4 + $0x2e4] sm:$0xf] %v10563_v57  ;;  %v8343_v46 = vld [vmem:[#allocation4 + $0x278] sm:$0xf0]  ;;  %v7349_v8 = vor.u32 %v8265_v58, %v7346_v34  ;;  %v7352_v58 = vld [vmem:[#allocation4 + $0x10] sm:$0xf] }
 0x3f8   : > { %v3499_v56 = vmax.f32 %v3469_v7, 0.0  ;;  %4425 = vst [vmem:[#allocation4 + $0x2a0] sm:$0xf] %v10543_v19  ;;  %v10698_v1 = vpack.c.b16 %v3790_v51, %v3790_v51  ;;  %v7740_v19 = vld [vmem:[#allocation4 + $0x320] sm:$0xf]  ;;  %v4333_v54 = vrot.slane %v4332_v23, 4  ;;  %v7649_v7 = vor.u32 %v8343_v46, %v7648_v4 }
 0x3f9   : > { %v3400_v63 = vpop.f32.mrf.mxu0  ;;  %4484 = vst [vmem:[#allocation4 + $0x280] sm:$0xf] %v10578_v36  ;;  %v10707_v40 = vpop.f32.mrf.mxu3  ;;  %v8519_v36 = vld [vmem:[%s11044_s4 + $0x1b0] sm:$0xff] }
 0x3fa   : > { %v3701_v18 = vsel %vm10632_vm4, %v3499_v56, 0.0  ;;  %v3401_v50 = vadd.f32 %v3400_v63, %v3317_v27  ;;  %4520 = vst [vmem:[#allocation4 + $0x284] sm:$0xf] %v10563_v57  ;;  %v4335_v43 = vshll.u32 %v10698_v1, 16  ;;  %v4373_v62 = vrot.slane %v10698_v1, 5  ;;  %8461 = vmatpush.bf16.msrb.mxu3 %v8519_v36 }
 0x3fb   : > { %v4434_v31 = vshrl.u32 %v10698_v1, 16  ;;  %v3731_v28 = vpack.c.bf16 %v3701_v18, %v3701_v18  ;;  %4306 = vst [vmem:[#allocation4 + $0x324] sm:$0xf] %v10592_v14  ;;  %v8368_v53 = vld [vmem:[#allocation4 + $0x340] sm:$0xf0]  ;;  %v10719_v21 = vpop.f32.mrf.mxu1  ;;  %v10721_v29 = vpop.f32.mrf.mxu2 }
 0x3fc   : > { %v7734_v57 = vld [vmem:[#allocation4 + $0x33c] sm:$0xf0]  ;;  %v3436_v33 = vmul.f32 %v10619_v48, %v3401_v50  ;;  %4363 = vst [vmem:[#allocation4 + $0x304] sm:$0xf] %v10628_v32  ;;  %v4337_v61 = vrot.slane %v4335_v43, 5  ;;  %v10717_v0 = vsel %vm9009_vm5, %v4372_v49, %v4373_v62  ;;  %v7741_v47 = vor.u32 %v8368_v53, %v7740_v19 }
 0x3fd   : > { %v4436_v52 = vrot.slane %v4434_v31, 4  ;;  %4399 = vst [vmem:[#allocation4 + $0x308] sm:$0xf] %v10611_v17  ;;  %v7737_v9 = vor.u32 %v8363_v44, %v7734_v57  ;;  %v3791_v35 = vunpack.c.l.b16 %v3731_v28  ;;  %v4491_v15 = vrot.slane %v4373_v62, 4  ;;  %v8521_v62 = vld [vmem:[%s11044_s4 + $0x1a0] sm:$0xff]  ;;  %v8434_v28 = vld [vmem:[%s11044_s4 + $0x1f0] sm:$0xff] }
 0x3fe   : > { %v3470_v48 = vadd.f32 %v10642_v22, %v3436_v33  ;;  %4426 = vst [vmem:[#allocation4 + $0x2c4] sm:$0xf] %v10592_v14  ;;  %v10728_v20 = vsel %vm8727_vm2, %v4333_v54, %v4337_v61  ;;  %5953 = vmatmul.bf16.gmra.mxu3 %v7741_v47  ;;  %v4433_v19 = vpack.c.b16 %v4432_v12, %v4432_v12  ;;  %v8522_v47 = vld [vmem:[%s11044_s4 + $0x198] sm:$0xff] }
 0x3ff   : > { %4485 = vst [vmem:[#allocation4 + $0x2a4] sm:$0xf] %v10628_v32  ;;  %v4437_v16 = vor.u32 %v4436_v52, %v4337_v61  ;;  %5892 = vmatmul.bf16.gmra.mxu2 %v7737_v9  ;;  %v10739_v22 = vpack.c.b16 %v3791_v35, %v3791_v35  ;;  %v8520_v32 = vld [vmem:[%s11044_s4 + $0x1a8] sm:$0xff]  ;;  %6203 = vmatpush.bf16.msra.mxu1 %v8434_v28  ;;  %v8279_v28 = vld [vmem:[#allocation4 + $0x78] sm:$0xf0] }
 0x400   : > { %v3500_v14 = vmax.f32 %v3470_v48, 0.0  ;;  %4521 = vst [vmem:[#allocation4 + $0x2a8] sm:$0xf] %v10611_v17  ;;  %8462 = vmatpush.bf16.msrb.mxu3 %v8520_v32  ;;  %v8270_v9 = vld [vmem:[#allocation4 + $0x30] sm:$0xf0]  ;;  %v4498_v45 = vrot.slane %v4433_v19, 5 }
 0x401   : > { %v10742_v10 = vpop.f32.mrf.mxu0  ;;  %4307 = vst [vmem:[#allocation4 + $0x348] sm:$0xf] %v10637_v11  ;;  %v4440_v5 = vshll.u32 %v10739_v22, 16  ;;  %v4444_v42 = vshrl.u32 %v10739_v22, 16  ;;  %v4492_v17 = vrot.slane %v10739_v22, 5  ;;  %v4438_v56 = vrot.slane %v4437_v16, 4 }
 0x402   : > { %v3702_v51 = vsel %vm10734_vm9, %v3500_v14, 0.0  ;;  %4364 = vst [vmem:[#allocation4 + $0x328] sm:$0xf] %v10681_v55  ;;  %v8266_v16 = vld [vmem:[#allocation4 + $0x14] sm:$0xf] }
 0x403   : > { %v3732_v27 = vpack.c.bf16 %v3702_v51, %v3702_v51  ;;  %4400 = vst [vmem:[#allocation4 + $0x32c] sm:$0xf] %v10668_v26  ;;  %v4442_v23 = vrot.slane %v4440_v5, 5  ;;  %v4446_v63 = vrot.slane %v4444_v42, 4  ;;  %v4493_v49 = vsel %vm9009_vm5, %v4491_v15, %v4492_v17  ;;  %v5924_v18 = vpop.f32.mrf.mxu3 }
 0x404   : > { %6184 = vmatmul.bf16.gmra.mxu0 %v7649_v7  ;;  %4427 = vst [vmem:[#allocation4 + $0x2e8] sm:$0xf] %v10637_v11  ;;  %v5863_v43 = vpop.f32.mrf.mxu2  ;;  %8463 = vmatpush.bf16.msrb.mxu3 %v8521_v62  ;;  %v8442_v11 = vld [vmem:[%s11044_s4 + $0x230] sm:$0xff]  ;;  %v4494_v57 = vrot.slane %v4492_v17, 4 }
 0x405   : > { %v3792_v50 = vunpack.c.l.b16 %v3732_v27  ;;  %4486 = vst [vmem:[#allocation4 + $0x2c8] sm:$0xf] %v10681_v55  ;;  %v4443_v31 = vsel %vm8727_vm2, %v4438_v56, %v4442_v23  ;;  %5966 = vmatmul.bf16.vlgmr.msrb.gmra.mxu1 %v7349_v8  ;;  %v10764_v44 = vpop.f32.mrf.mxu1  ;;  %v4447_v36 = vor.u32 %v4446_v63, %v4442_v23  ;;  %v4460_v55 = vshll.u32 %v4433_v19, 16  ;;  %6264 = vmatpush.bf16.msra.mxu2 %v8442_v11  ;;  %v8352_v42 = vld [vmem:[#allocation4 + $0x2c0] sm:$0xf0] }
 0x406   : > { %4522 = vst [vmem:[#allocation4 + $0x2cc] sm:$0xf] %v10668_v26  ;;  %v7354_v26 = vld [vmem:[#allocation4 + $0x34] sm:$0xf0]  ;;  %v7684_v23 = vld [vmem:[#allocation4 + $0x2a0] sm:$0xf] }
 0x407   : > { %v4403_v53 = vpack.c.b16 %v3792_v50, %v3792_v50  ;;  %4365 = vst [vmem:[#allocation4 + $0x34c] sm:$0xf] %v10728_v20  ;;  %v4448_v35 = vrot.slane %v4447_v36, 4  ;;  %v4462_v4 = vrot.slane %v4460_v55, 5  ;;  %v7357_v12 = vor.u32 %v8266_v16, %v7354_v26  ;;  %v7382_v27 = vld [vmem:[#allocation4 + $0x74] sm:$0xf0] }
 0x408   : > { %4401 = vst [vmem:[#allocation4 + $0x350] sm:$0xf] %v10717_v0  ;;  %8464 = vmatpush.bf16.msrb.mxu3 %v8522_v47  ;;  %v7685_v63 = vor.u32 %v8352_v42, %v7684_v23  ;;  %v7390_v11 = vld [vmem:[#allocation4 + $0x7c] sm:$0xf0]  ;;  %v8275_v36 = vld [vmem:[#allocation4 + $0x5c] sm:$0xf] }
 0x409   : > { %v4450_v33 = vshll.u32 %v4403_v53, 16  ;;  %v4454_v54 = vshrl.u32 %v4403_v53, 16  ;;  %v4495_v61 = vrot.slane %v4403_v53, 5  ;;  %v10775_v52 = vpop.f32.mrf.mxu0  ;;  %4428 = vst [vmem:[#allocation4 + $0x30c] sm:$0xf] %v10698_v1  ;;  %v7393_v55 = vor.u32 %v8275_v36, %v7390_v11 }
 0x40a   : > { %4487 = vst [vmem:[#allocation4 + $0x2ec] sm:$0xf] %v10728_v20  ;;  %v7418_v47 = vld [vmem:[#allocation4 + $0xbc] sm:$0xf0] }
 0x40b   : > { %v4452_v48 = vrot.slane %v4450_v33, 5  ;;  %v4456_v46 = vrot.slane %v4454_v54, 4  ;;  %v4496_v34 = vsel %vm9009_vm5, %v4494_v57, %v4495_v61  ;;  %4523 = vst [vmem:[#allocation4 + $0x2f0] sm:$0xf] %v10717_v0  ;;  %v4497_v15 = vrot.slane %v4495_v61, 4  ;;  %v5925_v32 = vpop.f32.mrf.mxu3 }
 0x40c   : > { %4429 = vst [vmem:[#allocation4 + $0x330] sm:$0xf] %v10739_v22  ;;  %v5864_v20 = vpop.f32.mrf.mxu2  ;;  %8465 = vmatpush.bf16.msrb.mxu3 %v8523_v37  ;;  %v7353_v0 = vor.u32 %v8270_v9, %v7352_v58  ;;  %v7720_v9 = vld [vmem:[#allocation4 + $0x2e8] sm:$0xf] }
 0x40d   : > { %v4453_v14 = vsel %vm8727_vm2, %v4448_v35, %v4452_v48  ;;  %v4457_v1 = vor.u32 %v4456_v46, %v4452_v48  ;;  %4488 = vst [vmem:[#allocation4 + $0x310] sm:$0xf] %v4443_v31  ;;  %v5808_v7 = vpop.f32.mrf.mxu1  ;;  %v5865_v22 = vadd.f32 %v5864_v20, %v10719_v21  ;;  %v4499_v8 = vsel %vm9009_vm5, %v4497_v15, %v4498_v45  ;;  %v8524_v21 = vld [vmem:[%s11044_s4 + $0x188] sm:$0xff]  ;;  %v8283_v46 = vld [vmem:[#allocation4 + $0x9c] sm:$0xf] }
 0x40e   : > { %4524 = vst [vmem:[#allocation4 + $0x314] sm:$0xf] %v4493_v49  ;;  %6088 = vmatmul.bf16.vlgmr.msra.gmra.mxu3 %v7357_v12  ;;  %v8274_v49 = vld [vmem:[#allocation4 + $0x54] sm:$0xf]  ;;  %v8288_v15 = vld [vmem:[#allocation4 + $0xc0] sm:$0xf0] }
 0x40f   : > { %v4458_v5 = vrot.slane %v4457_v1, 4  ;;  %4430 = vst [vmem:[#allocation4 + $0x354] sm:$0xf] %v4403_v53  ;;  %6027 = vmatmul.bf16.vlgmr.msrb.gmra.mxu2 %v7353_v0  ;;  %v10792_v17 = vadd.f32 %v5925_v32, %v5865_v22  ;;  %v7385_v18 = vor.u32 %v8274_v49, %v7382_v27  ;;  %v7388_v53 = vld [vmem:[#allocation4 + $0x58] sm:$0xf]  ;;  %v8432_v49 = vld [vmem:[%s11044_s4 + $0x1e0] sm:$0xff] }
 0x410   : > { %4489 = vst [vmem:[#allocation4 + $0x334] sm:$0xf] %v4453_v14  ;;  %8466 = vmatpush.bf16.msrb.mxu3 %v8524_v21  ;;  %v7389_v57 = vor.u32 %v8279_v28, %v7388_v53  ;;  %v8361_v54 = vld [vmem:[#allocation4 + $0x308] sm:$0xf0]  ;;  %v8433_v45 = vld [vmem:[%s11044_s4 + $0x1e8] sm:$0xff] }
 0x411   : > { %v4463_v51 = vsel %vm8727_vm2, %v4458_v5, %v4462_v4  ;;  %v6155_v56 = vpop.f32.mrf.mxu0  ;;  %4525 = vst [vmem:[#allocation4 + $0x338] sm:$0xf] %v4496_v34  ;;  %v7721_v48 = vor.u32 %v8361_v54, %v7720_v9  ;;  %v7421_v34 = vor.u32 %v8283_v46, %v7418_v47  ;;  %6204 = vmatpush.bf16.msra.mxu1 %v8433_v45  ;;  %v7426_v4 = vld [vmem:[#allocation4 + $0xc4] sm:$0xf0]  ;;  %v8284_v12 = vld [vmem:[#allocation4 + $0xa4] sm:$0xf] }
 0x412   : > { %4490 = vst [vmem:[#allocation4 + $0x358] sm:$0xf] %v4463_v51  ;;  %v7424_v0 = vld [vmem:[#allocation4 + $0xa0] sm:$0xf]  ;;  %v7429_v7 = vor.u32 %v8284_v12, %v7426_v4  ;;  %v7454_v22 = vld [vmem:[#allocation4 + $0x104] sm:$0xf0] }
 0x413   : > { %4526 = vst [vmem:[#allocation4 + $0x35c] sm:$0xf] %v4499_v8  ;;  %v7425_v32 = vor.u32 %v8288_v15, %v7424_v0  ;;  %v8292_v8 = vld [vmem:[#allocation4 + $0xe4] sm:$0xf]  ;;  %v7460_v28 = vld [vmem:[#allocation4 + $0xe8] sm:$0xf] }
 0x414   : > { %6188 = vmatmul.bf16.gmra.mxu0 %v7685_v63  ;;  %8467 = vmatpush.bf16.msrb.mxu3 %v8525_v25  ;;  %v7457_v56 = vor.u32 %v8292_v8, %v7454_v22  ;;  %v8440_v63 = vld [vmem:[%s11044_s4 + $0x220] sm:$0xff]  ;;  %v7498_v46 = vld [vmem:[#allocation4 + $0x154] sm:$0xf0]  ;;  %v8439_v22 = vld [vmem:[%s11044_s4 + $0x218] sm:$0xff] }
 0x415   : > { %5971 = vmatmul.bf16.gmra.mxu1 %v7385_v18  ;;  %v5867_v38 = vpop.f32.mrf.mxu2  ;;  %v8301_v54 = vld [vmem:[#allocation4 + $0x12c] sm:$0xf]  ;;  %v7526_v0 = vld [vmem:[#allocation4 + $0x194] sm:$0xf0] }
 0x416   : > { %v5868_v50 = vadd.f32 %v5867_v38, %v10764_v44  ;;  %v5928_v43 = vpop.f32.mrf.mxu3  ;;  %v8441_v44 = vld [vmem:[%s11044_s4 + $0x228] sm:$0xff]  ;;  %6205 = vmatpush.bf16.msra.mxu1 %v8432_v49  ;;  %v7462_v38 = vld [vmem:[#allocation4 + $0x10c] sm:$0xf0]  ;;  %v8315_v49 = vld [vmem:[#allocation4 + $0x198] sm:$0xf0] }
 0x417   : > { %v5810_v62 = vpop.f32.mrf.mxu1  ;;  %6265 = vmatpush.bf16.msra.mxu2 %v8441_v44 }
 0x418   : > { %v10807_v19 = vadd.f32 %v5928_v43, %v5868_v50  ;;  %v8297_v50 = vld [vmem:[#allocation4 + $0x108] sm:$0xf0] }
 0x419   : > { %v10805_v31 = vpop.f32.mrf.mxu0  ;;  %v7461_v53 = vor.u32 %v8297_v50, %v7460_v28 }
 0x41b   : > { %6266 = vmatpush.bf16.msra.mxu2 %v8440_v63  ;;  %v7534_v63 = vld [vmem:[#allocation4 + $0x19c] sm:$0xf0] }
 0x41d   : > { %v5869_v33 = vpop.f32.mrf.mxu2 }
 0x41e   : > { %6093 = vmatmul.bf16.gmra.mxu3 %v7393_v55  ;;  %v5930_v61 = vpop.f32.mrf.mxu3  ;;  %v7490_v55 = vld [vmem:[#allocation4 + $0x14c] sm:$0xf0] }
 0x41f   : > { %6032 = vmatmul.bf16.gmra.mxu2 %v7389_v57  ;;  %v5812_v35 = vpop.f32.mrf.mxu1  ;;  %v7493_v47 = vor.u32 %v8301_v54, %v7490_v55 }
 0x420   : > { %6267 = vmatpush.bf16.msra.mxu2 %v8439_v22 }
 0x421   : > { %v10812_v26 = vpop.f32.mrf.mxu0 }
 0x424   : > { %6193 = vmatmul.bf16.gmra.mxu0 %v7721_v48 }
 0x425   : > { %5975 = vmatmul.bf16.gmra.mxu1 %v7421_v34  ;;  %v8306_v34 = vld [vmem:[#allocation4 + $0x150] sm:$0xf0] }
 0x427   : > { %v5871_v16 = vpop.f32.mrf.mxu2 }
 0x428   : > { %v5872_v1 = vadd.f32 %v5871_v16, %v5810_v62  ;;  %v5932_v58 = vpop.f32.mrf.mxu3  ;;  %v8293_v62 = vld [vmem:[#allocation4 + $0xec] sm:$0xf]  ;;  %v8302_v16 = vld [vmem:[#allocation4 + $0x134] sm:$0xf] }
 0x429   : > { %v6161_v14 = vpop.f32.mrf.mxu0  ;;  %v7465_v36 = vor.u32 %v8293_v62, %v7462_v38  ;;  %v7501_v15 = vor.u32 %v8302_v16, %v7498_v46  ;;  %v7532_v38 = vld [vmem:[#allocation4 + $0x178] sm:$0xf]  ;;  %v8324_v16 = vld [vmem:[#allocation4 + $0x1e0] sm:$0xf0] }
 0x42a   : > { %v10817_v37 = vadd.f32 %v5932_v58, %v5872_v1  ;;  %v7496_v14 = vld [vmem:[#allocation4 + $0x130] sm:$0xf] }
 0x42b   : > { %v5815_v20 = vpop.f32.mrf.mxu1 }
 0x42c   : > { %v7497_v20 = vor.u32 %v8306_v34, %v7496_v14  ;;  %v8438_v14 = vld [vmem:[%s11044_s4 + $0x210] sm:$0xff] }
 0x42d   : > { %6268 = vmatpush.bf16.msra.mxu2 %v8438_v14 }
 0x42e   : > { %6097 = vmatmul.bf16.gmra.mxu3 %v7429_v7 }
 0x42f   : > { %6036 = vmatmul.bf16.gmra.mxu2 %v7425_v32  ;;  %v5873_v5 = vpop.f32.mrf.mxu2  ;;  %v8310_v32 = vld [vmem:[#allocation4 + $0x174] sm:$0xf] }
 0x430   : > { %v5874_v51 = vadd.f32 %v5873_v5, %v5812_v35  ;;  %v5934_v27 = vpop.f32.mrf.mxu3  ;;  %v7529_v5 = vor.u32 %v8310_v32, %v7526_v0  ;;  %v7598_v0 = vld [vmem:[#allocation4 + $0x224] sm:$0xf0] }
 0x431   : > { %v10819_v42 = vpop.f32.mrf.mxu0 }
 0x432   : > { %v10821_v21 = vadd.f32 %v5934_v27, %v5874_v51 }
 0x433   : > { %v5816_v23 = vpop.f32.mrf.mxu1 }
 0x435   : > { %5979 = vmatmul.bf16.gmra.mxu1 %v7457_v56  ;;  %v8431_v56 = vld [vmem:[%s11044_s4 + $0x1d8] sm:$0xff] }
 0x436   : > { %6206 = vmatpush.bf16.msra.mxu1 %v8431_v56 }
 0x439   : > { %v10829_v18 = vpop.f32.mrf.mxu0  ;;  %v5876_v25 = vpop.f32.mrf.mxu2 }
 0x43a   : > { %v5937_v43 = vpop.f32.mrf.mxu3  ;;  %v8311_v25 = vld [vmem:[#allocation4 + $0x17c] sm:$0xf] }
 0x43b   : > { %v5819_v11 = vpop.f32.mrf.mxu1  ;;  %v7537_v50 = vor.u32 %v8311_v25, %v7534_v63  ;;  %v7533_v43 = vor.u32 %v8315_v49, %v7532_v38  ;;  %v7606_v38 = vld [vmem:[#allocation4 + $0x22c] sm:$0xf0] }
 0x43e   : > { %6101 = vmatmul.bf16.gmra.mxu3 %v7465_v36 }
 0x43f   : > { %6040 = vmatmul.bf16.gmra.mxu2 %v7461_v53  ;;  %v7562_v53 = vld [vmem:[#allocation4 + $0x1dc] sm:$0xf0] }
 0x441   : > { %v6168_v57 = vpop.f32.mrf.mxu0  ;;  %v5877_v33 = vpop.f32.mrf.mxu2 }
 0x442   : > { %v5938_v61 = vpop.f32.mrf.mxu3  ;;  %v5878_v44 = vadd.f32 %v5877_v33, %v5816_v23  ;;  %v8319_v33 = vld [vmem:[#allocation4 + $0x1bc] sm:$0xf] }
 0x443   : > { %v5821_v9 = vpop.f32.mrf.mxu1  ;;  %v7565_v54 = vor.u32 %v8319_v33, %v7562_v53  ;;  %v7634_v53 = vld [vmem:[#allocation4 + $0x26c] sm:$0xf0] }
 0x444   : > { %v10831_v35 = vadd.f32 %v5938_v61, %v5878_v44 }
 0x445   : > { %5984 = vmatmul.bf16.gmra.mxu1 %v7493_v47 }
 0x449   : > { %v10833_v48 = vpop.f32.mrf.mxu0 }
 0x44b   : > { %v5880_v45 = vpop.f32.mrf.mxu2 }
 0x44c   : > { %v5941_v1 = vpop.f32.mrf.mxu3  ;;  %v5881_v4 = vadd.f32 %v5880_v45, %v5819_v11  ;;  %v7570_v45 = vld [vmem:[#allocation4 + $0x1e4] sm:$0xf0] }
 0x44d   : > { %v5823_v58 = vpop.f32.mrf.mxu1 }
 0x44e   : > { %v10835_v12 = vadd.f32 %v5941_v1, %v5881_v4  ;;  %6106 = vmatmul.bf16.gmra.mxu3 %v7501_v15  ;;  %v8430_v1 = vld [vmem:[%s11044_s4 + $0x1d0] sm:$0xff]  ;;  %v8320_v4 = vld [vmem:[#allocation4 + $0x1c4] sm:$0xf] }
 0x44f   : > { %6045 = vmatmul.bf16.gmra.mxu2 %v7497_v20  ;;  %v7568_v15 = vld [vmem:[#allocation4 + $0x1c0] sm:$0xf]  ;;  %6207 = vmatpush.bf16.msra.mxu1 %v8430_v1  ;;  %v8429_v1 = vld [vmem:[%s11044_s4 + $0x1c8] sm:$0xff] }
 0x450   : > { %v7569_v20 = vor.u32 %v8324_v16, %v7568_v15  ;;  %v8437_v16 = vld [vmem:[%s11044_s4 + $0x208] sm:$0xff] }
 0x451   : > { %v10837_v7 = vpop.f32.mrf.mxu0  ;;  %6269 = vmatpush.bf16.msra.mxu2 %v8437_v16  ;;  %v7678_v16 = vld [vmem:[#allocation4 + $0x2bc] sm:$0xf0] }
 0x453   : > { %v5882_v51 = vpop.f32.mrf.mxu2  ;;  %6208 = vmatpush.bf16.msra.mxu1 %v8429_v1 }
 0x454   : > { %v5943_v8 = vpop.f32.mrf.mxu3 }
 0x455   : > { %5988 = vmatmul.bf16.gmra.mxu1 %v7529_v5  ;;  %v5825_v27 = vpop.f32.mrf.mxu1  ;;  %v8328_v8 = vld [vmem:[#allocation4 + $0x204] sm:$0xf] }
 0x459   : > { %v6174_v23 = vpop.f32.mrf.mxu0 }
 0x45d   : > { %v5884_v62 = vpop.f32.mrf.mxu2 }
 0x45e   : > { %v5945_v11 = vpop.f32.mrf.mxu3  ;;  %v5885_v28 = vadd.f32 %v5884_v62, %v5823_v58  ;;  %6110 = vmatmul.bf16.gmra.mxu3 %v7537_v50  ;;  %v7573_v58 = vor.u32 %v8320_v4, %v7570_v45  ;;  %v8333_v50 = vld [vmem:[#allocation4 + $0x228] sm:$0xf0]  ;;  %v7604_v62 = vld [vmem:[#allocation4 + $0x208] sm:$0xf] }
 0x45f   : > { %v5828_v36 = vpop.f32.mrf.mxu1  ;;  %6049 = vmatmul.bf16.gmra.mxu2 %v7533_v43  ;;  %v8329_v43 = vld [vmem:[#allocation4 + $0x20c] sm:$0xf] }
 0x460   : > { %v10847_v57 = vadd.f32 %v5945_v11, %v5885_v28  ;;  %v7609_v28 = vor.u32 %v8329_v43, %v7606_v38  ;;  %v7605_v36 = vor.u32 %v8333_v50, %v7604_v62  ;;  %v5848_v43 = vadd.f32 %v10446_v41, %v10344_v2  ;;  %v8428_v41 = vld [vmem:[%s11044_s4 + $0x1c0] sm:$0xff] }
 0x461   : > { %v10845_v55 = vpop.f32.mrf.mxu0  ;;  %6209 = vmatpush.bf16.msra.mxu1 %v8428_v41 }
 0x465   : > { %5992 = vmatmul.bf16.gmra.mxu1 %v7565_v54  ;;  %v5886_v61 = vpop.f32.mrf.mxu2 }
 0x466   : > { %v5887_v44 = vadd.f32 %v5886_v61, %v5825_v27  ;;  %v5947_v47 = vpop.f32.mrf.mxu3  ;;  %v7601_v27 = vor.u32 %v8328_v8, %v7598_v0  ;;  %v8342_v0 = vld [vmem:[#allocation4 + $0x270] sm:$0xf0] }
 0x467   : > { %v5829_v9 = vpop.f32.mrf.mxu1 }
 0x468   : > { %v10851_v34 = vadd.f32 %v5947_v47, %v5887_v44  ;;  %v8337_v44 = vld [vmem:[#allocation4 + $0x24c] sm:$0xf] }
 0x469   : > { %v10849_v46 = vpop.f32.mrf.mxu0 }
 0x46e   : > { %6114 = vmatmul.bf16.gmra.mxu3 %v7573_v58 }
 0x46f   : > { %6053 = vmatmul.bf16.gmra.mxu2 %v7569_v20 }
 0x471   : > { %v6181_v32 = vpop.f32.mrf.mxu0  ;;  %v5950_v22 = vpop.f32.mrf.mxu3 }
 0x472   : > { %v5889_v5 = vpop.f32.mrf.mxu2  ;;  %v5832_v51 = vpop.f32.mrf.mxu1  ;;  %v8338_v22 = vld [vmem:[#allocation4 + $0x254] sm:$0xf] }
 0x473   : > { %v7640_v5 = vld [vmem:[#allocation4 + $0x250] sm:$0xf] }
 0x475   : > { %5997 = vmatmul.bf16.gmra.mxu1 %v7601_v27  ;;  %v7641_v27 = vor.u32 %v8342_v0, %v7640_v5 }
 0x479   : > { %v10859_v56 = vpop.f32.mrf.mxu0  ;;  %v5951_v23 = vpop.f32.mrf.mxu3 }
 0x47a   : > { %v5890_v63 = vpop.f32.mrf.mxu2  ;;  %v5834_v49 = vpop.f32.mrf.mxu1 }
 0x47b   : > { %v5891_v25 = vadd.f32 %v5890_v63, %v5829_v9  ;;  %v7637_v9 = vor.u32 %v8337_v44, %v7634_v53  ;;  %v5909_v53 = vadd.f32 %v10435_v3, %v5848_v43  ;;  %v8356_v43 = vld [vmem:[#allocation4 + $0x2e4] sm:$0xf] }
 0x47d   : > { %v10861_v11 = vadd.f32 %v5951_v23, %v5891_v25  ;;  %v8346_v25 = vld [vmem:[#allocation4 + $0x294] sm:$0xf] }
 0x47e   : > { %6119 = vmatmul.bf16.gmra.mxu3 %v7609_v28  ;;  %v5852_v28 = vadd.f32 %v10529_v30, %v10432_v60  ;;  %v8436_v60 = vld [vmem:[%s11044_s4 + $0x200] sm:$0xff]  ;;  %v8347_v30 = vld [vmem:[#allocation4 + $0x29c] sm:$0xf] }
 0x47f   : > { %6058 = vmatmul.bf16.gmra.mxu2 %v7605_v36 }
 0x480   : > { %6270 = vmatpush.bf16.msra.mxu2 %v8436_v60 }
 0x481   : > { %v10863_v33 = vpop.f32.mrf.mxu0  ;;  %v5954_v61 = vpop.f32.mrf.mxu3 }
 0x482   : > { %v5967_v54 = vpop.f32.mrf.mxu1  ;;  %v5893_v45 = vpop.f32.mrf.mxu2 }
 0x483   : > { %v5968_v47 = vadd.f32 %v5967_v54, %v10423_v24  ;;  %v5894_v14 = vadd.f32 %v5893_v45, %v5832_v51  ;;  %v7642_v24 = vld [vmem:[#allocation4 + $0x274] sm:$0xf0] }
 0x484   : > { %v7645_v8 = vor.u32 %v8338_v22, %v7642_v24  ;;  %v7670_v51 = vld [vmem:[#allocation4 + $0x2b4] sm:$0xf0]  ;;  %v8355_v22 = vld [vmem:[#allocation4 + $0x2dc] sm:$0xf] }
 0x485   : > { %6001 = vmatmul.bf16.gmra.mxu1 %v7637_v9  ;;  %v10872_v4 = vadd.f32 %v5954_v61, %v5894_v14  ;;  %v7673_v38 = vor.u32 %v8346_v25, %v7670_v51  ;;  %v5913_v61 = vadd.f32 %v10520_v6, %v5852_v28  ;;  %v8351_v14 = vld [vmem:[#allocation4 + $0x2b8] sm:$0xf0]  ;;  %v8360_v25 = vld [vmem:[#allocation4 + $0x300] sm:$0xf0] }
 0x489   : > { %v6187_v15 = vpop.f32.mrf.mxu0  ;;  %v5956_v20 = vpop.f32.mrf.mxu3 }
 0x48a   : > { %v5969_v58 = vpop.f32.mrf.mxu1  ;;  %v5895_v32 = vpop.f32.mrf.mxu2  ;;  %v7681_v15 = vor.u32 %v8347_v30, %v7678_v16  ;;  %v7706_v20 = vld [vmem:[#allocation4 + $0x2fc] sm:$0xf0] }
 0x48b   : > { %v5970_v44 = vadd.f32 %v5969_v58, %v5909_v53 }
 0x48e   : > { %6123 = vmatmul.bf16.gmra.mxu3 %v7645_v8  ;;  %v7709_v8 = vor.u32 %v8355_v22, %v7706_v20 }
 0x48f   : > { %6062 = vmatmul.bf16.gmra.mxu2 %v7641_v27 }
 0x491   : > { %v10874_v23 = vpop.f32.mrf.mxu0  ;;  %v6089_v49 = vpop.f32.mrf.mxu3 }
 0x492   : > { %v5972_v63 = vpop.f32.mrf.mxu1  ;;  %v6028_v50 = vpop.f32.mrf.mxu2 }
 0x493   : > { %v6029_v62 = vadd.f32 %v6028_v50, %v5968_v47  ;;  %v7676_v47 = vld [vmem:[#allocation4 + $0x298] sm:$0xf] }
 0x494   : > { %v7677_v6 = vor.u32 %v8351_v14, %v7676_v47 }
 0x495   : > { %6005 = vmatmul.bf16.gmra.mxu1 %v7673_v38  ;;  %v10880_v36 = vadd.f32 %v6089_v49, %v6029_v62  ;;  %v7714_v49 = vld [vmem:[#allocation4 + $0x304] sm:$0xf0]  ;;  %v7712_v62 = vld [vmem:[#allocation4 + $0x2e0] sm:$0xf] }
 0x496   : > { %v7717_v28 = vor.u32 %v8356_v43, %v7714_v49  ;;  %v7713_v53 = vor.u32 %v8360_v25, %v7712_v62 }
 0x499   : > { %v10883_v54 = vpop.f32.mrf.mxu0  ;;  %v6091_v9 = vpop.f32.mrf.mxu3 }
 0x49a   : > { %v5973_v45 = vpop.f32.mrf.mxu1  ;;  %v6030_v2 = vpop.f32.mrf.mxu2 }
 0x49b   : > { %v5974_v1 = vadd.f32 %v5973_v45, %v5913_v61  ;;  %v6031_v3 = vadd.f32 %v6030_v2, %v5970_v44  ;;  %v7742_v44 = vld [vmem:[#allocation4 + $0x344] sm:$0xf0] }
 0x49d   : > { %v10892_v58 = vadd.f32 %v6091_v9, %v6031_v3  ;;  %v8364_v9 = vld [vmem:[#allocation4 + $0x324] sm:$0xf] }
 0x49e   : > { %6127 = vmatmul.bf16.gmra.mxu3 %v7681_v15  ;;  %v7745_v14 = vor.u32 %v8364_v9, %v7742_v44  ;;  %v7750_v15 = vld [vmem:[#allocation4 + $0x34c] sm:$0xf0]  ;;  %v7368_v44 = vld [vmem:[#allocation4 + $0x20] sm:$0xf] }
 0x49f   : > { %6066 = vmatmul.bf16.gmra.mxu2 %v7677_v6  ;;  %v8369_v6 = vld [vmem:[#allocation4 + $0x348] sm:$0xf0] }
 0x4a1   : > { %v6194_v24 = vpop.f32.mrf.mxu0  ;;  %v6094_v32 = vpop.f32.mrf.mxu3 }
 0x4a2   : > { %v5976_v0 = vpop.f32.mrf.mxu1  ;;  %v6033_v27 = vpop.f32.mrf.mxu2  ;;  %v7748_v32 = vld [vmem:[#allocation4 + $0x328] sm:$0xf] }
 0x4a3   : > { %v5977_v5 = vadd.f32 %v5976_v0, %v10598_v13  ;;  %v8365_v0 = vld [vmem:[#allocation4 + $0x32c] sm:$0xf]  ;;  %v7749_v22 = vor.u32 %v8369_v6, %v7748_v32 }
 0x4a5   : > { %6010 = vmatmul.bf16.gmra.mxu1 %v7709_v8 }
 0x4a9   : > { %v6095_v63 = vpop.f32.mrf.mxu3 }
 0x4aa   : > { %v5978_v51 = vpop.f32.mrf.mxu1  ;;  %v6034_v38 = vpop.f32.mrf.mxu2 }
 0x4ab   : > { %v6035_v50 = vadd.f32 %v6034_v38, %v5974_v1  ;;  %v5861_v1 = vadd.f32 %v10721_v29, %v10613_v59  ;;  %v8267_v29 = vld [vmem:[#allocation4 + $0x1c] sm:$0xf]  ;;  %v8370_v38 = vld [vmem:[#allocation4 + $0x350] sm:$0xf0] }
 0x4ad   : > { %v10895_v61 = vadd.f32 %v6095_v63, %v6035_v50  ;;  %v5922_v3 = vadd.f32 %v10707_v40, %v5861_v1  ;;  %v8272_v50 = vld [vmem:[#allocation4 + $0x40] sm:$0xf0] }
 0x4ae   : > { %6132 = vmatmul.bf16.gmra.mxu3 %v7717_v28 }
 0x4af   : > { %6071 = vmatmul.bf16.gmra.mxu2 %v7713_v53  ;;  %v7756_v53 = vld [vmem:[#allocation4 + $0x330] sm:$0xf] }
 0x4b1   : > { %v6098_v13 = vpop.f32.mrf.mxu3 }
 0x4b2   : > { %v5980_v45 = vpop.f32.mrf.mxu1  ;;  %v6037_v2 = vpop.f32.mrf.mxu2 }
 0x4b3   : > { %v5981_v16 = vadd.f32 %v5980_v45, %v10695_v39  ;;  %v6038_v60 = vadd.f32 %v6037_v2, %v5977_v5  ;;  %v7753_v39 = vor.u32 %v8365_v0, %v7750_v15  ;;  %v7362_v5 = vld [vmem:[#allocation4 + $0x3c] sm:$0xf0]  ;;  %v7757_v45 = vor.u32 %v8370_v38, %v7756_v53  ;;  %v8281_v15 = vld [vmem:[#allocation4 + $0x88] sm:$0xf0] }
 0x4b4   : > { %v7365_v51 = vor.u32 %v8267_v29, %v7362_v5 }
 0x4b5   : > { %6014 = vmatmul.bf16.gmra.mxu1 %v7745_v14  ;;  %v10900_v41 = vadd.f32 %v6098_v13, %v6038_v60  ;;  %v7369_v13 = vor.u32 %v8272_v50, %v7368_v44  ;;  %v8276_v60 = vld [vmem:[#allocation4 + $0x64] sm:$0xf] }
 0x4b9   : > { %v6100_v47 = vpop.f32.mrf.mxu3 }
 0x4ba   : > { %v5982_v30 = vpop.f32.mrf.mxu1  ;;  %v6039_v24 = vpop.f32.mrf.mxu2 }
 0x4bb   : > { %v5983_v20 = vadd.f32 %v5982_v30, %v5922_v3  ;;  %v7404_v24 = vld [vmem:[#allocation4 + $0x68] sm:$0xf] }
 0x4bc   : > { %v7405_v0 = vor.u32 %v8281_v15, %v7404_v24 }
 0x4be   : > { %6136 = vmatmul.bf16.gmra.mxu3 %v7753_v39  ;;  %v7434_v39 = vld [vmem:[#allocation4 + $0xcc] sm:$0xf0] }
 0x4bf   : > { %6075 = vmatmul.bf16.gmra.mxu2 %v7749_v22 }
 0x4c1   : > { %v6102_v59 = vpop.f32.mrf.mxu3 }
 0x4c2   : > { %v5985_v8 = vpop.f32.mrf.mxu1  ;;  %v6041_v27 = vpop.f32.mrf.mxu2 }
 0x4c3   : > { %v6042_v63 = vadd.f32 %v6041_v27, %v5981_v16  ;;  %v7398_v16 = vld [vmem:[#allocation4 + $0x84] sm:$0xf0]  ;;  %v8285_v8 = vld [vmem:[#allocation4 + $0xac] sm:$0xf] }
 0x4c4   : > { %v7401_v30 = vor.u32 %v8276_v60, %v7398_v16  ;;  %v7437_v29 = vor.u32 %v8285_v8, %v7434_v39 }
 0x4c5   : > { %6210 = vmatmul.bf16.vlgmr.msra.gmra.mxu1 %v7365_v51  ;;  %v10903_v40 = vadd.f32 %v6102_v59, %v6042_v63 }
 0x4c9   : > { %v6104_v25 = vpop.f32.mrf.mxu3 }
 0x4ca   : > { %v5986_v49 = vpop.f32.mrf.mxu1  ;;  %v6043_v62 = vpop.f32.mrf.mxu2 }
 0x4cb   : > { %v5987_v43 = vadd.f32 %v5986_v49, %v10792_v17  ;;  %v6044_v28 = vadd.f32 %v6043_v62, %v5983_v20 }
 0x4cd   : > { %v10906_v9 = vadd.f32 %v6104_v25, %v6044_v28  ;;  %v8290_v25 = vld [vmem:[#allocation4 + $0xd0] sm:$0xf0]  ;;  %v7470_v28 = vld [vmem:[#allocation4 + $0x114] sm:$0xf0] }
 0x4ce   : > { %6197 = vmatmul.bf16.vlgmr.msrb.gmra.mxu3 %v7757_v45  ;;  %v8294_v45 = vld [vmem:[#allocation4 + $0xf4] sm:$0xf] }
 0x4cf   : > { %6271 = vmatmul.bf16.vlgmr.msra.gmra.mxu2 %v7369_v13  ;;  %v7473_v13 = vor.u32 %v8294_v45, %v7470_v28 }
 0x4d1   : > { %v6107_v2 = vpop.f32.mrf.mxu3 }
 0x4d2   : > { %v5989_v14 = vpop.f32.mrf.mxu1  ;;  %v6046_v3 = vpop.f32.mrf.mxu2 }
 0x4d3   : > { %v5990_v1 = vadd.f32 %v5989_v14, %v10807_v19 }
 0x4d5   : > { %6215 = vmatmul.bf16.gmra.mxu1 %v7401_v30 }
 0x4d9   : > { %v6108_v47 = vpop.f32.mrf.mxu3 }
 0x4da   : > { %v5991_v17 = vpop.f32.mrf.mxu1  ;;  %v6047_v6 = vpop.f32.mrf.mxu2 }
 0x4db   : > { %v6048_v20 = vadd.f32 %v6047_v6, %v5987_v43  ;;  %v7440_v43 = vld [vmem:[#allocation4 + $0xb0] sm:$0xf]  ;;  %v7476_v17 = vld [vmem:[#allocation4 + $0xf8] sm:$0xf]  ;;  %v7506_v6 = vld [vmem:[#allocation4 + $0x15c] sm:$0xf0] }
 0x4dc   : > { %v7441_v62 = vor.u32 %v8290_v25, %v7440_v43  ;;  %v7542_v25 = vld [vmem:[#allocation4 + $0x1a4] sm:$0xf0]  ;;  %v8312_v43 = vld [vmem:[#allocation4 + $0x184] sm:$0xf] }
 0x4dd   : > { %v10909_v32 = vadd.f32 %v6108_v47, %v6048_v20  ;;  %v7545_v28 = vor.u32 %v8312_v43, %v7542_v25 }
 0x4df   : > { %6276 = vmatmul.bf16.gmra.mxu2 %v7405_v0  ;;  %v8303_v0 = vld [vmem:[#allocation4 + $0x13c] sm:$0xf] }
 0x4e1   : > { %v6111_v5 = vpop.f32.mrf.mxu3 }
 0x4e2   : > { %v5993_v22 = vpop.f32.mrf.mxu1  ;;  %v6050_v19 = vpop.f32.mrf.mxu2 }
 0x4e3   : > { %v5994_v59 = vadd.f32 %v5993_v22, %v10817_v37  ;;  %v6051_v27 = vadd.f32 %v6050_v19, %v5990_v1  ;;  %v8299_v1 = vld [vmem:[#allocation4 + $0x118] sm:$0xf0]  ;;  %v8308_v19 = vld [vmem:[#allocation4 + $0x160] sm:$0xf0] }
 0x4e4   : > { %v7477_v47 = vor.u32 %v8299_v1, %v7476_v17  ;;  %v8321_v17 = vld [vmem:[#allocation4 + $0x1cc] sm:$0xf] }
 0x4e5   : > { %6219 = vmatmul.bf16.gmra.mxu1 %v7437_v29  ;;  %v10912_v51 = vadd.f32 %v6111_v5, %v6051_v27  ;;  %v7509_v5 = vor.u32 %v8303_v0, %v7506_v6  ;;  %v7512_v27 = vld [vmem:[#allocation4 + $0x140] sm:$0xf] }
 0x4e9   : > { %v6113_v49 = vpop.f32.mrf.mxu3 }
 0x4ea   : > { %v5995_v63 = vpop.f32.mrf.mxu1  ;;  %v6052_v50 = vpop.f32.mrf.mxu2 }
 0x4eb   : > { %v5996_v38 = vadd.f32 %v5995_v63, %v10821_v21  ;;  %v7513_v63 = vor.u32 %v8308_v19, %v7512_v27 }
 0x4ef   : > { %6280 = vmatmul.bf16.gmra.mxu2 %v7441_v62 }
 0x4f1   : > { %v6115_v44 = vpop.f32.mrf.mxu3 }
 0x4f2   : > { %v5998_v53 = vpop.f32.mrf.mxu1  ;;  %v6054_v37 = vpop.f32.mrf.mxu2 }
 0x4f3   : > { %v6055_v16 = vadd.f32 %v6054_v37, %v5994_v59 }
 0x4f5   : > { %6223 = vmatmul.bf16.gmra.mxu1 %v7473_v13  ;;  %v10915_v14 = vadd.f32 %v6115_v44, %v6055_v16  ;;  %v8317_v13 = vld [vmem:[#allocation4 + $0x1a8] sm:$0xf0] }
 0x4f9   : > { %v6117_v60 = vpop.f32.mrf.mxu3 }
 0x4fa   : > { %v5999_v2 = vpop.f32.mrf.mxu1  ;;  %v6056_v21 = vpop.f32.mrf.mxu2 }
 0x4fb   : > { %v6000_v3 = vadd.f32 %v5999_v2, %v10831_v35  ;;  %v6057_v30 = vadd.f32 %v6056_v21, %v5996_v38 }
 0x4fd   : > { %v10918_v15 = vadd.f32 %v6117_v60, %v6057_v30  ;;  %v7548_v60 = vld [vmem:[#allocation4 + $0x188] sm:$0xf] }
 0x4fe   : > { %v7549_v1 = vor.u32 %v8317_v13, %v7548_v60  ;;  %v7650_v13 = vld [vmem:[#allocation4 + $0x27c] sm:$0xf0]  ;;  %v8339_v60 = vld [vmem:[#allocation4 + $0x25c] sm:$0xf] }
 0x4ff   : > { %6284 = vmatmul.bf16.gmra.mxu2 %v7477_v47 }
 0x501   : > { %v6120_v24 = vpop.f32.mrf.mxu3 }
 0x502   : > { %v6002_v20 = vpop.f32.mrf.mxu1  ;;  %v6059_v22 = vpop.f32.mrf.mxu2 }
 0x503   : > { %v6003_v39 = vadd.f32 %v6002_v20, %v10835_v12 }
 0x505   : > { %6228 = vmatmul.bf16.gmra.mxu1 %v7509_v5 }
 0x509   : > { %v6121_v59 = vpop.f32.mrf.mxu3 }
 0x50a   : > { %v6004_v8 = vpop.f32.mrf.mxu1  ;;  %v6060_v35 = vpop.f32.mrf.mxu2 }
 0x50b   : > { %v6061_v29 = vadd.f32 %v6060_v35, %v6000_v3  ;;  %v7578_v3 = vld [vmem:[#allocation4 + $0x1ec] sm:$0xf0]  ;;  %v7614_v35 = vld [vmem:[#allocation4 + $0x234] sm:$0xf0] }
 0x50c   : > { %v7581_v47 = vor.u32 %v8321_v17, %v7578_v3  ;;  %v7584_v8 = vld [vmem:[#allocation4 + $0x1d0] sm:$0xf]  ;;  %v7653_v3 = vor.u32 %v8339_v60, %v7650_v13 }
 0x50d   : > { %v10921_v49 = vadd.f32 %v6121_v59, %v6061_v29  ;;  %v7722_v60 = vld [vmem:[#allocation4 + $0x30c] sm:$0xf0] }
 0x50f   : > { %6289 = vmatmul.bf16.gmra.mxu2 %v7513_v63  ;;  %v8330_v63 = vld [vmem:[#allocation4 + $0x214] sm:$0xf] }
 0x511   : > { %v6124_v50 = vpop.f32.mrf.mxu3 }
 0x512   : > { %v6006_v38 = vpop.f32.mrf.mxu1  ;;  %v6063_v12 = vpop.f32.mrf.mxu2 }
 0x513   : > { %v6007_v62 = vadd.f32 %v6006_v38, %v10847_v57  ;;  %v6064_v53 = vadd.f32 %v6063_v12, %v6003_v39  ;;  %v8326_v39 = vld [vmem:[#allocation4 + $0x1f0] sm:$0xf0]  ;;  %v8335_v12 = vld [vmem:[#allocation4 + $0x238] sm:$0xf0] }
 0x514   : > { %v7585_v59 = vor.u32 %v8326_v39, %v7584_v8  ;;  %v7686_v39 = vld [vmem:[#allocation4 + $0x2c4] sm:$0xf0]  ;;  %v8348_v8 = vld [vmem:[#allocation4 + $0x2a4] sm:$0xf] }
 0x515   : > { %6232 = vmatmul.bf16.gmra.mxu1 %v7545_v28  ;;  %v10924_v44 = vadd.f32 %v6124_v50, %v6064_v53  ;;  %v7617_v50 = vor.u32 %v8330_v63, %v7614_v35  ;;  %v7620_v53 = vld [vmem:[#allocation4 + $0x218] sm:$0xf] }
 0x519   : > { %v6126_v37 = vpop.f32.mrf.mxu3 }
 0x51a   : > { %v6008_v45 = vpop.f32.mrf.mxu1  ;;  %v6065_v2 = vpop.f32.mrf.mxu2 }
 0x51b   : > { %v6009_v16 = vadd.f32 %v6008_v45, %v10851_v34  ;;  %v7621_v45 = vor.u32 %v8335_v12, %v7620_v53 }
 0x51f   : > { %6293 = vmatmul.bf16.gmra.mxu2 %v7549_v1 }
 0x521   : > { %v6128_v30 = vpop.f32.mrf.mxu3 }
 0x522   : > { %v6011_v21 = vpop.f32.mrf.mxu1  ;;  %v6067_v57 = vpop.f32.mrf.mxu2 }
 0x523   : > { %v6068_v6 = vadd.f32 %v6067_v57, %v6007_v62  ;;  %v8344_v57 = vld [vmem:[#allocation4 + $0x280] sm:$0xf0] }
 0x525   : > { %6236 = vmatmul.bf16.gmra.mxu1 %v7581_v47  ;;  %v10927_v20 = vadd.f32 %v6128_v30, %v6068_v6  ;;  %v7656_v6 = vld [vmem:[#allocation4 + $0x260] sm:$0xf] }
 0x529   : > { %v6130_v0 = vpop.f32.mrf.mxu3 }
 0x52a   : > { %v6012_v24 = vpop.f32.mrf.mxu1  ;;  %v6069_v34 = vpop.f32.mrf.mxu2 }
 0x52b   : > { %v6013_v22 = vadd.f32 %v6012_v24, %v10861_v11  ;;  %v6070_v5 = vadd.f32 %v6069_v34, %v6009_v16  ;;  %v7657_v24 = vor.u32 %v8344_v57, %v7656_v6  ;;  %v8362_v57 = vld [vmem:[#allocation4 + $0x310] sm:$0xf0] }
 0x52d   : > { %v10930_v19 = vadd.f32 %v6130_v0, %v6070_v5  ;;  %v6151_v0 = vadd.f32 %v10742_v10, %v10880_v36  ;;  %v10947_v10 = vld [vmem:[%s11046_s6] ss:$0 sm:$0xff] }
 0x52f   : > { %6297 = vmatmul.bf16.gmra.mxu2 %v7585_v59  ;;  %v10940_v59 = vld [vmem:[%s11045_s5] ss:$0 sm:$0xff] }
 0x531   : > { %v6133_v27 = vpop.f32.mrf.mxu3 }
 0x532   : > { %v6015_v29 = vpop.f32.mrf.mxu1  ;;  %v6072_v38 = vpop.f32.mrf.mxu2 }
 0x533   : > { %v6016_v25 = vadd.f32 %v6015_v29, %v10872_v4  ;;  %v7689_v29 = vor.u32 %v8348_v8, %v7686_v39 }
 0x535   : > { %6241 = vmatmul.bf16.gmra.mxu1 %v7617_v50 }
 0x539   : > { %v6134_v62 = vpop.f32.mrf.mxu3 }
 0x53a   : > { %v6017_v43 = vpop.f32.mrf.mxu1  ;;  %v6073_v11 = vpop.f32.mrf.mxu2 }
 0x53b   : > { %v6074_v28 = vadd.f32 %v6073_v11, %v6013_v22  ;;  %v8353_v11 = vld [vmem:[#allocation4 + $0x2c8] sm:$0xf0] }
 0x53d   : > { %v10933_v37 = vadd.f32 %v6134_v62, %v6074_v28 }
 0x53f   : > { %6302 = vmatmul.bf16.gmra.mxu2 %v7621_v45  ;;  %v7692_v45 = vld [vmem:[#allocation4 + $0x2a8] sm:$0xf] }
 0x540   : > { %v7693_v13 = vor.u32 %v8353_v11, %v7692_v45  ;;  %v6164_v11 = vadd.f32 %v10819_v42, %v10903_v40 }
 0x541   : > { %v6137_v2 = vpop.f32.mrf.mxu3 }
 0x542   : > { %v6211_v16 = vpop.f32.mrf.mxu1  ;;  %v6076_v1 = vpop.f32.mrf.mxu2 }
 0x543   : > { %v6077_v4 = vadd.f32 %v6076_v1, %v6016_v25  ;;  %v6212_v22 = vadd.f32 %v6211_v16, %v6151_v0  ;;  %v6153_v25 = vadd.f32 %v10775_v52, %v10892_v58  ;;  %v8357_v1 = vld [vmem:[#allocation4 + $0x2ec] sm:$0xf] }
 0x545   : > { %6245 = vmatmul.bf16.gmra.mxu1 %v7653_v3  ;;  %v6138_v21 = vadd.f32 %v6137_v2, %v6077_v4  ;;  %v7725_v3 = vor.u32 %v8357_v1, %v7722_v60 }
 0x549   : > { %v6139_v17 = vpop.f32.mrf.mxu3 }
 0x54a   : > { %v6213_v30 = vpop.f32.mrf.mxu1  ;;  %v6078_v47 = vpop.f32.mrf.mxu2 }
 0x54b   : > { %v6214_v50 = vadd.f32 %v6213_v30, %v6153_v25 }
 0x54f   : > { %6306 = vmatmul.bf16.gmra.mxu2 %v7657_v24  ;;  %v7728_v24 = vld [vmem:[#allocation4 + $0x2f0] sm:$0xf] }
 0x550   : > { %v7729_v0 = vor.u32 %v8362_v57, %v7728_v24 }
 0x551   : > { %v6198_v5 = vpop.f32.mrf.mxu3 }
 0x552   : > { %v6216_v34 = vpop.f32.mrf.mxu1  ;;  %v10942_v35 = vadd.f32 %v6198_v5, %v6138_v21  ;;  %v6272_v27 = vpop.f32.mrf.mxu2  ;;  %v6157_v21 = vadd.f32 %v10805_v31, %v10895_v61  ;;  %v7758_v5 = vld [vmem:[#allocation4 + $0x354] sm:$0xf0] }
 0x553   : > { %v6273_v63 = vadd.f32 %v6272_v27, %v6212_v22  ;;  %v6160_v22 = vadd.f32 %v10812_v26, %v10900_v41  ;;  %v8371_v26 = vld [vmem:[#allocation4 + $0x358] sm:$0xf0] }
 0x555   : > { %6249 = vmatmul.bf16.gmra.mxu1 %v7689_v29  ;;  %v6328_v36 = vmul.f32 %v10940_v59, %v6273_v63  ;;  %v8366_v29 = vld [vmem:[#allocation4 + $0x334] sm:$0xf] }
 0x556   : > { %v7761_v27 = vor.u32 %v8366_v29, %v7758_v5 }
 0x557   : > { %v6348_v38 = vadd.f32 %v10947_v10, %v6328_v36 }
 0x559   : > { %v6364_v43 = vmax.f32 %v6348_v38, 0.0  ;;  %v6200_v12 = vpop.f32.mrf.mxu3 }
 0x55a   : > { %v6217_v62 = vpop.f32.mrf.mxu1  ;;  %v6274_v28 = vpop.f32.mrf.mxu2 }
 0x55b   : > { %6380 = vst [vmem:[%s8646_s21] sm:$0xff] %v6364_v43  ;;  %v6275_v53 = vadd.f32 %v6274_v28, %v6214_v50  ;;  %v6218_v30 = vadd.f32 %v6217_v62, %v6157_v21  ;;  %v7764_v62 = vld [vmem:[#allocation4 + $0x338] sm:$0xf] }
 0x55c   : > { %v7765_v12 = vor.u32 %v8371_v26, %v7764_v62 }
 0x55d   : > { %v6329_v16 = vmul.f32 %v10940_v59, %v6275_v53 }
 0x55f   : > { %6310 = vmatmul.bf16.gmra.mxu2 %v7693_v13  ;;  %v6349_v2 = vadd.f32 %v10947_v10, %v6329_v16 }
 0x561   : > { %v6365_v52 = vmax.f32 %v6349_v2, 0.0  ;;  %v6166_v2 = vadd.f32 %v10829_v18, %v10906_v9  ;;  %v6170_v18 = vadd.f32 %v10833_v48, %v10909_v32 }
 0x562   : > { %v6220_v58 = vpop.f32.mrf.mxu1  ;;  %v6277_v4 = vpop.f32.mrf.mxu2 }
 0x563   : > { %6381 = vst [vmem:[%s8646_s21 + $0x8] sm:$0xff] %v6365_v52  ;;  %v6221_v8 = vadd.f32 %v6220_v58, %v6160_v22 }
 0x565   : > { %6254 = vmatmul.bf16.gmra.mxu1 %v7725_v3 }
 0x56a   : > { %v6222_v17 = vpop.f32.mrf.mxu1  ;;  %v6278_v47 = vpop.f32.mrf.mxu2 }
 0x56b   : > { %v6279_v6 = vadd.f32 %v6278_v47, %v6218_v30 }
 0x56d   : > { %v6330_v39 = vmul.f32 %v10940_v59, %v6279_v6 }
 0x56f   : > { %6315 = vmatmul.bf16.gmra.mxu2 %v7729_v0  ;;  %v6350_v34 = vadd.f32 %v10947_v10, %v6330_v39  ;;  %v6173_v0 = vadd.f32 %v10837_v7, %v10912_v51  ;;  %v6177_v7 = vadd.f32 %v10845_v55, %v10915_v14 }
 0x571   : > { %v6366_v31 = vmax.f32 %v6350_v34, 0.0 }
 0x572   : > { %v6224_v61 = vpop.f32.mrf.mxu1  ;;  %v6281_v63 = vpop.f32.mrf.mxu2 }
 0x573   : > { %6382 = vst [vmem:[%s8646_s21 + $0x10] sm:$0xff] %v6366_v31  ;;  %v6282_v36 = vadd.f32 %v6281_v63, %v6221_v8  ;;  %v6225_v28 = vadd.f32 %v6224_v61, %v6164_v11 }
 0x575   : > { %6258 = vmatmul.bf16.gmra.mxu1 %v7761_v27  ;;  %v6331_v25 = vmul.f32 %v10940_v59, %v6282_v36 }
 0x577   : > { %v6351_v38 = vadd.f32 %v10947_v10, %v6331_v25 }
 0x579   : > { %v6367_v50 = vmax.f32 %v6351_v38, 0.0 }
 0x57a   : > { %v6226_v43 = vpop.f32.mrf.mxu1  ;;  %v6283_v41 = vpop.f32.mrf.mxu2 }
 0x57b   : > { %6383 = vst [vmem:[%s8646_s21 + $0x18] sm:$0xff] %v6367_v50  ;;  %v6227_v52 = vadd.f32 %v6226_v43, %v6166_v2  ;;  %v6179_v50 = vadd.f32 %v10849_v46, %v10918_v15  ;;  %v6183_v46 = vadd.f32 %v10859_v56, %v10921_v49 }
 0x57f   : > { %6319 = vmatmul.bf16.gmra.mxu2 %v7765_v12 }
 0x582   : > { %v6229_v53 = vpop.f32.mrf.mxu1  ;;  %v6285_v45 = vpop.f32.mrf.mxu2 }
 0x583   : > { %v6286_v13 = vadd.f32 %v6285_v45, %v6225_v28 }
 0x585   : > { %v6332_v16 = vmul.f32 %v10940_v59, %v6286_v13 }
 0x587   : > { %v6352_v60 = vadd.f32 %v10947_v10, %v6332_v16 }
 0x589   : > { %v6368_v58 = vmax.f32 %v6352_v60, 0.0 }
 0x58a   : > { %v6230_v1 = vpop.f32.mrf.mxu1  ;;  %v6287_v3 = vpop.f32.mrf.mxu2 }
 0x58b   : > { %6384 = vst [vmem:[%s8646_s21 + $0x20] sm:$0xff] %v6368_v58  ;;  %v6288_v4 = vadd.f32 %v6287_v3, %v6227_v52  ;;  %v6231_v9 = vadd.f32 %v6230_v1, %v6170_v18  ;;  %v6186_v52 = vadd.f32 %v10863_v33, %v10924_v44  ;;  %v6190_v33 = vadd.f32 %v10874_v23, %v10927_v20 }
 0x58d   : > { %v6333_v42 = vmul.f32 %v10940_v59, %v6288_v4 }
 0x58f   : > { %v6353_v40 = vadd.f32 %v10947_v10, %v6333_v42 }
 0x591   : > { %v6369_v21 = vmax.f32 %v6353_v40, 0.0 }
 0x592   : > { %v6233_v30 = vpop.f32.mrf.mxu1  ;;  %v6290_v17 = vpop.f32.mrf.mxu2 }
 0x593   : > { %6385 = vst [vmem:[%s8646_s21 + $0x28] sm:$0xff] %v6369_v21  ;;  %v6234_v22 = vadd.f32 %v6233_v30, %v6173_v0 }
 0x59a   : > { %v6235_v57 = vpop.f32.mrf.mxu1  ;;  %v6291_v47 = vpop.f32.mrf.mxu2 }
 0x59b   : > { %v6292_v6 = vadd.f32 %v6291_v47, %v6231_v9 }
 0x59d   : > { %v6334_v24 = vmul.f32 %v10940_v59, %v6292_v6  ;;  %v6192_v6 = vadd.f32 %v10883_v54, %v10930_v19 }
 0x59f   : > { %v6354_v39 = vadd.f32 %v10947_v10, %v6334_v24 }
 0x5a1   : > { %v6370_v34 = vmax.f32 %v6354_v39, 0.0 }
 0x5a2   : > { %v6237_v5 = vpop.f32.mrf.mxu1  ;;  %v6294_v8 = vpop.f32.mrf.mxu2 }
 0x5a3   : > { %6386 = vst [vmem:[%s8646_s21 + $0x30] sm:$0xff] %v6370_v34  ;;  %v6295_v31 = vadd.f32 %v6294_v8, %v6234_v22  ;;  %v6238_v51 = vadd.f32 %v6237_v5, %v6177_v7 }
 0x5a5   : > { %v6335_v48 = vmul.f32 %v10940_v59, %v6295_v31 }
 0x5a7   : > { %v6355_v32 = vadd.f32 %v10947_v10, %v6335_v48 }
 0x5a9   : > { %v6371_v61 = vmax.f32 %v6355_v32, 0.0  ;;  %v6195_v32 = vpop.f32.mrf.mxu0 }
 0x5aa   : > { %v6239_v29 = vpop.f32.mrf.mxu1  ;;  %v6296_v27 = vpop.f32.mrf.mxu2  ;;  %v6196_v54 = vadd.f32 %v6195_v32, %v10933_v37 }
 0x5ab   : > { %6387 = vst [vmem:[%s8646_s21 + $0x38] sm:$0xff] %v6371_v61  ;;  %v6240_v26 = vadd.f32 %v6239_v29, %v6179_v50 }
 0x5b2   : > { %v6242_v63 = vpop.f32.mrf.mxu1  ;;  %v6298_v36 = vpop.f32.mrf.mxu2 }
 0x5b3   : > { %v6299_v25 = vadd.f32 %v6298_v36, %v6238_v51 }
 0x5b5   : > { %v6336_v38 = vmul.f32 %v10940_v59, %v6299_v25 }
 0x5b7   : > { %v6356_v43 = vadd.f32 %v10947_v10, %v6336_v38 }
 0x5b9   : > { %v6372_v41 = vmax.f32 %v6356_v43, 0.0 }
 0x5ba   : > { %v6243_v62 = vpop.f32.mrf.mxu1  ;;  %v6300_v12 = vpop.f32.mrf.mxu2 }
 0x5bb   : > { %6388 = vst [vmem:[%s8646_s21 + $0x40] sm:$0xff] %v6372_v41  ;;  %v6301_v11 = vadd.f32 %v6300_v12, %v6240_v26  ;;  %v6244_v15 = vadd.f32 %v6243_v62, %v6183_v46 }
 0x5bd   : > { %v6337_v55 = vmul.f32 %v10940_v59, %v6301_v11 }
 0x5bf   : > { %v6357_v14 = vadd.f32 %v10947_v10, %v6337_v55 }
 0x5c1   : > { %v6373_v28 = vmax.f32 %v6357_v14, 0.0 }
 0x5c2   : > { %v6246_v53 = vpop.f32.mrf.mxu1  ;;  %v6303_v45 = vpop.f32.mrf.mxu2 }
 0x5c3   : > { %6389 = vst [vmem:[%s8646_s21 + $0x48] sm:$0xff] %v6373_v28  ;;  %v6247_v1 = vadd.f32 %v6246_v53, %v6186_v52 }
 0x5ca   : > { %v6248_v13 = vpop.f32.mrf.mxu1  ;;  %v6304_v16 = vpop.f32.mrf.mxu2 }
 0x5cb   : > { %v6305_v2 = vadd.f32 %v6304_v16, %v6244_v15 }
 0x5cd   : > { %v6338_v60 = vmul.f32 %v10940_v59, %v6305_v2 }
 0x5cf   : > { %v6358_v58 = vadd.f32 %v10947_v10, %v6338_v60 }
 0x5d1   : > { %v6374_v3 = vmax.f32 %v6358_v58, 0.0 }
 0x5d2   : > { %v6250_v4 = vpop.f32.mrf.mxu1  ;;  %v6307_v42 = vpop.f32.mrf.mxu2 }
 0x5d3   : > { %6390 = vst [vmem:[%s8646_s21 + $0x50] sm:$0xff] %v6374_v3  ;;  %v6308_v40 = vadd.f32 %v6307_v42, %v6247_v1  ;;  %v6251_v44 = vadd.f32 %v6250_v4, %v6190_v33 }
 0x5d5   : > { %v6339_v56 = vmul.f32 %v10940_v59, %v6308_v40 }
 0x5d7   : > { %v6359_v49 = vadd.f32 %v10947_v10, %v6339_v56 }
 0x5d9   : > { %v6375_v21 = vmax.f32 %v6359_v49, 0.0 }
 0x5da   : > { %v6252_v30 = vpop.f32.mrf.mxu1  ;;  %v6309_v17 = vpop.f32.mrf.mxu2 }
 0x5db   : > { %6391 = vst [vmem:[%s8646_s21 + $0x58] sm:$0xff] %v6375_v21  ;;  %v6253_v0 = vadd.f32 %v6252_v30, %v6192_v6 }
 0x5e2   : > { %v6255_v18 = vpop.f32.mrf.mxu1  ;;  %v6311_v9 = vpop.f32.mrf.mxu2 }
 0x5e3   : > { %v6312_v57 = vadd.f32 %v6311_v9, %v6251_v44 }
 0x5e5   : > { %v6340_v47 = vmul.f32 %v10940_v59, %v6312_v57 }
 0x5e7   : > { %v6360_v24 = vadd.f32 %v10947_v10, %v6340_v47 }
 0x5e9   : > { %v6376_v39 = vmax.f32 %v6360_v24, 0.0 }
 0x5ea   : > { %v6256_v22 = vpop.f32.mrf.mxu1  ;;  %v6313_v34 = vpop.f32.mrf.mxu2 }
 0x5eb   : > { %6392 = vst [vmem:[%s8646_s21 + $0x60] sm:$0xff] %v6376_v39  ;;  %v6314_v5 = vadd.f32 %v6313_v34, %v6253_v0  ;;  %v6257_v19 = vadd.f32 %v6256_v22, %v6196_v54 }
 0x5ed   : > { %v6341_v23 = vmul.f32 %v10940_v59, %v6314_v5 }
 0x5ef   : > { %v6361_v20 = vadd.f32 %v10947_v10, %v6341_v23 }
 0x5f1   : > { %v6377_v8 = vmax.f32 %v6361_v20, 0.0 }
 0x5f2   : > { %v6259_v31 = vpop.f32.mrf.mxu1  ;;  %v6316_v48 = vpop.f32.mrf.mxu2 }
 0x5f3   : > { %6393 = vst [vmem:[%s8646_s21 + $0x68] sm:$0xff] %v6377_v8  ;;  %v6260_v63 = vadd.f32 %v6259_v31, %v10942_v35 }
 0x5fa   : > { %v6261_v61 = vpop.f32.mrf.mxu1  ;;  %v6317_v29 = vpop.f32.mrf.mxu2 }
 0x5fb   : > { %v6318_v27 = vadd.f32 %v6317_v29, %v6257_v19 }
 0x5fd   : > { %v6342_v7 = vmul.f32 %v10940_v59, %v6318_v27 }
 0x5ff   : > { %v6362_v51 = vadd.f32 %v10947_v10, %v6342_v7 }
 0x601   : > { %v6378_v36 = vmax.f32 %v6362_v51, 0.0 }
 0x602   : > { %v6320_v25 = vpop.f32.mrf.mxu2 }
 0x603   : > { %6394 = vst [vmem:[%s8646_s21 + $0x70] sm:$0xff] %v6378_v36  ;;  %v6321_v38 = vadd.f32 %v6320_v25, %v6260_v63 }
 0x605   : > { %v6343_v50 = vmul.f32 %v10940_v59, %v6321_v38 }
 0x607   : > { %v6363_v43 = vadd.f32 %v10947_v10, %v6343_v50 }
 0x609   : > { %v6379_v37 = vmax.f32 %v6363_v43, 0.0 }
 0x60a   : > { %v6322_v26 = vpop.f32.mrf.mxu2 }
 0x60b   : > { %6395 = vst [vmem:[%s8646_s21 + $0x78] sm:$0xff] %v6379_v37 }
 0x60c PF: > { %s17_s28 = sadd.s32 1, %s8566_s28   ;;  %s11169_s12 = sld [smem:[#allocation8_spill]] }
 0x60d   : > { %p14_p7 = scmp.ge.s32.totalorder %s17_s28, 6   ;;  %s11170_s13 = sld [smem:[#allocation9_spill]] }
 0x60e   : > { %s11171_s24 = smov %s8558_s26  ;;  %s11172_s25 = smov %s8562_s27 }
 0x60f   :  { %16 = sbr.rel (!%p14_p7) target bundleno = 3 (0x3), region = 104 }
 0x612   : > { %s11173_s26 = smov %s11169_s12 }
 0x613   : > { %s11174_s27 = smov %s11170_s13 }
 0x614   :  { %6428 = vsyncmov [#allocation5] }
 0x617   :  { %s6429_s21 = vpop.sfrf %6428 }
 0x618   :  { %p8056_p8 = scmp.ne.s32.totalorder %s6429_s21, 0 }
 0x61a   :  { %6433 = shalt.err (%p8056_p8)  }

</bundles_post_ra>
